<compile_context>
chip_gen: v7x
topology: tpu7x:2x2x1
jax: 0.10.0
libtpu: 0.0.40
codegen_flags: <defaults>
</compile_context>

<pallas_src>
import functools

import jax
import jax.numpy as jnp
from jax import lax
from jax.experimental import pallas as pl
from jax.experimental.pallas import tpu as pltpu


# ----------------------------------------------------------------------------
# Helpers
# ----------------------------------------------------------------------------
def _round_up(n, m):
    return ((n + m - 1) // m) * m


_VMEM = pl.BlockSpec(memory_space=pltpu.MemorySpace.VMEM)


# ----------------------------------------------------------------------------
# Fused decoder kernel: num_layers LSTM layers + final Linear, one pallas_call.
# ----------------------------------------------------------------------------
def make_decoder_kernel(num_layers):
    """Builds a kernel with signature:

      kernel(x, wih_0, whh_0, b_0, ..., wih_{L-1}, whh_{L-1}, b_{L-1},
             fc_w, fc_b,                 # inputs
             out,                        # output (Bp, Op)
             g_sc, seq_sc, h_sc, c_sc)   # VMEM scratch

      x      : (T, Bp, Dp)   bf16, time-major, padded
      wih_l  : (Dp|Hp, 4Hp)  bf16, gate blocks [i|f|g|o], each Hp wide
      whh_l  : (Hp, 4Hp)     bf16
      b_l    : (1, 4Hp)      f32  (b_ih + b_hh)
      fc_w   : (Hp, Op)      bf16
      fc_b   : (1, Op)       f32
      g_sc   : (T, Bp, 4Hp)  f32  precomputed ih-gates for all timesteps
      seq_sc : (T, Bp, Hp)   f32  inter-layer activation sequence (VMEM only)
      h_sc/c_sc: (Bp, Hp)    f32  recurrent state
    """

    def kernel(*refs):
        n_in = 1 + 3 * num_layers + 2
        x_ref = refs[0]
        fcw_ref = refs[n_in - 2]
        fcb_ref = refs[n_in - 1]
        out_ref = refs[n_in]
        g_sc, seq_sc, h_sc, c_sc = refs[n_in + 1:]

        T, Bp, _ = x_ref.shape
        Hp = h_sc.shape[-1]

        for layer in range(num_layers):
            wih_ref = refs[1 + 3 * layer]
            whh_ref = refs[2 + 3 * layer]
            b_ref = refs[3 + 3 * layer]

            # ---- 1) Batched input projection: one big MXU matmul across all
            #         timesteps, bias folded in here (hoisted out of the loop).
            if layer == 0:
                xin = x_ref[...].reshape(T * Bp, x_ref.shape[-1])
            else:
                xin = seq_sc[...].reshape(T * Bp, Hp)
            g_sc[...] = (
                jnp.dot(
                    xin.astype(jnp.bfloat16),
                    wih_ref[...],
                    preferred_element_type=jnp.float32,
                )
                + b_ref[...]
            ).reshape(T, Bp, 4 * Hp)

            # ---- 2) Serial recurrence (the only part that must be a loop).
            h_sc[...] = jnp.zeros(h_sc.shape, h_sc.dtype)
            c_sc[...] = jnp.zeros(c_sc.shape, c_sc.dtype)

            write_seq = layer < num_layers - 1  # last layer: only h_{T-1} used

            def step(t, carry, whh_ref=whh_ref, write_seq=write_seq):
                gates = g_sc[t] + jnp.dot(
                    h_sc[...].astype(jnp.bfloat16),
                    whh_ref[...],
                    preferred_element_type=jnp.float32,
                )  # (Bp, 4Hp), gate slices are 128-lane aligned
                i_g = jax.nn.sigmoid(gates[:, 0 * Hp:1 * Hp])
                f_g = jax.nn.sigmoid(gates[:, 1 * Hp:2 * Hp])
                g_g = jnp.tanh(gates[:, 2 * Hp:3 * Hp])
                o_g = jax.nn.sigmoid(gates[:, 3 * Hp:4 * Hp])

                c_new = f_g * c_sc[...] + i_g * g_g
                h_new = o_g * jnp.tanh(c_new)

                c_sc[...] = c_new
                h_sc[...] = h_new
                if write_seq:
                    seq_sc[t] = h_new
                return carry

            lax.fori_loop(0, T, step, 0, unroll=True)

        # ---- 3) Fused final Linear on the last hidden state (lane-dense out).
        out_ref[...] = (
            jnp.dot(
                h_sc[...].astype(jnp.bfloat16),
                fcw_ref[...],
                preferred_element_type=jnp.float32,
            )
            + fcb_ref[...]
        )

    return kernel


# ----------------------------------------------------------------------------
# Wrapper
# ----------------------------------------------------------------------------
@functools.partial(jax.jit, static_argnames=("output_dim",))
def decoder_forward(x, packed, output_dim, encoder_output=None):
    """Equivalent of Decoder.forward(x, encoder_output).

    x: (B, T, input_dim) float32, batch_first (PyTorch convention).
    encoder_output is accepted but unused, exactly like the PyTorch module.
    Returns (B, output_dim) float32.
    """
    del encoder_output  # unused by the original module's forward
    B, T, D = x.shape
    Dp = packed["lstm"][0]["wih"].shape[0]
    Hp = packed["lstm"][0]["whh"].shape[0]
    Op = packed["fc_w"].shape[1]
    Bp = _round_up(max(B, 8), 8)
    num_layers = len(packed["lstm"])

    # Pad (batch, feature) and go time-major; the padding op materializes the
    # array anyway, so the transpose is folded into the same single XLA op.
    x_p = (
        jnp.zeros((T, Bp, Dp), jnp.float32)
        .at[:, :B, :D]
        .set(jnp.transpose(x, (1, 0, 2)))
        .astype(jnp.bfloat16)
    )

    inputs = [x_p]
    for layer in packed["lstm"]:
        inputs += [layer["wih"], layer["whh"], layer["b"]]
    inputs += [packed["fc_w"], packed["fc_b"]]

    out_p = pl.pallas_call(
        make_decoder_kernel(num_layers),
        out_shape=jax.ShapeDtypeStruct((Bp, Op), jnp.float32),
        in_specs=[_VMEM] * len(inputs),
        out_specs=_VMEM,
        scratch_shapes=[
            pltpu.VMEM((T, Bp, 4 * Hp), jnp.float32),  # ih-gates, all timesteps
            pltpu.VMEM((T, Bp, Hp), jnp.float32),      # inter-layer sequence
            pltpu.VMEM((Bp, Hp), jnp.float32),         # h
            pltpu.VMEM((Bp, Hp), jnp.float32),         # c
        ],
    )(*inputs)

    return out_p[:B, :output_dim]


# ----------------------------------------------------------------------------
# Parameter init (PyTorch LSTM/Linear shapes) + packing into padded bf16 layout
# ----------------------------------------------------------------------------
def init_raw_params(key, input_dim, hidden_dim, output_dim, num_layers):
    k = 1.0 / jnp.sqrt(hidden_dim)
    lstm = []
    for layer in range(num_layers):
        in_dim = input_dim if layer == 0 else hidden_dim
        key, k1, k2, k3, k4 = jax.random.split(key, 5)
        lstm.append({
            "w_ih": jax.random.uniform(k1, (4 * hidden_dim, in_dim), jnp.float32, -k, k),
            "w_hh": jax.random.uniform(k2, (4 * hidden_dim, hidden_dim), jnp.float32, -k, k),
            "b_ih": jax.random.uniform(k3, (4 * hidden_dim,), jnp.float32, -k, k),
            "b_hh": jax.random.uniform(k4, (4 * hidden_dim,), jnp.float32, -k, k),
        })
    key, k5, k6 = jax.random.split(key, 3)
    fc_w = jax.random.uniform(k5, (output_dim, hidden_dim), jnp.float32, -k, k)
    fc_b = jax.random.uniform(k6, (output_dim,), jnp.float32, -k, k)
    return {"lstm": lstm, "fc_w": fc_w, "fc_b": fc_b}


def _pack_gate_matrix(w_t, in_p, H, Hp):
    """(in_dim, 4H) with gate blocks [i|f|g|o] -> (in_p, 4Hp), each block padded."""
    in_dim = w_t.shape[0]
    out = jnp.zeros((in_p, 4 * Hp), jnp.float32)
    for g in range(4):
        out = out.at[:in_dim, g * Hp:g * Hp + H].set(w_t[:, g * H:(g + 1) * H])
    return out


def _pack_gate_bias(b, H, Hp):
    out = jnp.zeros((1, 4 * Hp), jnp.float32)
    for g in range(4):
        out = out.at[0, g * Hp:g * Hp + H].set(b[g * H:(g + 1) * H])
    return out


def pack_params(raw, input_dim, hidden_dim, output_dim):
    """Pad to MXU/vreg friendly sizes and cast matmul weights to bf16.

    Padding is exact: zero weight rows/cols and zero biases keep the padded
    hidden units at h == c == 0 for all time, so they never contribute.
    """
    Dp = _round_up(input_dim, 128)
    Hp = _round_up(hidden_dim, 128)
    Op = _round_up(output_dim, 128)
    lstm = []
    for i, layer in enumerate(raw["lstm"]):
        in_p = Dp if i == 0 else Hp
        lstm.append({
            "wih": _pack_gate_matrix(layer["w_ih"].T, in_p, hidden_dim, Hp).astype(jnp.bfloat16),
            "whh": _pack_gate_matrix(layer["w_hh"].T, Hp, hidden_dim, Hp).astype(jnp.bfloat16),
            "b": _pack_gate_bias(layer["b_ih"] + layer["b_hh"], hidden_dim, Hp),
        })
    fc_w = (
        jnp.zeros((Hp, Op), jnp.float32)
        .at[:hidden_dim, :output_dim]
        .set(raw["fc_w"].T)
        .astype(jnp.bfloat16)
    )
    fc_b = jnp.zeros((1, Op), jnp.float32).at[0, :output_dim].set(raw["fc_b"])
    return {"lstm": lstm, "fc_w": fc_w, "fc_b": fc_b}


# ----------------------------------------------------------------------------
# Pure-JAX reference mirroring torch.nn.LSTM semantics with the same
# bf16-operand / f32-accumulation matmul policy as the kernel.
# ----------------------------------------------------------------------------
def decoder_reference(x, raw):
    B = x.shape[0]
    h_seq = x
    for layer in raw["lstm"]:
        H = layer["w_hh"].shape[1]
        w_ih_t = layer["w_ih"].T.astype(jnp.bfloat16)
        w_hh_t = layer["w_hh"].T.astype(jnp.bfloat16)
        b = (layer["b_ih"] + layer["b_hh"])[None, :]
        h0 = jnp.zeros((B, H), jnp.float32)
        c0 = jnp.zeros((B, H), jnp.float32)

        def step(carry, x_t, w_ih_t=w_ih_t, w_hh_t=w_hh_t, b=b, H=H):
            h, c = carry
            gates = (
                jnp.dot(x_t.astype(jnp.bfloat16), w_ih_t, preferred_element_type=jnp.float32)
                + jnp.dot(h.astype(jnp.bfloat16), w_hh_t, preferred_element_type=jnp.float32)
                + b
            )
            i = jax.nn.sigmoid(gates[:, :H])
            f = jax.nn.sigmoid(gates[:, H:2 * H])
            g = jnp.tanh(gates[:, 2 * H:3 * H])
            o = jax.nn.sigmoid(gates[:, 3 * H:])
            c = f * c + i * g
            h = o * jnp.tanh(c)
            return (h, c), h

        _, ys = lax.scan(step, (h0, c0), jnp.transpose(h_seq, (1, 0, 2)))
        h_seq = jnp.transpose(ys, (1, 0, 2))

    h_last = h_seq[:, -1, :]
    return (
        jnp.dot(
            h_last.astype(jnp.bfloat16),
            raw["fc_w"].T.astype(jnp.bfloat16),
            preferred_element_type=jnp.float32,
        )
        + raw["fc_b"][None, :]
    )


# ----------------------------------------------------------------------------
if __name__ == "__main__":
    B, T = 2, 8
    input_dim, hidden_dim, output_dim, num_layers = 16, 32, 8, 2

    key = jax.random.PRNGKey(0)
    key, kx, kp = jax.random.split(key, 3)
    x = jax.random.normal(kx, (B, T, input_dim), jnp.float32)
    encoder_output = jnp.zeros((B, T, hidden_dim), jnp.float32)  # unused (as in PyTorch)

    raw = init_raw_params(kp, input_dim, hidden_dim, output_dim, num_layers)
    packed = pack_params(raw, input_dim, hidden_dim, output_dim)

    out = decoder_forward(x, packed, output_dim=output_dim, encoder_output=encoder_output)
    out = jax.block_until_ready(out)

    ref = decoder_reference(x, raw)
    assert out.shape == (B, output_dim)
    assert jnp.allclose(out, ref, atol=2e-3, rtol=2e-3), (
        f"max abs diff {jnp.max(jnp.abs(out - ref))}"
    )

    print("KERNEL_OK")
</pallas_src>

<mosaic_0001>
module attributes {stable_mosaic.version = 11 : i64} {
  func.func @kernel(%arg0: memref<8x8x128xbf16, #tpu.memory_space<vmem>>, %arg1: memref<128x512xbf16, #tpu.memory_space<vmem>>, %arg2: memref<128x512xbf16, #tpu.memory_space<vmem>>, %arg3: memref<1x512xf32, #tpu.memory_space<vmem>>, %arg4: memref<128x512xbf16, #tpu.memory_space<vmem>>, %arg5: memref<128x512xbf16, #tpu.memory_space<vmem>>, %arg6: memref<1x512xf32, #tpu.memory_space<vmem>>, %arg7: memref<128x128xbf16, #tpu.memory_space<vmem>>, %arg8: memref<1x128xf32, #tpu.memory_space<vmem>>, %arg9: memref<8x128xf32, #tpu.memory_space<vmem>>, %arg10: memref<8x8x512xf32, #tpu.memory_space<vmem>>, %arg11: memref<8x8x128xf32, #tpu.memory_space<vmem>>, %arg12: memref<8x128xf32, #tpu.memory_space<vmem>>, %arg13: memref<8x128xf32, #tpu.memory_space<vmem>>) attributes {dimension_semantics = [], scalar_prefetch = 0 : i64, scratch_operands = 4 : i64, tpu.core_type = #tpu.core_type<tc>} {
    %c0 = arith.constant 0 : index
    %c0_0 = arith.constant 0 : index
    %c0_1 = arith.constant 0 : index
    %0 = vector.load %arg0[%c0, %c0_0, %c0_1] : memref<8x8x128xbf16, #tpu.memory_space<vmem>>, vector<8x8x128xbf16>
    %1 = vector.shape_cast %0 : vector<8x8x128xbf16> to vector<64x128xbf16>
    %c0_2 = arith.constant 0 : index
    %c0_3 = arith.constant 0 : index
    %2 = vector.load %arg1[%c0_2, %c0_3] : memref<128x512xbf16, #tpu.memory_space<vmem>>, vector<128x512xbf16>
    %cst = arith.constant dense<0.000000e+00> : vector<64x512xf32>
    %3 = tpu.matmul %1, %2, %cst {dimension_numbers = #tpu.dot_dimension_numbers<[1], [0], [0], [1], [0, 0, 1, 1], [], []>} : vector<64x128xbf16>, vector<128x512xbf16>, vector<64x512xf32> -> vector<64x512xf32>
    %c0_4 = arith.constant 0 : index
    %c0_5 = arith.constant 0 : index
    %4 = vector.load %arg3[%c0_4, %c0_5] : memref<1x512xf32, #tpu.memory_space<vmem>>, vector<1x512xf32>
    %5 = vector.broadcast %4 : vector<1x512xf32> to vector<64x512xf32>
    %6 = arith.addf %3, %5 : vector<64x512xf32>
    %7 = vector.shape_cast %6 : vector<64x512xf32> to vector<8x8x512xf32>
    %c0_6 = arith.constant 0 : index
    %c0_7 = arith.constant 0 : index
    %c0_8 = arith.constant 0 : index
    %8 = vector.load %arg10[%c0_6, %c0_7, %c0_8] : memref<8x8x512xf32, #tpu.memory_space<vmem>>, vector<8x8x512xf32>
    tpu.vector_store %arg10[%c0_6, %c0_7, %c0_8], %7 {strides = array<i32>} : memref<8x8x512xf32, #tpu.memory_space<vmem>>, vector<8x8x512xf32>,
    %cst_9 = arith.constant 0.000000e+00 : f32
    %9 = vector.broadcast %cst_9 : f32 to vector<8x128xf32>
    %c0_10 = arith.constant 0 : index
    %c0_11 = arith.constant 0 : index
    %10 = vector.load %arg12[%c0_10, %c0_11] : memref<8x128xf32, #tpu.memory_space<vmem>>, vector<8x128xf32>
    tpu.vector_store %arg12[%c0_10, %c0_11], %9 {strides = array<i32>} : memref<8x128xf32, #tpu.memory_space<vmem>>, vector<8x128xf32>,
    %cst_12 = arith.constant 0.000000e+00 : f32
    %11 = vector.broadcast %cst_12 : f32 to vector<8x128xf32>
    %c0_13 = arith.constant 0 : index
    %c0_14 = arith.constant 0 : index
    %12 = vector.load %arg13[%c0_13, %c0_14] : memref<8x128xf32, #tpu.memory_space<vmem>>, vector<8x128xf32>
    tpu.vector_store %arg13[%c0_13, %c0_14], %11 {strides = array<i32>} : memref<8x128xf32, #tpu.memory_space<vmem>>, vector<8x128xf32>,
    %c0_i32 = arith.constant 0 : i32
    %13 = arith.index_cast %c0_i32 : i32 to index
    %c0_15 = arith.constant 0 : index
    %c0_16 = arith.constant 0 : index
    %14 = vector.load %arg10[%13, %c0_15, %c0_16] : memref<8x8x512xf32, #tpu.memory_space<vmem>>, vector<1x8x512xf32>
    %15 = vector.shape_cast %14 : vector<1x8x512xf32> to vector<8x512xf32>
    %c0_17 = arith.constant 0 : index
    %c0_18 = arith.constant 0 : index
    %16 = vector.load %arg12[%c0_17, %c0_18] : memref<8x128xf32, #tpu.memory_space<vmem>>, vector<8x128xf32>
    %17 = arith.truncf %16 : vector<8x128xf32> to vector<8x128xbf16>
    %c0_19 = arith.constant 0 : index
    %c0_20 = arith.constant 0 : index
    %18 = vector.load %arg2[%c0_19, %c0_20] : memref<128x512xbf16, #tpu.memory_space<vmem>>, vector<128x512xbf16>
    %cst_21 = arith.constant dense<0.000000e+00> : vector<8x512xf32>
    %19 = tpu.matmul %17, %18, %cst_21 {dimension_numbers = #tpu.dot_dimension_numbers<[1], [0], [0], [1], [0, 0, 1, 1], [], []>} : vector<8x128xbf16>, vector<128x512xbf16>, vector<8x512xf32> -> vector<8x512xf32>
    %20 = arith.addf %15, %19 : vector<8x512xf32>
    %21 = vector.extract_strided_slice %20 {offsets = [0, 0], sizes = [8, 128], strides = [1, 1]} : vector<8x512xf32> to vector<8x128xf32>
    %22 = arith.negf %21 : vector<8x128xf32>
    %23 = math.exp %22 : vector<8x128xf32>
    %cst_22 = arith.constant 1.000000e+00 : f32
    %24 = vector.broadcast %cst_22 : f32 to vector<8x128xf32>
    %25 = arith.addf %24, %23 : vector<8x128xf32>
    %26 = arith.divf %24, %25 : vector<8x128xf32>
    %27 = vector.extract_strided_slice %20 {offsets = [0, 128], sizes = [8, 128], strides = [1, 1]} : vector<8x512xf32> to vector<8x128xf32>
    %28 = arith.negf %27 : vector<8x128xf32>
    %29 = math.exp %28 : vector<8x128xf32>
    %cst_23 = arith.constant 1.000000e+00 : f32
    %30 = vector.broadcast %cst_23 : f32 to vector<8x128xf32>
    %31 = arith.addf %30, %29 : vector<8x128xf32>
    %32 = arith.divf %30, %31 : vector<8x128xf32>
    %33 = vector.extract_strided_slice %20 {offsets = [0, 256], sizes = [8, 128], strides = [1, 1]} : vector<8x512xf32> to vector<8x128xf32>
    %34 = math.tanh %33 : vector<8x128xf32>
    %35 = vector.extract_strided_slice %20 {offsets = [0, 384], sizes = [8, 128], strides = [1, 1]} : vector<8x512xf32> to vector<8x128xf32>
    %36 = arith.negf %35 : vector<8x128xf32>
    %37 = math.exp %36 : vector<8x128xf32>
    %cst_24 = arith.constant 1.000000e+00 : f32
    %38 = vector.broadcast %cst_24 : f32 to vector<8x128xf32>
    %39 = arith.addf %38, %37 : vector<8x128xf32>
    %40 = arith.divf %38, %39 : vector<8x128xf32>
    %c0_25 = arith.constant 0 : index
    %c0_26 = arith.constant 0 : index
    %41 = vector.load %arg13[%c0_25, %c0_26] : memref<8x128xf32, #tpu.memory_space<vmem>>, vector<8x128xf32>
    %42 = arith.mulf %32, %41 : vector<8x128xf32>
    %43 = arith.mulf %26, %34 : vector<8x128xf32>
    %44 = arith.addf %42, %43 : vector<8x128xf32>
    %45 = math.tanh %44 : vector<8x128xf32>
    %46 = arith.mulf %40, %45 : vector<8x128xf32>
    %c0_27 = arith.constant 0 : index
    %c0_28 = arith.constant 0 : index
    %47 = vector.load %arg13[%c0_27, %c0_28] : memref<8x128xf32, #tpu.memory_space<vmem>>, vector<8x128xf32>
    tpu.vector_store %arg13[%c0_27, %c0_28], %44 {strides = array<i32>} : memref<8x128xf32, #tpu.memory_space<vmem>>, vector<8x128xf32>,
    %c0_29 = arith.constant 0 : index
    %c0_30 = arith.constant 0 : index
    %48 = vector.load %arg12[%c0_29, %c0_30] : memref<8x128xf32, #tpu.memory_space<vmem>>, vector<8x128xf32>
    tpu.vector_store %arg12[%c0_29, %c0_30], %46 {strides = array<i32>} : memref<8x128xf32, #tpu.memory_space<vmem>>, vector<8x128xf32>,
    %49 = arith.index_cast %c0_i32 : i32 to index
    %c0_31 = arith.constant 0 : index
    %c0_32 = arith.constant 0 : index
    %50 = vector.load %arg11[%49, %c0_31, %c0_32] : memref<8x8x128xf32, #tpu.memory_space<vmem>>, vector<1x8x128xf32>
    %51 = vector.shape_cast %50 : vector<1x8x128xf32> to vector<8x128xf32>
    %52 = vector.shape_cast %46 : vector<8x128xf32> to vector<1x8x128xf32>
    tpu.vector_store %arg11[%49, %c0_31, %c0_32], %52 {strides = array<i32>} : memref<8x8x128xf32, #tpu.memory_space<vmem>>, vector<1x8x128xf32>,
    %c1_i32 = arith.constant 1 : i32
    %53 = arith.index_cast %c1_i32 : i32 to index
    %c0_33 = arith.constant 0 : index
    %c0_34 = arith.constant 0 : index
    %54 = vector.load %arg10[%53, %c0_33, %c0_34] : memref<8x8x512xf32, #tpu.memory_space<vmem>>, vector<1x8x512xf32>
    %55 = vector.shape_cast %54 : vector<1x8x512xf32> to vector<8x512xf32>
    %c0_35 = arith.constant 0 : index
    %c0_36 = arith.constant 0 : index
    %56 = vector.load %arg12[%c0_35, %c0_36] : memref<8x128xf32, #tpu.memory_space<vmem>>, vector<8x128xf32>
    %57 = arith.truncf %56 : vector<8x128xf32> to vector<8x128xbf16>
    %c0_37 = arith.constant 0 : index
    %c0_38 = arith.constant 0 : index
    %58 = vector.load %arg2[%c0_37, %c0_38] : memref<128x512xbf16, #tpu.memory_space<vmem>>, vector<128x512xbf16>
    %cst_39 = arith.constant dense<0.000000e+00> : vector<8x512xf32>
    %59 = tpu.matmul %57, %58, %cst_39 {dimension_numbers = #tpu.dot_dimension_numbers<[1], [0], [0], [1], [0, 0, 1, 1], [], []>} : vector<8x128xbf16>, vector<128x512xbf16>, vector<8x512xf32> -> vector<8x512xf32>
    %60 = arith.addf %55, %59 : vector<8x512xf32>
    %61 = vector.extract_strided_slice %60 {offsets = [0, 0], sizes = [8, 128], strides = [1, 1]} : vector<8x512xf32> to vector<8x128xf32>
    %62 = arith.negf %61 : vector<8x128xf32>
    %63 = math.exp %62 : vector<8x128xf32>
    %cst_40 = arith.constant 1.000000e+00 : f32
    %64 = vector.broadcast %cst_40 : f32 to vector<8x128xf32>
    %65 = arith.addf %64, %63 : vector<8x128xf32>
    %66 = arith.divf %64, %65 : vector<8x128xf32>
    %67 = vector.extract_strided_slice %60 {offsets = [0, 128], sizes = [8, 128], strides = [1, 1]} : vector<8x512xf32> to vector<8x128xf32>
    %68 = arith.negf %67 : vector<8x128xf32>
    %69 = math.exp %68 : vector<8x128xf32>
    %cst_41 = arith.constant 1.000000e+00 : f32
    %70 = vector.broadcast %cst_41 : f32 to vector<8x128xf32>
    %71 = arith.addf %70, %69 : vector<8x128xf32>
    %72 = arith.divf %70, %71 : vector<8x128xf32>
    %73 = vector.extract_strided_slice %60 {offsets = [0, 256], sizes = [8, 128], strides = [1, 1]} : vector<8x512xf32> to vector<8x128xf32>
    %74 = math.tanh %73 : vector<8x128xf32>
    %75 = vector.extract_strided_slice %60 {offsets = [0, 384], sizes = [8, 128], strides = [1, 1]} : vector<8x512xf32> to vector<8x128xf32>
    %76 = arith.negf %75 : vector<8x128xf32>
    %77 = math.exp %76 : vector<8x128xf32>
    %cst_42 = arith.constant 1.000000e+00 : f32
    %78 = vector.broadcast %cst_42 : f32 to vector<8x128xf32>
    %79 = arith.addf %78, %77 : vector<8x128xf32>
    %80 = arith.divf %78, %79 : vector<8x128xf32>
    %c0_43 = arith.constant 0 : index
    %c0_44 = arith.constant 0 : index
    %81 = vector.load %arg13[%c0_43, %c0_44] : memref<8x128xf32, #tpu.memory_space<vmem>>, vector<8x128xf32>
    %82 = arith.mulf %72, %81 : vector<8x128xf32>
    %83 = arith.mulf %66, %74 : vector<8x128xf32>
    %84 = arith.addf %82, %83 : vector<8x128xf32>
    %85 = math.tanh %84 : vector<8x128xf32>
    %86 = arith.mulf %80, %85 : vector<8x128xf32>
    %c0_45 = arith.constant 0 : index
    %c0_46 = arith.constant 0 : index
    %87 = vector.load %arg13[%c0_45, %c0_46] : memref<8x128xf32, #tpu.memory_space<vmem>>, vector<8x128xf32>
    tpu.vector_store %arg13[%c0_45, %c0_46], %84 {strides = array<i32>} : memref<8x128xf32, #tpu.memory_space<vmem>>, vector<8x128xf32>,
    %c0_47 = arith.constant 0 : index
    %c0_48 = arith.constant 0 : index
    %88 = vector.load %arg12[%c0_47, %c0_48] : memref<8x128xf32, #tpu.memory_space<vmem>>, vector<8x128xf32>
    tpu.vector_store %arg12[%c0_47, %c0_48], %86 {strides = array<i32>} : memref<8x128xf32, #tpu.memory_space<vmem>>, vector<8x128xf32>,
    %89 = arith.index_cast %c1_i32 : i32 to index
    %c0_49 = arith.constant 0 : index
    %c0_50 = arith.constant 0 : index
    %90 = vector.load %arg11[%89, %c0_49, %c0_50] : memref<8x8x128xf32, #tpu.memory_space<vmem>>, vector<1x8x128xf32>
    %91 = vector.shape_cast %90 : vector<1x8x128xf32> to vector<8x128xf32>
    %92 = vector.shape_cast %86 : vector<8x128xf32> to vector<1x8x128xf32>
    tpu.vector_store %arg11[%89, %c0_49, %c0_50], %92 {strides = array<i32>} : memref<8x8x128xf32, #tpu.memory_space<vmem>>, vector<1x8x128xf32>,
    %c2_i32 = arith.constant 2 : i32
    %93 = arith.index_cast %c2_i32 : i32 to index
    %c0_51 = arith.constant 0 : index
    %c0_52 = arith.constant 0 : index
    %94 = vector.load %arg10[%93, %c0_51, %c0_52] : memref<8x8x512xf32, #tpu.memory_space<vmem>>, vector<1x8x512xf32>
    %95 = vector.shape_cast %94 : vector<1x8x512xf32> to vector<8x512xf32>
    %c0_53 = arith.constant 0 : index
    %c0_54 = arith.constant 0 : index
    %96 = vector.load %arg12[%c0_53, %c0_54] : memref<8x128xf32, #tpu.memory_space<vmem>>, vector<8x128xf32>
    %97 = arith.truncf %96 : vector<8x128xf32> to vector<8x128xbf16>
    %c0_55 = arith.constant 0 : index
    %c0_56 = arith.constant 0 : index
    %98 = vector.load %arg2[%c0_55, %c0_56] : memref<128x512xbf16, #tpu.memory_space<vmem>>, vector<128x512xbf16>
    %cst_57 = arith.constant dense<0.000000e+00> : vector<8x512xf32>
    %99 = tpu.matmul %97, %98, %cst_57 {dimension_numbers = #tpu.dot_dimension_numbers<[1], [0], [0], [1], [0, 0, 1, 1], [], []>} : vector<8x128xbf16>, vector<128x512xbf16>, vector<8x512xf32> -> vector<8x512xf32>
    %100 = arith.addf %95, %99 : vector<8x512xf32>
    %101 = vector.extract_strided_slice %100 {offsets = [0, 0], sizes = [8, 128], strides = [1, 1]} : vector<8x512xf32> to vector<8x128xf32>
    %102 = arith.negf %101 : vector<8x128xf32>
    %103 = math.exp %102 : vector<8x128xf32>
    %cst_58 = arith.constant 1.000000e+00 : f32
    %104 = vector.broadcast %cst_58 : f32 to vector<8x128xf32>
    %105 = arith.addf %104, %103 : vector<8x128xf32>
    %106 = arith.divf %104, %105 : vector<8x128xf32>
    %107 = vector.extract_strided_slice %100 {offsets = [0, 128], sizes = [8, 128], strides = [1, 1]} : vector<8x512xf32> to vector<8x128xf32>
    %108 = arith.negf %107 : vector<8x128xf32>
    %109 = math.exp %108 : vector<8x128xf32>
    %cst_59 = arith.constant 1.000000e+00 : f32
    %110 = vector.broadcast %cst_59 : f32 to vector<8x128xf32>
    %111 = arith.addf %110, %109 : vector<8x128xf32>
    %112 = arith.divf %110, %111 : vector<8x128xf32>
    %113 = vector.extract_strided_slice %100 {offsets = [0, 256], sizes = [8, 128], strides = [1, 1]} : vector<8x512xf32> to vector<8x128xf32>
    %114 = math.tanh %113 : vector<8x128xf32>
    %115 = vector.extract_strided_slice %100 {offsets = [0, 384], sizes = [8, 128], strides = [1, 1]} : vector<8x512xf32> to vector<8x128xf32>
    %116 = arith.negf %115 : vector<8x128xf32>
    %117 = math.exp %116 : vector<8x128xf32>
    %cst_60 = arith.constant 1.000000e+00 : f32
    %118 = vector.broadcast %cst_60 : f32 to vector<8x128xf32>
    %119 = arith.addf %118, %117 : vector<8x128xf32>
    %120 = arith.divf %118, %119 : vector<8x128xf32>
    %c0_61 = arith.constant 0 : index
    %c0_62 = arith.constant 0 : index
    %121 = vector.load %arg13[%c0_61, %c0_62] : memref<8x128xf32, #tpu.memory_space<vmem>>, vector<8x128xf32>
    %122 = arith.mulf %112, %121 : vector<8x128xf32>
    %123 = arith.mulf %106, %114 : vector<8x128xf32>
    %124 = arith.addf %122, %123 : vector<8x128xf32>
    %125 = math.tanh %124 : vector<8x128xf32>
    %126 = arith.mulf %120, %125 : vector<8x128xf32>
    %c0_63 = arith.constant 0 : index
    %c0_64 = arith.constant 0 : index
    %127 = vector.load %arg13[%c0_63, %c0_64] : memref<8x128xf32, #tpu.memory_space<vmem>>, vector<8x128xf32>
    tpu.vector_store %arg13[%c0_63, %c0_64], %124 {strides = array<i32>} : memref<8x128xf32, #tpu.memory_space<vmem>>, vector<8x128xf32>,
    %c0_65 = arith.constant 0 : index
    %c0_66 = arith.constant 0 : index
    %128 = vector.load %arg12[%c0_65, %c0_66] : memref<8x128xf32, #tpu.memory_space<vmem>>, vector<8x128xf32>
    tpu.vector_store %arg12[%c0_65, %c0_66], %126 {strides = array<i32>} : memref<8x128xf32, #tpu.memory_space<vmem>>, vector<8x128xf32>,
    %129 = arith.index_cast %c2_i32 : i32 to index
    %c0_67 = arith.constant 0 : index
    %c0_68 = arith.constant 0 : index
    %130 = vector.load %arg11[%129, %c0_67, %c0_68] : memref<8x8x128xf32, #tpu.memory_space<vmem>>, vector<1x8x128xf32>
    %131 = vector.shape_cast %130 : vector<1x8x128xf32> to vector<8x128xf32>
    %132 = vector.shape_cast %126 : vector<8x128xf32> to vector<1x8x128xf32>
    tpu.vector_store %arg11[%129, %c0_67, %c0_68], %132 {strides = array<i32>} : memref<8x8x128xf32, #tpu.memory_space<vmem>>, vector<1x8x128xf32>,
    %c3_i32 = arith.constant 3 : i32
    %133 = arith.index_cast %c3_i32 : i32 to index
    %c0_69 = arith.constant 0 : index
    %c0_70 = arith.constant 0 : index
    %134 = vector.load %arg10[%133, %c0_69, %c0_70] : memref<8x8x512xf32, #tpu.memory_space<vmem>>, vector<1x8x512xf32>
    %135 = vector.shape_cast %134 : vector<1x8x512xf32> to vector<8x512xf32>
    %c0_71 = arith.constant 0 : index
    %c0_72 = arith.constant 0 : index
    %136 = vector.load %arg12[%c0_71, %c0_72] : memref<8x128xf32, #tpu.memory_space<vmem>>, vector<8x128xf32>
    %137 = arith.truncf %136 : vector<8x128xf32> to vector<8x128xbf16>
    %c0_73 = arith.constant 0 : index
    %c0_74 = arith.constant 0 : index
    %138 = vector.load %arg2[%c0_73, %c0_74] : memref<128x512xbf16, #tpu.memory_space<vmem>>, vector<128x512xbf16>
    %cst_75 = arith.constant dense<0.000000e+00> : vector<8x512xf32>
    %139 = tpu.matmul %137, %138, %cst_75 {dimension_numbers = #tpu.dot_dimension_numbers<[1], [0], [0], [1], [0, 0, 1, 1], [], []>} : vector<8x128xbf16>, vector<128x512xbf16>, vector<8x512xf32> -> vector<8x512xf32>
    %140 = arith.addf %135, %139 : vector<8x512xf32>
    %141 = vector.extract_strided_slice %140 {offsets = [0, 0], sizes = [8, 128], strides = [1, 1]} : vector<8x512xf32> to vector<8x128xf32>
    %142 = arith.negf %141 : vector<8x128xf32>
    %143 = math.exp %142 : vector<8x128xf32>
    %cst_76 = arith.constant 1.000000e+00 : f32
    %144 = vector.broadcast %cst_76 : f32 to vector<8x128xf32>
    %145 = arith.addf %144, %143 : vector<8x128xf32>
    %146 = arith.divf %144, %145 : vector<8x128xf32>
    %147 = vector.extract_strided_slice %140 {offsets = [0, 128], sizes = [8, 128], strides = [1, 1]} : vector<8x512xf32> to vector<8x128xf32>
    %148 = arith.negf %147 : vector<8x128xf32>
    %149 = math.exp %148 : vector<8x128xf32>
    %cst_77 = arith.constant 1.000000e+00 : f32
    %150 = vector.broadcast %cst_77 : f32 to vector<8x128xf32>
    %151 = arith.addf %150, %149 : vector<8x128xf32>
    %152 = arith.divf %150, %151 : vector<8x128xf32>
    %153 = vector.extract_strided_slice %140 {offsets = [0, 256], sizes = [8, 128], strides = [1, 1]} : vector<8x512xf32> to vector<8x128xf32>
    %154 = math.tanh %153 : vector<8x128xf32>
    %155 = vector.extract_strided_slice %140 {offsets = [0, 384], sizes = [8, 128], strides = [1, 1]} : vector<8x512xf32> to vector<8x128xf32>
    %156 = arith.negf %155 : vector<8x128xf32>
    %157 = math.exp %156 : vector<8x128xf32>
    %cst_78 = arith.constant 1.000000e+00 : f32
    %158 = vector.broadcast %cst_78 : f32 to vector<8x128xf32>
    %159 = arith.addf %158, %157 : vector<8x128xf32>
    %160 = arith.divf %158, %159 : vector<8x128xf32>
    %c0_79 = arith.constant 0 : index
    %c0_80 = arith.constant 0 : index
    %161 = vector.load %arg13[%c0_79, %c0_80] : memref<8x128xf32, #tpu.memory_space<vmem>>, vector<8x128xf32>
    %162 = arith.mulf %152, %161 : vector<8x128xf32>
    %163 = arith.mulf %146, %154 : vector<8x128xf32>
    %164 = arith.addf %162, %163 : vector<8x128xf32>
    %165 = math.tanh %164 : vector<8x128xf32>
    %166 = arith.mulf %160, %165 : vector<8x128xf32>
    %c0_81 = arith.constant 0 : index
    %c0_82 = arith.constant 0 : index
    %167 = vector.load %arg13[%c0_81, %c0_82] : memref<8x128xf32, #tpu.memory_space<vmem>>, vector<8x128xf32>
    tpu.vector_store %arg13[%c0_81, %c0_82], %164 {strides = array<i32>} : memref<8x128xf32, #tpu.memory_space<vmem>>, vector<8x128xf32>,
    %c0_83 = arith.constant 0 : index
    %c0_84 = arith.constant 0 : index
    %168 = vector.load %arg12[%c0_83, %c0_84] : memref<8x128xf32, #tpu.memory_space<vmem>>, vector<8x128xf32>
    tpu.vector_store %arg12[%c0_83, %c0_84], %166 {strides = array<i32>} : memref<8x128xf32, #tpu.memory_space<vmem>>, vector<8x128xf32>,
    %169 = arith.index_cast %c3_i32 : i32 to index
    %c0_85 = arith.constant 0 : index
    %c0_86 = arith.constant 0 : index
    %170 = vector.load %arg11[%169, %c0_85, %c0_86] : memref<8x8x128xf32, #tpu.memory_space<vmem>>, vector<1x8x128xf32>
    %171 = vector.shape_cast %170 : vector<1x8x128xf32> to vector<8x128xf32>
    %172 = vector.shape_cast %166 : vector<8x128xf32> to vector<1x8x128xf32>
    tpu.vector_store %arg11[%169, %c0_85, %c0_86], %172 {strides = array<i32>} : memref<8x8x128xf32, #tpu.memory_space<vmem>>, vector<1x8x128xf32>,
    %c4_i32 = arith.constant 4 : i32
    %173 = arith.index_cast %c4_i32 : i32 to index
    %c0_87 = arith.constant 0 : index
    %c0_88 = arith.constant 0 : index
    %174 = vector.load %arg10[%173, %c0_87, %c0_88] : memref<8x8x512xf32, #tpu.memory_space<vmem>>, vector<1x8x512xf32>
    %175 = vector.shape_cast %174 : vector<1x8x512xf32> to vector<8x512xf32>
    %c0_89 = arith.constant 0 : index
    %c0_90 = arith.constant 0 : index
    %176 = vector.load %arg12[%c0_89, %c0_90] : memref<8x128xf32, #tpu.memory_space<vmem>>, vector<8x128xf32>
    %177 = arith.truncf %176 : vector<8x128xf32> to vector<8x128xbf16>
    %c0_91 = arith.constant 0 : index
    %c0_92 = arith.constant 0 : index
    %178 = vector.load %arg2[%c0_91, %c0_92] : memref<128x512xbf16, #tpu.memory_space<vmem>>, vector<128x512xbf16>
    %cst_93 = arith.constant dense<0.000000e+00> : vector<8x512xf32>
    %179 = tpu.matmul %177, %178, %cst_93 {dimension_numbers = #tpu.dot_dimension_numbers<[1], [0], [0], [1], [0, 0, 1, 1], [], []>} : vector<8x128xbf16>, vector<128x512xbf16>, vector<8x512xf32> -> vector<8x512xf32>
    %180 = arith.addf %175, %179 : vector<8x512xf32>
    %181 = vector.extract_strided_slice %180 {offsets = [0, 0], sizes = [8, 128], strides = [1, 1]} : vector<8x512xf32> to vector<8x128xf32>
    %182 = arith.negf %181 : vector<8x128xf32>
    %183 = math.exp %182 : vector<8x128xf32>
    %cst_94 = arith.constant 1.000000e+00 : f32
    %184 = vector.broadcast %cst_94 : f32 to vector<8x128xf32>
    %185 = arith.addf %184, %183 : vector<8x128xf32>
    %186 = arith.divf %184, %185 : vector<8x128xf32>
    %187 = vector.extract_strided_slice %180 {offsets = [0, 128], sizes = [8, 128], strides = [1, 1]} : vector<8x512xf32> to vector<8x128xf32>
    %188 = arith.negf %187 : vector<8x128xf32>
    %189 = math.exp %188 : vector<8x128xf32>
    %cst_95 = arith.constant 1.000000e+00 : f32
    %190 = vector.broadcast %cst_95 : f32 to vector<8x128xf32>
    %191 = arith.addf %190, %189 : vector<8x128xf32>
    %192 = arith.divf %190, %191 : vector<8x128xf32>
    %193 = vector.extract_strided_slice %180 {offsets = [0, 256], sizes = [8, 128], strides = [1, 1]} : vector<8x512xf32> to vector<8x128xf32>
    %194 = math.tanh %193 : vector<8x128xf32>
    %195 = vector.extract_strided_slice %180 {offsets = [0, 384], sizes = [8, 128], strides = [1, 1]} : vector<8x512xf32> to vector<8x128xf32>
    %196 = arith.negf %195 : vector<8x128xf32>
    %197 = math.exp %196 : vector<8x128xf32>
    %cst_96 = arith.constant 1.000000e+00 : f32
    %198 = vector.broadcast %cst_96 : f32 to vector<8x128xf32>
    %199 = arith.addf %198, %197 : vector<8x128xf32>
    %200 = arith.divf %198, %199 : vector<8x128xf32>
    %c0_97 = arith.constant 0 : index
    %c0_98 = arith.constant 0 : index
    %201 = vector.load %arg13[%c0_97, %c0_98] : memref<8x128xf32, #tpu.memory_space<vmem>>, vector<8x128xf32>
    %202 = arith.mulf %192, %201 : vector<8x128xf32>
    %203 = arith.mulf %186, %194 : vector<8x128xf32>
    %204 = arith.addf %202, %203 : vector<8x128xf32>
    %205 = math.tanh %204 : vector<8x128xf32>
    %206 = arith.mulf %200, %205 : vector<8x128xf32>
    %c0_99 = arith.constant 0 : index
    %c0_100 = arith.constant 0 : index
    %207 = vector.load %arg13[%c0_99, %c0_100] : memref<8x128xf32, #tpu.memory_space<vmem>>, vector<8x128xf32>
    tpu.vector_store %arg13[%c0_99, %c0_100], %204 {strides = array<i32>} : memref<8x128xf32, #tpu.memory_space<vmem>>, vector<8x128xf32>,
    %c0_101 = arith.constant 0 : index
    %c0_102 = arith.constant 0 : index
    %208 = vector.load %arg12[%c0_101, %c0_102] : memref<8x128xf32, #tpu.memory_space<vmem>>, vector<8x128xf32>
    tpu.vector_store %arg12[%c0_101, %c0_102], %206 {strides = array<i32>} : memref<8x128xf32, #tpu.memory_space<vmem>>, vector<8x128xf32>,
    %209 = arith.index_cast %c4_i32 : i32 to index
    %c0_103 = arith.constant 0 : index
    %c0_104 = arith.constant 0 : index
    %210 = vector.load %arg11[%209, %c0_103, %c0_104] : memref<8x8x128xf32, #tpu.memory_space<vmem>>, vector<1x8x128xf32>
    %211 = vector.shape_cast %210 : vector<1x8x128xf32> to vector<8x128xf32>
    %212 = vector.shape_cast %206 : vector<8x128xf32> to vector<1x8x128xf32>
    tpu.vector_store %arg11[%209, %c0_103, %c0_104], %212 {strides = array<i32>} : memref<8x8x128xf32, #tpu.memory_space<vmem>>, vector<1x8x128xf32>,
    %c5_i32 = arith.constant 5 : i32
    %213 = arith.index_cast %c5_i32 : i32 to index
    %c0_105 = arith.constant 0 : index
    %c0_106 = arith.constant 0 : index
    %214 = vector.load %arg10[%213, %c0_105, %c0_106] : memref<8x8x512xf32, #tpu.memory_space<vmem>>, vector<1x8x512xf32>
    %215 = vector.shape_cast %214 : vector<1x8x512xf32> to vector<8x512xf32>
    %c0_107 = arith.constant 0 : index
    %c0_108 = arith.constant 0 : index
    %216 = vector.load %arg12[%c0_107, %c0_108] : memref<8x128xf32, #tpu.memory_space<vmem>>, vector<8x128xf32>
    %217 = arith.truncf %216 : vector<8x128xf32> to vector<8x128xbf16>
    %c0_109 = arith.constant 0 : index
    %c0_110 = arith.constant 0 : index
    %218 = vector.load %arg2[%c0_109, %c0_110] : memref<128x512xbf16, #tpu.memory_space<vmem>>, vector<128x512xbf16>
    %cst_111 = arith.constant dense<0.000000e+00> : vector<8x512xf32>
    %219 = tpu.matmul %217, %218, %cst_111 {dimension_numbers = #tpu.dot_dimension_numbers<[1], [0], [0], [1], [0, 0, 1, 1], [], []>} : vector<8x128xbf16>, vector<128x512xbf16>, vector<8x512xf32> -> vector<8x512xf32>
    %220 = arith.addf %215, %219 : vector<8x512xf32>
    %221 = vector.extract_strided_slice %220 {offsets = [0, 0], sizes = [8, 128], strides = [1, 1]} : vector<8x512xf32> to vector<8x128xf32>
    %222 = arith.negf %221 : vector<8x128xf32>
    %223 = math.exp %222 : vector<8x128xf32>
    %cst_112 = arith.constant 1.000000e+00 : f32
    %224 = vector.broadcast %cst_112 : f32 to vector<8x128xf32>
    %225 = arith.addf %224, %223 : vector<8x128xf32>
    %226 = arith.divf %224, %225 : vector<8x128xf32>
    %227 = vector.extract_strided_slice %220 {offsets = [0, 128], sizes = [8, 128], strides = [1, 1]} : vector<8x512xf32> to vector<8x128xf32>
    %228 = arith.negf %227 : vector<8x128xf32>
    %229 = math.exp %228 : vector<8x128xf32>
    %cst_113 = arith.constant 1.000000e+00 : f32
    %230 = vector.broadcast %cst_113 : f32 to vector<8x128xf32>
    %231 = arith.addf %230, %229 : vector<8x128xf32>
    %232 = arith.divf %230, %231 : vector<8x128xf32>
    %233 = vector.extract_strided_slice %220 {offsets = [0, 256], sizes = [8, 128], strides = [1, 1]} : vector<8x512xf32> to vector<8x128xf32>
    %234 = math.tanh %233 : vector<8x128xf32>
    %235 = vector.extract_strided_slice %220 {offsets = [0, 384], sizes = [8, 128], strides = [1, 1]} : vector<8x512xf32> to vector<8x128xf32>
    %236 = arith.negf %235 : vector<8x128xf32>
    %237 = math.exp %236 : vector<8x128xf32>
    %cst_114 = arith.constant 1.000000e+00 : f32
    %238 = vector.broadcast %cst_114 : f32 to vector<8x128xf32>
    %239 = arith.addf %238, %237 : vector<8x128xf32>
    %240 = arith.divf %238, %239 : vector<8x128xf32>
    %c0_115 = arith.constant 0 : index
    %c0_116 = arith.constant 0 : index
    %241 = vector.load %arg13[%c0_115, %c0_116] : memref<8x128xf32, #tpu.memory_space<vmem>>, vector<8x128xf32>
    %242 = arith.mulf %232, %241 : vector<8x128xf32>
    %243 = arith.mulf %226, %234 : vector<8x128xf32>
    %244 = arith.addf %242, %243 : vector<8x128xf32>
    %245 = math.tanh %244 : vector<8x128xf32>
    %246 = arith.mulf %240, %245 : vector<8x128xf32>
    %c0_117 = arith.constant 0 : index
    %c0_118 = arith.constant 0 : index
    %247 = vector.load %arg13[%c0_117, %c0_118] : memref<8x128xf32, #tpu.memory_space<vmem>>, vector<8x128xf32>
    tpu.vector_store %arg13[%c0_117, %c0_118], %244 {strides = array<i32>} : memref<8x128xf32, #tpu.memory_space<vmem>>, vector<8x128xf32>,
    %c0_119 = arith.constant 0 : index
    %c0_120 = arith.constant 0 : index
    %248 = vector.load %arg12[%c0_119, %c0_120] : memref<8x128xf32, #tpu.memory_space<vmem>>, vector<8x128xf32>
    tpu.vector_store %arg12[%c0_119, %c0_120], %246 {strides = array<i32>} : memref<8x128xf32, #tpu.memory_space<vmem>>, vector<8x128xf32>,
    %249 = arith.index_cast %c5_i32 : i32 to index
    %c0_121 = arith.constant 0 : index
    %c0_122 = arith.constant 0 : index
    %250 = vector.load %arg11[%249, %c0_121, %c0_122] : memref<8x8x128xf32, #tpu.memory_space<vmem>>, vector<1x8x128xf32>
    %251 = vector.shape_cast %250 : vector<1x8x128xf32> to vector<8x128xf32>
    %252 = vector.shape_cast %246 : vector<8x128xf32> to vector<1x8x128xf32>
    tpu.vector_store %arg11[%249, %c0_121, %c0_122], %252 {strides = array<i32>} : memref<8x8x128xf32, #tpu.memory_space<vmem>>, vector<1x8x128xf32>,
    %c6_i32 = arith.constant 6 : i32
    %253 = arith.index_cast %c6_i32 : i32 to index
    %c0_123 = arith.constant 0 : index
    %c0_124 = arith.constant 0 : index
    %254 = vector.load %arg10[%253, %c0_123, %c0_124] : memref<8x8x512xf32, #tpu.memory_space<vmem>>, vector<1x8x512xf32>
    %255 = vector.shape_cast %254 : vector<1x8x512xf32> to vector<8x512xf32>
    %c0_125 = arith.constant 0 : index
    %c0_126 = arith.constant 0 : index
    %256 = vector.load %arg12[%c0_125, %c0_126] : memref<8x128xf32, #tpu.memory_space<vmem>>, vector<8x128xf32>
    %257 = arith.truncf %256 : vector<8x128xf32> to vector<8x128xbf16>
    %c0_127 = arith.constant 0 : index
    %c0_128 = arith.constant 0 : index
    %258 = vector.load %arg2[%c0_127, %c0_128] : memref<128x512xbf16, #tpu.memory_space<vmem>>, vector<128x512xbf16>
    %cst_129 = arith.constant dense<0.000000e+00> : vector<8x512xf32>
    %259 = tpu.matmul %257, %258, %cst_129 {dimension_numbers = #tpu.dot_dimension_numbers<[1], [0], [0], [1], [0, 0, 1, 1], [], []>} : vector<8x128xbf16>, vector<128x512xbf16>, vector<8x512xf32> -> vector<8x512xf32>
    %260 = arith.addf %255, %259 : vector<8x512xf32>
    %261 = vector.extract_strided_slice %260 {offsets = [0, 0], sizes = [8, 128], strides = [1, 1]} : vector<8x512xf32> to vector<8x128xf32>
    %262 = arith.negf %261 : vector<8x128xf32>
    %263 = math.exp %262 : vector<8x128xf32>
    %cst_130 = arith.constant 1.000000e+00 : f32
    %264 = vector.broadcast %cst_130 : f32 to vector<8x128xf32>
    %265 = arith.addf %264, %263 : vector<8x128xf32>
    %266 = arith.divf %264, %265 : vector<8x128xf32>
    %267 = vector.extract_strided_slice %260 {offsets = [0, 128], sizes = [8, 128], strides = [1, 1]} : vector<8x512xf32> to vector<8x128xf32>
    %268 = arith.negf %267 : vector<8x128xf32>
    %269 = math.exp %268 : vector<8x128xf32>
    %cst_131 = arith.constant 1.000000e+00 : f32
    %270 = vector.broadcast %cst_131 : f32 to vector<8x128xf32>
    %271 = arith.addf %270, %269 : vector<8x128xf32>
    %272 = arith.divf %270, %271 : vector<8x128xf32>
    %273 = vector.extract_strided_slice %260 {offsets = [0, 256], sizes = [8, 128], strides = [1, 1]} : vector<8x512xf32> to vector<8x128xf32>
    %274 = math.tanh %273 : vector<8x128xf32>
    %275 = vector.extract_strided_slice %260 {offsets = [0, 384], sizes = [8, 128], strides = [1, 1]} : vector<8x512xf32> to vector<8x128xf32>
    %276 = arith.negf %275 : vector<8x128xf32>
    %277 = math.exp %276 : vector<8x128xf32>
    %cst_132 = arith.constant 1.000000e+00 : f32
    %278 = vector.broadcast %cst_132 : f32 to vector<8x128xf32>
    %279 = arith.addf %278, %277 : vector<8x128xf32>
    %280 = arith.divf %278, %279 : vector<8x128xf32>
    %c0_133 = arith.constant 0 : index
    %c0_134 = arith.constant 0 : index
    %281 = vector.load %arg13[%c0_133, %c0_134] : memref<8x128xf32, #tpu.memory_space<vmem>>, vector<8x128xf32>
    %282 = arith.mulf %272, %281 : vector<8x128xf32>
    %283 = arith.mulf %266, %274 : vector<8x128xf32>
    %284 = arith.addf %282, %283 : vector<8x128xf32>
    %285 = math.tanh %284 : vector<8x128xf32>
    %286 = arith.mulf %280, %285 : vector<8x128xf32>
    %c0_135 = arith.constant 0 : index
    %c0_136 = arith.constant 0 : index
    %287 = vector.load %arg13[%c0_135, %c0_136] : memref<8x128xf32, #tpu.memory_space<vmem>>, vector<8x128xf32>
    tpu.vector_store %arg13[%c0_135, %c0_136], %284 {strides = array<i32>} : memref<8x128xf32, #tpu.memory_space<vmem>>, vector<8x128xf32>,
    %c0_137 = arith.constant 0 : index
    %c0_138 = arith.constant 0 : index
    %288 = vector.load %arg12[%c0_137, %c0_138] : memref<8x128xf32, #tpu.memory_space<vmem>>, vector<8x128xf32>
    tpu.vector_store %arg12[%c0_137, %c0_138], %286 {strides = array<i32>} : memref<8x128xf32, #tpu.memory_space<vmem>>, vector<8x128xf32>,
    %289 = arith.index_cast %c6_i32 : i32 to index
    %c0_139 = arith.constant 0 : index
    %c0_140 = arith.constant 0 : index
    %290 = vector.load %arg11[%289, %c0_139, %c0_140] : memref<8x8x128xf32, #tpu.memory_space<vmem>>, vector<1x8x128xf32>
    %291 = vector.shape_cast %290 : vector<1x8x128xf32> to vector<8x128xf32>
    %292 = vector.shape_cast %286 : vector<8x128xf32> to vector<1x8x128xf32>
    tpu.vector_store %arg11[%289, %c0_139, %c0_140], %292 {strides = array<i32>} : memref<8x8x128xf32, #tpu.memory_space<vmem>>, vector<1x8x128xf32>,
    %c7_i32 = arith.constant 7 : i32
    %293 = arith.index_cast %c7_i32 : i32 to index
    %c0_141 = arith.constant 0 : index
    %c0_142 = arith.constant 0 : index
    %294 = vector.load %arg10[%293, %c0_141, %c0_142] : memref<8x8x512xf32, #tpu.memory_space<vmem>>, vector<1x8x512xf32>
    %295 = vector.shape_cast %294 : vector<1x8x512xf32> to vector<8x512xf32>
    %c0_143 = arith.constant 0 : index
    %c0_144 = arith.constant 0 : index
    %296 = vector.load %arg12[%c0_143, %c0_144] : memref<8x128xf32, #tpu.memory_space<vmem>>, vector<8x128xf32>
    %297 = arith.truncf %296 : vector<8x128xf32> to vector<8x128xbf16>
    %c0_145 = arith.constant 0 : index
    %c0_146 = arith.constant 0 : index
    %298 = vector.load %arg2[%c0_145, %c0_146] : memref<128x512xbf16, #tpu.memory_space<vmem>>, vector<128x512xbf16>
    %cst_147 = arith.constant dense<0.000000e+00> : vector<8x512xf32>
    %299 = tpu.matmul %297, %298, %cst_147 {dimension_numbers = #tpu.dot_dimension_numbers<[1], [0], [0], [1], [0, 0, 1, 1], [], []>} : vector<8x128xbf16>, vector<128x512xbf16>, vector<8x512xf32> -> vector<8x512xf32>
    %300 = arith.addf %295, %299 : vector<8x512xf32>
    %301 = vector.extract_strided_slice %300 {offsets = [0, 0], sizes = [8, 128], strides = [1, 1]} : vector<8x512xf32> to vector<8x128xf32>
    %302 = arith.negf %301 : vector<8x128xf32>
    %303 = math.exp %302 : vector<8x128xf32>
    %cst_148 = arith.constant 1.000000e+00 : f32
    %304 = vector.broadcast %cst_148 : f32 to vector<8x128xf32>
    %305 = arith.addf %304, %303 : vector<8x128xf32>
    %306 = arith.divf %304, %305 : vector<8x128xf32>
    %307 = vector.extract_strided_slice %300 {offsets = [0, 128], sizes = [8, 128], strides = [1, 1]} : vector<8x512xf32> to vector<8x128xf32>
    %308 = arith.negf %307 : vector<8x128xf32>
    %309 = math.exp %308 : vector<8x128xf32>
    %cst_149 = arith.constant 1.000000e+00 : f32
    %310 = vector.broadcast %cst_149 : f32 to vector<8x128xf32>
    %311 = arith.addf %310, %309 : vector<8x128xf32>
    %312 = arith.divf %310, %311 : vector<8x128xf32>
    %313 = vector.extract_strided_slice %300 {offsets = [0, 256], sizes = [8, 128], strides = [1, 1]} : vector<8x512xf32> to vector<8x128xf32>
    %314 = math.tanh %313 : vector<8x128xf32>
    %315 = vector.extract_strided_slice %300 {offsets = [0, 384], sizes = [8, 128], strides = [1, 1]} : vector<8x512xf32> to vector<8x128xf32>
    %316 = arith.negf %315 : vector<8x128xf32>
    %317 = math.exp %316 : vector<8x128xf32>
    %cst_150 = arith.constant 1.000000e+00 : f32
    %318 = vector.broadcast %cst_150 : f32 to vector<8x128xf32>
    %319 = arith.addf %318, %317 : vector<8x128xf32>
    %320 = arith.divf %318, %319 : vector<8x128xf32>
    %c0_151 = arith.constant 0 : index
    %c0_152 = arith.constant 0 : index
    %321 = vector.load %arg13[%c0_151, %c0_152] : memref<8x128xf32, #tpu.memory_space<vmem>>, vector<8x128xf32>
    %322 = arith.mulf %312, %321 : vector<8x128xf32>
    %323 = arith.mulf %306, %314 : vector<8x128xf32>
    %324 = arith.addf %322, %323 : vector<8x128xf32>
    %325 = math.tanh %324 : vector<8x128xf32>
    %326 = arith.mulf %320, %325 : vector<8x128xf32>
    %c0_153 = arith.constant 0 : index
    %c0_154 = arith.constant 0 : index
    %327 = vector.load %arg13[%c0_153, %c0_154] : memref<8x128xf32, #tpu.memory_space<vmem>>, vector<8x128xf32>
    tpu.vector_store %arg13[%c0_153, %c0_154], %324 {strides = array<i32>} : memref<8x128xf32, #tpu.memory_space<vmem>>, vector<8x128xf32>,
    %c0_155 = arith.constant 0 : index
    %c0_156 = arith.constant 0 : index
    %328 = vector.load %arg12[%c0_155, %c0_156] : memref<8x128xf32, #tpu.memory_space<vmem>>, vector<8x128xf32>
    tpu.vector_store %arg12[%c0_155, %c0_156], %326 {strides = array<i32>} : memref<8x128xf32, #tpu.memory_space<vmem>>, vector<8x128xf32>,
    %329 = arith.index_cast %c7_i32 : i32 to index
    %c0_157 = arith.constant 0 : index
    %c0_158 = arith.constant 0 : index
    %330 = vector.load %arg11[%329, %c0_157, %c0_158] : memref<8x8x128xf32, #tpu.memory_space<vmem>>, vector<1x8x128xf32>
    %331 = vector.shape_cast %330 : vector<1x8x128xf32> to vector<8x128xf32>
    %332 = vector.shape_cast %326 : vector<8x128xf32> to vector<1x8x128xf32>
    tpu.vector_store %arg11[%329, %c0_157, %c0_158], %332 {strides = array<i32>} : memref<8x8x128xf32, #tpu.memory_space<vmem>>, vector<1x8x128xf32>,
    %c8_i32 = arith.constant 8 : i32
    %c0_159 = arith.constant 0 : index
    %c0_160 = arith.constant 0 : index
    %c0_161 = arith.constant 0 : index
    %333 = vector.load %arg11[%c0_159, %c0_160, %c0_161] : memref<8x8x128xf32, #tpu.memory_space<vmem>>, vector<8x8x128xf32>
    %334 = vector.shape_cast %333 : vector<8x8x128xf32> to vector<64x128xf32>
    %335 = arith.truncf %334 : vector<64x128xf32> to vector<64x128xbf16>
    %c0_162 = arith.constant 0 : index
    %c0_163 = arith.constant 0 : index
    %336 = vector.load %arg4[%c0_162, %c0_163] : memref<128x512xbf16, #tpu.memory_space<vmem>>, vector<128x512xbf16>
    %cst_164 = arith.constant dense<0.000000e+00> : vector<64x512xf32>
    %337 = tpu.matmul %335, %336, %cst_164 {dimension_numbers = #tpu.dot_dimension_numbers<[1], [0], [0], [1], [0, 0, 1, 1], [], []>} : vector<64x128xbf16>, vector<128x512xbf16>, vector<64x512xf32> -> vector<64x512xf32>
    %c0_165 = arith.constant 0 : index
    %c0_166 = arith.constant 0 : index
    %338 = vector.load %arg6[%c0_165, %c0_166] : memref<1x512xf32, #tpu.memory_space<vmem>>, vector<1x512xf32>
    %339 = vector.broadcast %338 : vector<1x512xf32> to vector<64x512xf32>
    %340 = arith.addf %337, %339 : vector<64x512xf32>
    %341 = vector.shape_cast %340 : vector<64x512xf32> to vector<8x8x512xf32>
    %c0_167 = arith.constant 0 : index
    %c0_168 = arith.constant 0 : index
    %c0_169 = arith.constant 0 : index
    %342 = vector.load %arg10[%c0_167, %c0_168, %c0_169] : memref<8x8x512xf32, #tpu.memory_space<vmem>>, vector<8x8x512xf32>
    tpu.vector_store %arg10[%c0_167, %c0_168, %c0_169], %341 {strides = array<i32>} : memref<8x8x512xf32, #tpu.memory_space<vmem>>, vector<8x8x512xf32>,
    %cst_170 = arith.constant 0.000000e+00 : f32
    %343 = vector.broadcast %cst_170 : f32 to vector<8x128xf32>
    %c0_171 = arith.constant 0 : index
    %c0_172 = arith.constant 0 : index
    %344 = vector.load %arg12[%c0_171, %c0_172] : memref<8x128xf32, #tpu.memory_space<vmem>>, vector<8x128xf32>
    tpu.vector_store %arg12[%c0_171, %c0_172], %343 {strides = array<i32>} : memref<8x128xf32, #tpu.memory_space<vmem>>, vector<8x128xf32>,
    %cst_173 = arith.constant 0.000000e+00 : f32
    %345 = vector.broadcast %cst_173 : f32 to vector<8x128xf32>
    %c0_174 = arith.constant 0 : index
    %c0_175 = arith.constant 0 : index
    %346 = vector.load %arg13[%c0_174, %c0_175] : memref<8x128xf32, #tpu.memory_space<vmem>>, vector<8x128xf32>
    tpu.vector_store %arg13[%c0_174, %c0_175], %345 {strides = array<i32>} : memref<8x128xf32, #tpu.memory_space<vmem>>, vector<8x128xf32>,
    %c0_i32_176 = arith.constant 0 : i32
    %347 = arith.index_cast %c0_i32_176 : i32 to index
    %c0_177 = arith.constant 0 : index
    %c0_178 = arith.constant 0 : index
    %348 = vector.load %arg10[%347, %c0_177, %c0_178] : memref<8x8x512xf32, #tpu.memory_space<vmem>>, vector<1x8x512xf32>
    %349 = vector.shape_cast %348 : vector<1x8x512xf32> to vector<8x512xf32>
    %c0_179 = arith.constant 0 : index
    %c0_180 = arith.constant 0 : index
    %350 = vector.load %arg12[%c0_179, %c0_180] : memref<8x128xf32, #tpu.memory_space<vmem>>, vector<8x128xf32>
    %351 = arith.truncf %350 : vector<8x128xf32> to vector<8x128xbf16>
    %c0_181 = arith.constant 0 : index
    %c0_182 = arith.constant 0 : index
    %352 = vector.load %arg5[%c0_181, %c0_182] : memref<128x512xbf16, #tpu.memory_space<vmem>>, vector<128x512xbf16>
    %cst_183 = arith.constant dense<0.000000e+00> : vector<8x512xf32>
    %353 = tpu.matmul %351, %352, %cst_183 {dimension_numbers = #tpu.dot_dimension_numbers<[1], [0], [0], [1], [0, 0, 1, 1], [], []>} : vector<8x128xbf16>, vector<128x512xbf16>, vector<8x512xf32> -> vector<8x512xf32>
    %354 = arith.addf %349, %353 : vector<8x512xf32>
    %355 = vector.extract_strided_slice %354 {offsets = [0, 0], sizes = [8, 128], strides = [1, 1]} : vector<8x512xf32> to vector<8x128xf32>
    %356 = arith.negf %355 : vector<8x128xf32>
    %357 = math.exp %356 : vector<8x128xf32>
    %cst_184 = arith.constant 1.000000e+00 : f32
    %358 = vector.broadcast %cst_184 : f32 to vector<8x128xf32>
    %359 = arith.addf %358, %357 : vector<8x128xf32>
    %360 = arith.divf %358, %359 : vector<8x128xf32>
    %361 = vector.extract_strided_slice %354 {offsets = [0, 128], sizes = [8, 128], strides = [1, 1]} : vector<8x512xf32> to vector<8x128xf32>
    %362 = arith.negf %361 : vector<8x128xf32>
    %363 = math.exp %362 : vector<8x128xf32>
    %cst_185 = arith.constant 1.000000e+00 : f32
    %364 = vector.broadcast %cst_185 : f32 to vector<8x128xf32>
    %365 = arith.addf %364, %363 : vector<8x128xf32>
    %366 = arith.divf %364, %365 : vector<8x128xf32>
    %367 = vector.extract_strided_slice %354 {offsets = [0, 256], sizes = [8, 128], strides = [1, 1]} : vector<8x512xf32> to vector<8x128xf32>
    %368 = math.tanh %367 : vector<8x128xf32>
    %369 = vector.extract_strided_slice %354 {offsets = [0, 384], sizes = [8, 128], strides = [1, 1]} : vector<8x512xf32> to vector<8x128xf32>
    %370 = arith.negf %369 : vector<8x128xf32>
    %371 = math.exp %370 : vector<8x128xf32>
    %cst_186 = arith.constant 1.000000e+00 : f32
    %372 = vector.broadcast %cst_186 : f32 to vector<8x128xf32>
    %373 = arith.addf %372, %371 : vector<8x128xf32>
    %374 = arith.divf %372, %373 : vector<8x128xf32>
    %c0_187 = arith.constant 0 : index
    %c0_188 = arith.constant 0 : index
    %375 = vector.load %arg13[%c0_187, %c0_188] : memref<8x128xf32, #tpu.memory_space<vmem>>, vector<8x128xf32>
    %376 = arith.mulf %366, %375 : vector<8x128xf32>
    %377 = arith.mulf %360, %368 : vector<8x128xf32>
    %378 = arith.addf %376, %377 : vector<8x128xf32>
    %379 = math.tanh %378 : vector<8x128xf32>
    %380 = arith.mulf %374, %379 : vector<8x128xf32>
    %c0_189 = arith.constant 0 : index
    %c0_190 = arith.constant 0 : index
    %381 = vector.load %arg13[%c0_189, %c0_190] : memref<8x128xf32, #tpu.memory_space<vmem>>, vector<8x128xf32>
    tpu.vector_store %arg13[%c0_189, %c0_190], %378 {strides = array<i32>} : memref<8x128xf32, #tpu.memory_space<vmem>>, vector<8x128xf32>,
    %c0_191 = arith.constant 0 : index
    %c0_192 = arith.constant 0 : index
    %382 = vector.load %arg12[%c0_191, %c0_192] : memref<8x128xf32, #tpu.memory_space<vmem>>, vector<8x128xf32>
    tpu.vector_store %arg12[%c0_191, %c0_192], %380 {strides = array<i32>} : memref<8x128xf32, #tpu.memory_space<vmem>>, vector<8x128xf32>,
    %c1_i32_193 = arith.constant 1 : i32
    %383 = arith.index_cast %c1_i32_193 : i32 to index
    %c0_194 = arith.constant 0 : index
    %c0_195 = arith.constant 0 : index
    %384 = vector.load %arg10[%383, %c0_194, %c0_195] : memref<8x8x512xf32, #tpu.memory_space<vmem>>, vector<1x8x512xf32>
    %385 = vector.shape_cast %384 : vector<1x8x512xf32> to vector<8x512xf32>
    %c0_196 = arith.constant 0 : index
    %c0_197 = arith.constant 0 : index
    %386 = vector.load %arg12[%c0_196, %c0_197] : memref<8x128xf32, #tpu.memory_space<vmem>>, vector<8x128xf32>
    %387 = arith.truncf %386 : vector<8x128xf32> to vector<8x128xbf16>
    %c0_198 = arith.constant 0 : index
    %c0_199 = arith.constant 0 : index
    %388 = vector.load %arg5[%c0_198, %c0_199] : memref<128x512xbf16, #tpu.memory_space<vmem>>, vector<128x512xbf16>
    %cst_200 = arith.constant dense<0.000000e+00> : vector<8x512xf32>
    %389 = tpu.matmul %387, %388, %cst_200 {dimension_numbers = #tpu.dot_dimension_numbers<[1], [0], [0], [1], [0, 0, 1, 1], [], []>} : vector<8x128xbf16>, vector<128x512xbf16>, vector<8x512xf32> -> vector<8x512xf32>
    %390 = arith.addf %385, %389 : vector<8x512xf32>
    %391 = vector.extract_strided_slice %390 {offsets = [0, 0], sizes = [8, 128], strides = [1, 1]} : vector<8x512xf32> to vector<8x128xf32>
    %392 = arith.negf %391 : vector<8x128xf32>
    %393 = math.exp %392 : vector<8x128xf32>
    %cst_201 = arith.constant 1.000000e+00 : f32
    %394 = vector.broadcast %cst_201 : f32 to vector<8x128xf32>
    %395 = arith.addf %394, %393 : vector<8x128xf32>
    %396 = arith.divf %394, %395 : vector<8x128xf32>
    %397 = vector.extract_strided_slice %390 {offsets = [0, 128], sizes = [8, 128], strides = [1, 1]} : vector<8x512xf32> to vector<8x128xf32>
    %398 = arith.negf %397 : vector<8x128xf32>
    %399 = math.exp %398 : vector<8x128xf32>
    %cst_202 = arith.constant 1.000000e+00 : f32
    %400 = vector.broadcast %cst_202 : f32 to vector<8x128xf32>
    %401 = arith.addf %400, %399 : vector<8x128xf32>
    %402 = arith.divf %400, %401 : vector<8x128xf32>
    %403 = vector.extract_strided_slice %390 {offsets = [0, 256], sizes = [8, 128], strides = [1, 1]} : vector<8x512xf32> to vector<8x128xf32>
    %404 = math.tanh %403 : vector<8x128xf32>
    %405 = vector.extract_strided_slice %390 {offsets = [0, 384], sizes = [8, 128], strides = [1, 1]} : vector<8x512xf32> to vector<8x128xf32>
    %406 = arith.negf %405 : vector<8x128xf32>
    %407 = math.exp %406 : vector<8x128xf32>
    %cst_203 = arith.constant 1.000000e+00 : f32
    %408 = vector.broadcast %cst_203 : f32 to vector<8x128xf32>
    %409 = arith.addf %408, %407 : vector<8x128xf32>
    %410 = arith.divf %408, %409 : vector<8x128xf32>
    %c0_204 = arith.constant 0 : index
    %c0_205 = arith.constant 0 : index
    %411 = vector.load %arg13[%c0_204, %c0_205] : memref<8x128xf32, #tpu.memory_space<vmem>>, vector<8x128xf32>
    %412 = arith.mulf %402, %411 : vector<8x128xf32>
    %413 = arith.mulf %396, %404 : vector<8x128xf32>
    %414 = arith.addf %412, %413 : vector<8x128xf32>
    %415 = math.tanh %414 : vector<8x128xf32>
    %416 = arith.mulf %410, %415 : vector<8x128xf32>
    %c0_206 = arith.constant 0 : index
    %c0_207 = arith.constant 0 : index
    %417 = vector.load %arg13[%c0_206, %c0_207] : memref<8x128xf32, #tpu.memory_space<vmem>>, vector<8x128xf32>
    tpu.vector_store %arg13[%c0_206, %c0_207], %414 {strides = array<i32>} : memref<8x128xf32, #tpu.memory_space<vmem>>, vector<8x128xf32>,
    %c0_208 = arith.constant 0 : index
    %c0_209 = arith.constant 0 : index
    %418 = vector.load %arg12[%c0_208, %c0_209] : memref<8x128xf32, #tpu.memory_space<vmem>>, vector<8x128xf32>
    tpu.vector_store %arg12[%c0_208, %c0_209], %416 {strides = array<i32>} : memref<8x128xf32, #tpu.memory_space<vmem>>, vector<8x128xf32>,
    %c2_i32_210 = arith.constant 2 : i32
    %419 = arith.index_cast %c2_i32_210 : i32 to index
    %c0_211 = arith.constant 0 : index
    %c0_212 = arith.constant 0 : index
    %420 = vector.load %arg10[%419, %c0_211, %c0_212] : memref<8x8x512xf32, #tpu.memory_space<vmem>>, vector<1x8x512xf32>
    %421 = vector.shape_cast %420 : vector<1x8x512xf32> to vector<8x512xf32>
    %c0_213 = arith.constant 0 : index
    %c0_214 = arith.constant 0 : index
    %422 = vector.load %arg12[%c0_213, %c0_214] : memref<8x128xf32, #tpu.memory_space<vmem>>, vector<8x128xf32>
    %423 = arith.truncf %422 : vector<8x128xf32> to vector<8x128xbf16>
    %c0_215 = arith.constant 0 : index
    %c0_216 = arith.constant 0 : index
    %424 = vector.load %arg5[%c0_215, %c0_216] : memref<128x512xbf16, #tpu.memory_space<vmem>>, vector<128x512xbf16>
    %cst_217 = arith.constant dense<0.000000e+00> : vector<8x512xf32>
    %425 = tpu.matmul %423, %424, %cst_217 {dimension_numbers = #tpu.dot_dimension_numbers<[1], [0], [0], [1], [0, 0, 1, 1], [], []>} : vector<8x128xbf16>, vector<128x512xbf16>, vector<8x512xf32> -> vector<8x512xf32>
    %426 = arith.addf %421, %425 : vector<8x512xf32>
    %427 = vector.extract_strided_slice %426 {offsets = [0, 0], sizes = [8, 128], strides = [1, 1]} : vector<8x512xf32> to vector<8x128xf32>
    %428 = arith.negf %427 : vector<8x128xf32>
    %429 = math.exp %428 : vector<8x128xf32>
    %cst_218 = arith.constant 1.000000e+00 : f32
    %430 = vector.broadcast %cst_218 : f32 to vector<8x128xf32>
    %431 = arith.addf %430, %429 : vector<8x128xf32>
    %432 = arith.divf %430, %431 : vector<8x128xf32>
    %433 = vector.extract_strided_slice %426 {offsets = [0, 128], sizes = [8, 128], strides = [1, 1]} : vector<8x512xf32> to vector<8x128xf32>
    %434 = arith.negf %433 : vector<8x128xf32>
    %435 = math.exp %434 : vector<8x128xf32>
    %cst_219 = arith.constant 1.000000e+00 : f32
    %436 = vector.broadcast %cst_219 : f32 to vector<8x128xf32>
    %437 = arith.addf %436, %435 : vector<8x128xf32>
    %438 = arith.divf %436, %437 : vector<8x128xf32>
    %439 = vector.extract_strided_slice %426 {offsets = [0, 256], sizes = [8, 128], strides = [1, 1]} : vector<8x512xf32> to vector<8x128xf32>
    %440 = math.tanh %439 : vector<8x128xf32>
    %441 = vector.extract_strided_slice %426 {offsets = [0, 384], sizes = [8, 128], strides = [1, 1]} : vector<8x512xf32> to vector<8x128xf32>
    %442 = arith.negf %441 : vector<8x128xf32>
    %443 = math.exp %442 : vector<8x128xf32>
    %cst_220 = arith.constant 1.000000e+00 : f32
    %444 = vector.broadcast %cst_220 : f32 to vector<8x128xf32>
    %445 = arith.addf %444, %443 : vector<8x128xf32>
    %446 = arith.divf %444, %445 : vector<8x128xf32>
    %c0_221 = arith.constant 0 : index
    %c0_222 = arith.constant 0 : index
    %447 = vector.load %arg13[%c0_221, %c0_222] : memref<8x128xf32, #tpu.memory_space<vmem>>, vector<8x128xf32>
    %448 = arith.mulf %438, %447 : vector<8x128xf32>
    %449 = arith.mulf %432, %440 : vector<8x128xf32>
    %450 = arith.addf %448, %449 : vector<8x128xf32>
    %451 = math.tanh %450 : vector<8x128xf32>
    %452 = arith.mulf %446, %451 : vector<8x128xf32>
    %c0_223 = arith.constant 0 : index
    %c0_224 = arith.constant 0 : index
    %453 = vector.load %arg13[%c0_223, %c0_224] : memref<8x128xf32, #tpu.memory_space<vmem>>, vector<8x128xf32>
    tpu.vector_store %arg13[%c0_223, %c0_224], %450 {strides = array<i32>} : memref<8x128xf32, #tpu.memory_space<vmem>>, vector<8x128xf32>,
    %c0_225 = arith.constant 0 : index
    %c0_226 = arith.constant 0 : index
    %454 = vector.load %arg12[%c0_225, %c0_226] : memref<8x128xf32, #tpu.memory_space<vmem>>, vector<8x128xf32>
    tpu.vector_store %arg12[%c0_225, %c0_226], %452 {strides = array<i32>} : memref<8x128xf32, #tpu.memory_space<vmem>>, vector<8x128xf32>,
    %c3_i32_227 = arith.constant 3 : i32
    %455 = arith.index_cast %c3_i32_227 : i32 to index
    %c0_228 = arith.constant 0 : index
    %c0_229 = arith.constant 0 : index
    %456 = vector.load %arg10[%455, %c0_228, %c0_229] : memref<8x8x512xf32, #tpu.memory_space<vmem>>, vector<1x8x512xf32>
    %457 = vector.shape_cast %456 : vector<1x8x512xf32> to vector<8x512xf32>
    %c0_230 = arith.constant 0 : index
    %c0_231 = arith.constant 0 : index
    %458 = vector.load %arg12[%c0_230, %c0_231] : memref<8x128xf32, #tpu.memory_space<vmem>>, vector<8x128xf32>
    %459 = arith.truncf %458 : vector<8x128xf32> to vector<8x128xbf16>
    %c0_232 = arith.constant 0 : index
    %c0_233 = arith.constant 0 : index
    %460 = vector.load %arg5[%c0_232, %c0_233] : memref<128x512xbf16, #tpu.memory_space<vmem>>, vector<128x512xbf16>
    %cst_234 = arith.constant dense<0.000000e+00> : vector<8x512xf32>
    %461 = tpu.matmul %459, %460, %cst_234 {dimension_numbers = #tpu.dot_dimension_numbers<[1], [0], [0], [1], [0, 0, 1, 1], [], []>} : vector<8x128xbf16>, vector<128x512xbf16>, vector<8x512xf32> -> vector<8x512xf32>
    %462 = arith.addf %457, %461 : vector<8x512xf32>
    %463 = vector.extract_strided_slice %462 {offsets = [0, 0], sizes = [8, 128], strides = [1, 1]} : vector<8x512xf32> to vector<8x128xf32>
    %464 = arith.negf %463 : vector<8x128xf32>
    %465 = math.exp %464 : vector<8x128xf32>
    %cst_235 = arith.constant 1.000000e+00 : f32
    %466 = vector.broadcast %cst_235 : f32 to vector<8x128xf32>
    %467 = arith.addf %466, %465 : vector<8x128xf32>
    %468 = arith.divf %466, %467 : vector<8x128xf32>
    %469 = vector.extract_strided_slice %462 {offsets = [0, 128], sizes = [8, 128], strides = [1, 1]} : vector<8x512xf32> to vector<8x128xf32>
    %470 = arith.negf %469 : vector<8x128xf32>
    %471 = math.exp %470 : vector<8x128xf32>
    %cst_236 = arith.constant 1.000000e+00 : f32
    %472 = vector.broadcast %cst_236 : f32 to vector<8x128xf32>
    %473 = arith.addf %472, %471 : vector<8x128xf32>
    %474 = arith.divf %472, %473 : vector<8x128xf32>
    %475 = vector.extract_strided_slice %462 {offsets = [0, 256], sizes = [8, 128], strides = [1, 1]} : vector<8x512xf32> to vector<8x128xf32>
    %476 = math.tanh %475 : vector<8x128xf32>
    %477 = vector.extract_strided_slice %462 {offsets = [0, 384], sizes = [8, 128], strides = [1, 1]} : vector<8x512xf32> to vector<8x128xf32>
    %478 = arith.negf %477 : vector<8x128xf32>
    %479 = math.exp %478 : vector<8x128xf32>
    %cst_237 = arith.constant 1.000000e+00 : f32
    %480 = vector.broadcast %cst_237 : f32 to vector<8x128xf32>
    %481 = arith.addf %480, %479 : vector<8x128xf32>
    %482 = arith.divf %480, %481 : vector<8x128xf32>
    %c0_238 = arith.constant 0 : index
    %c0_239 = arith.constant 0 : index
    %483 = vector.load %arg13[%c0_238, %c0_239] : memref<8x128xf32, #tpu.memory_space<vmem>>, vector<8x128xf32>
    %484 = arith.mulf %474, %483 : vector<8x128xf32>
    %485 = arith.mulf %468, %476 : vector<8x128xf32>
    %486 = arith.addf %484, %485 : vector<8x128xf32>
    %487 = math.tanh %486 : vector<8x128xf32>
    %488 = arith.mulf %482, %487 : vector<8x128xf32>
    %c0_240 = arith.constant 0 : index
    %c0_241 = arith.constant 0 : index
    %489 = vector.load %arg13[%c0_240, %c0_241] : memref<8x128xf32, #tpu.memory_space<vmem>>, vector<8x128xf32>
    tpu.vector_store %arg13[%c0_240, %c0_241], %486 {strides = array<i32>} : memref<8x128xf32, #tpu.memory_space<vmem>>, vector<8x128xf32>,
    %c0_242 = arith.constant 0 : index
    %c0_243 = arith.constant 0 : index
    %490 = vector.load %arg12[%c0_242, %c0_243] : memref<8x128xf32, #tpu.memory_space<vmem>>, vector<8x128xf32>
    tpu.vector_store %arg12[%c0_242, %c0_243], %488 {strides = array<i32>} : memref<8x128xf32, #tpu.memory_space<vmem>>, vector<8x128xf32>,
    %c4_i32_244 = arith.constant 4 : i32
    %491 = arith.index_cast %c4_i32_244 : i32 to index
    %c0_245 = arith.constant 0 : index
    %c0_246 = arith.constant 0 : index
    %492 = vector.load %arg10[%491, %c0_245, %c0_246] : memref<8x8x512xf32, #tpu.memory_space<vmem>>, vector<1x8x512xf32>
    %493 = vector.shape_cast %492 : vector<1x8x512xf32> to vector<8x512xf32>
    %c0_247 = arith.constant 0 : index
    %c0_248 = arith.constant 0 : index
    %494 = vector.load %arg12[%c0_247, %c0_248] : memref<8x128xf32, #tpu.memory_space<vmem>>, vector<8x128xf32>
    %495 = arith.truncf %494 : vector<8x128xf32> to vector<8x128xbf16>
    %c0_249 = arith.constant 0 : index
    %c0_250 = arith.constant 0 : index
    %496 = vector.load %arg5[%c0_249, %c0_250] : memref<128x512xbf16, #tpu.memory_space<vmem>>, vector<128x512xbf16>
    %cst_251 = arith.constant dense<0.000000e+00> : vector<8x512xf32>
    %497 = tpu.matmul %495, %496, %cst_251 {dimension_numbers = #tpu.dot_dimension_numbers<[1], [0], [0], [1], [0, 0, 1, 1], [], []>} : vector<8x128xbf16>, vector<128x512xbf16>, vector<8x512xf32> -> vector<8x512xf32>
    %498 = arith.addf %493, %497 : vector<8x512xf32>
    %499 = vector.extract_strided_slice %498 {offsets = [0, 0], sizes = [8, 128], strides = [1, 1]} : vector<8x512xf32> to vector<8x128xf32>
    %500 = arith.negf %499 : vector<8x128xf32>
    %501 = math.exp %500 : vector<8x128xf32>
    %cst_252 = arith.constant 1.000000e+00 : f32
    %502 = vector.broadcast %cst_252 : f32 to vector<8x128xf32>
    %503 = arith.addf %502, %501 : vector<8x128xf32>
    %504 = arith.divf %502, %503 : vector<8x128xf32>
    %505 = vector.extract_strided_slice %498 {offsets = [0, 128], sizes = [8, 128], strides = [1, 1]} : vector<8x512xf32> to vector<8x128xf32>
    %506 = arith.negf %505 : vector<8x128xf32>
    %507 = math.exp %506 : vector<8x128xf32>
    %cst_253 = arith.constant 1.000000e+00 : f32
    %508 = vector.broadcast %cst_253 : f32 to vector<8x128xf32>
    %509 = arith.addf %508, %507 : vector<8x128xf32>
    %510 = arith.divf %508, %509 : vector<8x128xf32>
    %511 = vector.extract_strided_slice %498 {offsets = [0, 256], sizes = [8, 128], strides = [1, 1]} : vector<8x512xf32> to vector<8x128xf32>
    %512 = math.tanh %511 : vector<8x128xf32>
    %513 = vector.extract_strided_slice %498 {offsets = [0, 384], sizes = [8, 128], strides = [1, 1]} : vector<8x512xf32> to vector<8x128xf32>
    %514 = arith.negf %513 : vector<8x128xf32>
    %515 = math.exp %514 : vector<8x128xf32>
    %cst_254 = arith.constant 1.000000e+00 : f32
    %516 = vector.broadcast %cst_254 : f32 to vector<8x128xf32>
    %517 = arith.addf %516, %515 : vector<8x128xf32>
    %518 = arith.divf %516, %517 : vector<8x128xf32>
    %c0_255 = arith.constant 0 : index
    %c0_256 = arith.constant 0 : index
    %519 = vector.load %arg13[%c0_255, %c0_256] : memref<8x128xf32, #tpu.memory_space<vmem>>, vector<8x128xf32>
    %520 = arith.mulf %510, %519 : vector<8x128xf32>
    %521 = arith.mulf %504, %512 : vector<8x128xf32>
    %522 = arith.addf %520, %521 : vector<8x128xf32>
    %523 = math.tanh %522 : vector<8x128xf32>
    %524 = arith.mulf %518, %523 : vector<8x128xf32>
    %c0_257 = arith.constant 0 : index
    %c0_258 = arith.constant 0 : index
    %525 = vector.load %arg13[%c0_257, %c0_258] : memref<8x128xf32, #tpu.memory_space<vmem>>, vector<8x128xf32>
    tpu.vector_store %arg13[%c0_257, %c0_258], %522 {strides = array<i32>} : memref<8x128xf32, #tpu.memory_space<vmem>>, vector<8x128xf32>,
    %c0_259 = arith.constant 0 : index
    %c0_260 = arith.constant 0 : index
    %526 = vector.load %arg12[%c0_259, %c0_260] : memref<8x128xf32, #tpu.memory_space<vmem>>, vector<8x128xf32>
    tpu.vector_store %arg12[%c0_259, %c0_260], %524 {strides = array<i32>} : memref<8x128xf32, #tpu.memory_space<vmem>>, vector<8x128xf32>,
    %c5_i32_261 = arith.constant 5 : i32
    %527 = arith.index_cast %c5_i32_261 : i32 to index
    %c0_262 = arith.constant 0 : index
    %c0_263 = arith.constant 0 : index
    %528 = vector.load %arg10[%527, %c0_262, %c0_263] : memref<8x8x512xf32, #tpu.memory_space<vmem>>, vector<1x8x512xf32>
    %529 = vector.shape_cast %528 : vector<1x8x512xf32> to vector<8x512xf32>
    %c0_264 = arith.constant 0 : index
    %c0_265 = arith.constant 0 : index
    %530 = vector.load %arg12[%c0_264, %c0_265] : memref<8x128xf32, #tpu.memory_space<vmem>>, vector<8x128xf32>
    %531 = arith.truncf %530 : vector<8x128xf32> to vector<8x128xbf16>
    %c0_266 = arith.constant 0 : index
    %c0_267 = arith.constant 0 : index
    %532 = vector.load %arg5[%c0_266, %c0_267] : memref<128x512xbf16, #tpu.memory_space<vmem>>, vector<128x512xbf16>
    %cst_268 = arith.constant dense<0.000000e+00> : vector<8x512xf32>
    %533 = tpu.matmul %531, %532, %cst_268 {dimension_numbers = #tpu.dot_dimension_numbers<[1], [0], [0], [1], [0, 0, 1, 1], [], []>} : vector<8x128xbf16>, vector<128x512xbf16>, vector<8x512xf32> -> vector<8x512xf32>
    %534 = arith.addf %529, %533 : vector<8x512xf32>
    %535 = vector.extract_strided_slice %534 {offsets = [0, 0], sizes = [8, 128], strides = [1, 1]} : vector<8x512xf32> to vector<8x128xf32>
    %536 = arith.negf %535 : vector<8x128xf32>
    %537 = math.exp %536 : vector<8x128xf32>
    %cst_269 = arith.constant 1.000000e+00 : f32
    %538 = vector.broadcast %cst_269 : f32 to vector<8x128xf32>
    %539 = arith.addf %538, %537 : vector<8x128xf32>
    %540 = arith.divf %538, %539 : vector<8x128xf32>
    %541 = vector.extract_strided_slice %534 {offsets = [0, 128], sizes = [8, 128], strides = [1, 1]} : vector<8x512xf32> to vector<8x128xf32>
    %542 = arith.negf %541 : vector<8x128xf32>
    %543 = math.exp %542 : vector<8x128xf32>
    %cst_270 = arith.constant 1.000000e+00 : f32
    %544 = vector.broadcast %cst_270 : f32 to vector<8x128xf32>
    %545 = arith.addf %544, %543 : vector<8x128xf32>
    %546 = arith.divf %544, %545 : vector<8x128xf32>
    %547 = vector.extract_strided_slice %534 {offsets = [0, 256], sizes = [8, 128], strides = [1, 1]} : vector<8x512xf32> to vector<8x128xf32>
    %548 = math.tanh %547 : vector<8x128xf32>
    %549 = vector.extract_strided_slice %534 {offsets = [0, 384], sizes = [8, 128], strides = [1, 1]} : vector<8x512xf32> to vector<8x128xf32>
    %550 = arith.negf %549 : vector<8x128xf32>
    %551 = math.exp %550 : vector<8x128xf32>
    %cst_271 = arith.constant 1.000000e+00 : f32
    %552 = vector.broadcast %cst_271 : f32 to vector<8x128xf32>
    %553 = arith.addf %552, %551 : vector<8x128xf32>
    %554 = arith.divf %552, %553 : vector<8x128xf32>
    %c0_272 = arith.constant 0 : index
    %c0_273 = arith.constant 0 : index
    %555 = vector.load %arg13[%c0_272, %c0_273] : memref<8x128xf32, #tpu.memory_space<vmem>>, vector<8x128xf32>
    %556 = arith.mulf %546, %555 : vector<8x128xf32>
    %557 = arith.mulf %540, %548 : vector<8x128xf32>
    %558 = arith.addf %556, %557 : vector<8x128xf32>
    %559 = math.tanh %558 : vector<8x128xf32>
    %560 = arith.mulf %554, %559 : vector<8x128xf32>
    %c0_274 = arith.constant 0 : index
    %c0_275 = arith.constant 0 : index
    %561 = vector.load %arg13[%c0_274, %c0_275] : memref<8x128xf32, #tpu.memory_space<vmem>>, vector<8x128xf32>
    tpu.vector_store %arg13[%c0_274, %c0_275], %558 {strides = array<i32>} : memref<8x128xf32, #tpu.memory_space<vmem>>, vector<8x128xf32>,
    %c0_276 = arith.constant 0 : index
    %c0_277 = arith.constant 0 : index
    %562 = vector.load %arg12[%c0_276, %c0_277] : memref<8x128xf32, #tpu.memory_space<vmem>>, vector<8x128xf32>
    tpu.vector_store %arg12[%c0_276, %c0_277], %560 {strides = array<i32>} : memref<8x128xf32, #tpu.memory_space<vmem>>, vector<8x128xf32>,
    %c6_i32_278 = arith.constant 6 : i32
    %563 = arith.index_cast %c6_i32_278 : i32 to index
    %c0_279 = arith.constant 0 : index
    %c0_280 = arith.constant 0 : index
    %564 = vector.load %arg10[%563, %c0_279, %c0_280] : memref<8x8x512xf32, #tpu.memory_space<vmem>>, vector<1x8x512xf32>
    %565 = vector.shape_cast %564 : vector<1x8x512xf32> to vector<8x512xf32>
    %c0_281 = arith.constant 0 : index
    %c0_282 = arith.constant 0 : index
    %566 = vector.load %arg12[%c0_281, %c0_282] : memref<8x128xf32, #tpu.memory_space<vmem>>, vector<8x128xf32>
    %567 = arith.truncf %566 : vector<8x128xf32> to vector<8x128xbf16>
    %c0_283 = arith.constant 0 : index
    %c0_284 = arith.constant 0 : index
    %568 = vector.load %arg5[%c0_283, %c0_284] : memref<128x512xbf16, #tpu.memory_space<vmem>>, vector<128x512xbf16>
    %cst_285 = arith.constant dense<0.000000e+00> : vector<8x512xf32>
    %569 = tpu.matmul %567, %568, %cst_285 {dimension_numbers = #tpu.dot_dimension_numbers<[1], [0], [0], [1], [0, 0, 1, 1], [], []>} : vector<8x128xbf16>, vector<128x512xbf16>, vector<8x512xf32> -> vector<8x512xf32>
    %570 = arith.addf %565, %569 : vector<8x512xf32>
    %571 = vector.extract_strided_slice %570 {offsets = [0, 0], sizes = [8, 128], strides = [1, 1]} : vector<8x512xf32> to vector<8x128xf32>
    %572 = arith.negf %571 : vector<8x128xf32>
    %573 = math.exp %572 : vector<8x128xf32>
    %cst_286 = arith.constant 1.000000e+00 : f32
    %574 = vector.broadcast %cst_286 : f32 to vector<8x128xf32>
    %575 = arith.addf %574, %573 : vector<8x128xf32>
    %576 = arith.divf %574, %575 : vector<8x128xf32>
    %577 = vector.extract_strided_slice %570 {offsets = [0, 128], sizes = [8, 128], strides = [1, 1]} : vector<8x512xf32> to vector<8x128xf32>
    %578 = arith.negf %577 : vector<8x128xf32>
    %579 = math.exp %578 : vector<8x128xf32>
    %cst_287 = arith.constant 1.000000e+00 : f32
    %580 = vector.broadcast %cst_287 : f32 to vector<8x128xf32>
    %581 = arith.addf %580, %579 : vector<8x128xf32>
    %582 = arith.divf %580, %581 : vector<8x128xf32>
    %583 = vector.extract_strided_slice %570 {offsets = [0, 256], sizes = [8, 128], strides = [1, 1]} : vector<8x512xf32> to vector<8x128xf32>
    %584 = math.tanh %583 : vector<8x128xf32>
    %585 = vector.extract_strided_slice %570 {offsets = [0, 384], sizes = [8, 128], strides = [1, 1]} : vector<8x512xf32> to vector<8x128xf32>
    %586 = arith.negf %585 : vector<8x128xf32>
    %587 = math.exp %586 : vector<8x128xf32>
    %cst_288 = arith.constant 1.000000e+00 : f32
    %588 = vector.broadcast %cst_288 : f32 to vector<8x128xf32>
    %589 = arith.addf %588, %587 : vector<8x128xf32>
    %590 = arith.divf %588, %589 : vector<8x128xf32>
    %c0_289 = arith.constant 0 : index
    %c0_290 = arith.constant 0 : index
    %591 = vector.load %arg13[%c0_289, %c0_290] : memref<8x128xf32, #tpu.memory_space<vmem>>, vector<8x128xf32>
    %592 = arith.mulf %582, %591 : vector<8x128xf32>
    %593 = arith.mulf %576, %584 : vector<8x128xf32>
    %594 = arith.addf %592, %593 : vector<8x128xf32>
    %595 = math.tanh %594 : vector<8x128xf32>
    %596 = arith.mulf %590, %595 : vector<8x128xf32>
    %c0_291 = arith.constant 0 : index
    %c0_292 = arith.constant 0 : index
    %597 = vector.load %arg13[%c0_291, %c0_292] : memref<8x128xf32, #tpu.memory_space<vmem>>, vector<8x128xf32>
    tpu.vector_store %arg13[%c0_291, %c0_292], %594 {strides = array<i32>} : memref<8x128xf32, #tpu.memory_space<vmem>>, vector<8x128xf32>,
    %c0_293 = arith.constant 0 : index
    %c0_294 = arith.constant 0 : index
    %598 = vector.load %arg12[%c0_293, %c0_294] : memref<8x128xf32, #tpu.memory_space<vmem>>, vector<8x128xf32>
    tpu.vector_store %arg12[%c0_293, %c0_294], %596 {strides = array<i32>} : memref<8x128xf32, #tpu.memory_space<vmem>>, vector<8x128xf32>,
    %c7_i32_295 = arith.constant 7 : i32
    %599 = arith.index_cast %c7_i32_295 : i32 to index
    %c0_296 = arith.constant 0 : index
    %c0_297 = arith.constant 0 : index
    %600 = vector.load %arg10[%599, %c0_296, %c0_297] : memref<8x8x512xf32, #tpu.memory_space<vmem>>, vector<1x8x512xf32>
    %601 = vector.shape_cast %600 : vector<1x8x512xf32> to vector<8x512xf32>
    %c0_298 = arith.constant 0 : index
    %c0_299 = arith.constant 0 : index
    %602 = vector.load %arg12[%c0_298, %c0_299] : memref<8x128xf32, #tpu.memory_space<vmem>>, vector<8x128xf32>
    %603 = arith.truncf %602 : vector<8x128xf32> to vector<8x128xbf16>
    %c0_300 = arith.constant 0 : index
    %c0_301 = arith.constant 0 : index
    %604 = vector.load %arg5[%c0_300, %c0_301] : memref<128x512xbf16, #tpu.memory_space<vmem>>, vector<128x512xbf16>
    %cst_302 = arith.constant dense<0.000000e+00> : vector<8x512xf32>
    %605 = tpu.matmul %603, %604, %cst_302 {dimension_numbers = #tpu.dot_dimension_numbers<[1], [0], [0], [1], [0, 0, 1, 1], [], []>} : vector<8x128xbf16>, vector<128x512xbf16>, vector<8x512xf32> -> vector<8x512xf32>
    %606 = arith.addf %601, %605 : vector<8x512xf32>
    %607 = vector.extract_strided_slice %606 {offsets = [0, 0], sizes = [8, 128], strides = [1, 1]} : vector<8x512xf32> to vector<8x128xf32>
    %608 = arith.negf %607 : vector<8x128xf32>
    %609 = math.exp %608 : vector<8x128xf32>
    %cst_303 = arith.constant 1.000000e+00 : f32
    %610 = vector.broadcast %cst_303 : f32 to vector<8x128xf32>
    %611 = arith.addf %610, %609 : vector<8x128xf32>
    %612 = arith.divf %610, %611 : vector<8x128xf32>
    %613 = vector.extract_strided_slice %606 {offsets = [0, 128], sizes = [8, 128], strides = [1, 1]} : vector<8x512xf32> to vector<8x128xf32>
    %614 = arith.negf %613 : vector<8x128xf32>
    %615 = math.exp %614 : vector<8x128xf32>
    %cst_304 = arith.constant 1.000000e+00 : f32
    %616 = vector.broadcast %cst_304 : f32 to vector<8x128xf32>
    %617 = arith.addf %616, %615 : vector<8x128xf32>
    %618 = arith.divf %616, %617 : vector<8x128xf32>
    %619 = vector.extract_strided_slice %606 {offsets = [0, 256], sizes = [8, 128], strides = [1, 1]} : vector<8x512xf32> to vector<8x128xf32>
    %620 = math.tanh %619 : vector<8x128xf32>
    %621 = vector.extract_strided_slice %606 {offsets = [0, 384], sizes = [8, 128], strides = [1, 1]} : vector<8x512xf32> to vector<8x128xf32>
    %622 = arith.negf %621 : vector<8x128xf32>
    %623 = math.exp %622 : vector<8x128xf32>
    %cst_305 = arith.constant 1.000000e+00 : f32
    %624 = vector.broadcast %cst_305 : f32 to vector<8x128xf32>
    %625 = arith.addf %624, %623 : vector<8x128xf32>
    %626 = arith.divf %624, %625 : vector<8x128xf32>
    %c0_306 = arith.constant 0 : index
    %c0_307 = arith.constant 0 : index
    %627 = vector.load %arg13[%c0_306, %c0_307] : memref<8x128xf32, #tpu.memory_space<vmem>>, vector<8x128xf32>
    %628 = arith.mulf %618, %627 : vector<8x128xf32>
    %629 = arith.mulf %612, %620 : vector<8x128xf32>
    %630 = arith.addf %628, %629 : vector<8x128xf32>
    %631 = math.tanh %630 : vector<8x128xf32>
    %632 = arith.mulf %626, %631 : vector<8x128xf32>
    %c0_308 = arith.constant 0 : index
    %c0_309 = arith.constant 0 : index
    %633 = vector.load %arg13[%c0_308, %c0_309] : memref<8x128xf32, #tpu.memory_space<vmem>>, vector<8x128xf32>
    tpu.vector_store %arg13[%c0_308, %c0_309], %630 {strides = array<i32>} : memref<8x128xf32, #tpu.memory_space<vmem>>, vector<8x128xf32>,
    %c0_310 = arith.constant 0 : index
    %c0_311 = arith.constant 0 : index
    %634 = vector.load %arg12[%c0_310, %c0_311] : memref<8x128xf32, #tpu.memory_space<vmem>>, vector<8x128xf32>
    tpu.vector_store %arg12[%c0_310, %c0_311], %632 {strides = array<i32>} : memref<8x128xf32, #tpu.memory_space<vmem>>, vector<8x128xf32>,
    %c8_i32_312 = arith.constant 8 : i32
    %c0_313 = arith.constant 0 : index
    %c0_314 = arith.constant 0 : index
    %635 = vector.load %arg12[%c0_313, %c0_314] : memref<8x128xf32, #tpu.memory_space<vmem>>, vector<8x128xf32>
    %636 = arith.truncf %635 : vector<8x128xf32> to vector<8x128xbf16>
    %c0_315 = arith.constant 0 : index
    %c0_316 = arith.constant 0 : index
    %637 = vector.load %arg7[%c0_315, %c0_316] : memref<128x128xbf16, #tpu.memory_space<vmem>>, vector<128x128xbf16>
    %cst_317 = arith.constant dense<0.000000e+00> : vector<8x128xf32>
    %638 = tpu.matmul %636, %637, %cst_317 {dimension_numbers = #tpu.dot_dimension_numbers<[1], [0], [0], [1], [0, 0, 1, 1], [], []>} : vector<8x128xbf16>, vector<128x128xbf16>, vector<8x128xf32> -> vector<8x128xf32>
    %c0_318 = arith.constant 0 : index
    %c0_319 = arith.constant 0 : index
    %639 = vector.load %arg8[%c0_318, %c0_319] : memref<1x128xf32, #tpu.memory_space<vmem>>, vector<1x128xf32>
    %640 = vector.broadcast %639 : vector<1x128xf32> to vector<8x128xf32>
    %641 = arith.addf %638, %640 : vector<8x128xf32>
    %c0_320 = arith.constant 0 : index
    %c0_321 = arith.constant 0 : index
    %642 = vector.load %arg9[%c0_320, %c0_321] : memref<8x128xf32, #tpu.memory_space<vmem>>, vector<8x128xf32>
    tpu.vector_store %arg9[%c0_320, %c0_321], %641 {strides = array<i32>} : memref<8x128xf32, #tpu.memory_space<vmem>>, vector<8x128xf32>,
    return
  }
}

</mosaic_0001>

<bundles_post_ra>
// kernel: decoder_forward.1
= control target key start
LH: loop header
LB: loop body
LE: loop exit
PB: predicated region body
PF: predicated region fallthrough
CT: control target
= control target key end

     0   :  { %14 = vsyncpa [#allocation7], 0  ;;  %s8770_s0 = inlined_call_operand.vmem [shape: bf16[8,8,128], index: 0, kind: input, shape index: {}]   ;;  %s8771_s1 = inlined_call_operand.hbm [shape: bf16[128,512], index: 1, kind: input, shape index: {}]   ;;  %s8772_s2 = inlined_call_operand.hbm [shape: bf16[128,512], index: 2, kind: input, shape index: {}]   ;;  %s8773_s3 = inlined_call_operand.vmem [shape: f32[1,512], index: 3, kind: input, shape index: {}]   ;;  %s8774_s4 = inlined_call_operand.hbm [shape: bf16[128,512], index: 4, kind: input, shape index: {}]   ;;  %s8775_s5 = inlined_call_operand.hbm [shape: bf16[128,512], index: 5, kind: input, shape index: {}]   ;;  %s8776_s6 = inlined_call_operand.vmem [shape: f32[1,512], index: 6, kind: input, shape index: {}]   ;;  %s8777_s7 = inlined_call_operand.vmem [shape: bf16[128,128], index: 7, kind: input, shape index: {}]   ;;  %s8778_s8 = inlined_call_operand.hbm [shape: f32[1,128], index: 8, kind: input, shape index: {}]   ;;  %s8779_s9 = inlined_call_operand.vmem [shape: f32[8,128], index: 9, kind: output, shape index: {}]  }
   0x1   :  { %15 = vsyncpa [#allocation9], 0 }
   0x2   :  { %16 = vsyncpa [#allocation12], 0  ;;  %s7399_s30 = smov [#allocation8]   ;;  %s7400_s11 = smov [#allocation11]  }
   0x3   :  { %s36_s10 = sshll.u32 %s7399_s30, 4  ;;  %s62_s12 = sshll.u32 %s7400_s11, 4  ;;  %s37_s10 = int_to_ptr.vmem [resolvable:$true] %s36_s10  ;;  %s7460_s12 = int_to_ptr.vmem [resolvable:$true] %s62_s12 }
   0x4   :  { %s7283_s15 = scalar_lea.hbm %s8772_s2, 4096 }
   0x5   :  { %p7284_p0 = scmp.ne.s32.totalorder %s8772_s2, %s7283_s15  ;;  %p7287_p1 = scmp.lt.u32.totalorder %s7283_s15, %s8772_s2 }
   0x7   :  { %p7289_p2 = pnand %p7287_p1, %p7284_p0 }
   0x9   :  { %7292 = shalt.err (!%p7289_p2)
}
   0xa   :  { %s7293_s20 = scalar_lea.vmem %s37_s10, 4096  ;;  %p7298_p4 = scmp.lt.s32.totalorder %s37_s10, %s37_s10 }
   0xb   :  { %p7294_p3 = scmp.ne.s32.totalorder %s37_s10, %s7293_s20  ;;  %p7299_p5 = scmp.lt.s32.totalorder %s7293_s20, %s7293_s20 }
   0xd   :  { %p7300_p6 = por %p7299_p5, %p7298_p4 }
   0xf   :  { %p7301_p7 = pnand %p7300_p6, %p7294_p3 }
  0x11   :  { %7304 = shalt.err (!%p7301_p7)
}
  0x12   :  { %s7401_s21 = smov 256   ;;  %s7402_s22 = smov 16  }
  0x13   :  { %42 = dma.hbm_to_vmem [thread:$0]  %s8772_s2, 4096, %s37_s10, [#allocation9], %s7401_s21, %s7401_s21, %s7402_s22  }
  0x14   :  { %s7305_s27 = scalar_lea.hbm %s8775_s5, 4096 }
  0x15   :  { %p7306_p8 = scmp.ne.s32.totalorder %s8775_s5, %s7305_s27  ;;  %p7309_p9 = scmp.lt.u32.totalorder %s7305_s27, %s8775_s5 }
  0x17   :  { %p7311_p10 = pnand %p7309_p9, %p7306_p8 }
  0x19   :  { %7314 = shalt.err (!%p7311_p10)
}
  0x1a   :  { %s7315_s13 = scalar_lea.vmem %s7460_s12, 4096  ;;  %p7320_p12 = scmp.lt.s32.totalorder %s7460_s12, %s7460_s12 }
  0x1b   :  { %p7316_p11 = scmp.ne.s32.totalorder %s7460_s12, %s7315_s13  ;;  %p7321_p13 = scmp.lt.s32.totalorder %s7315_s13, %s7315_s13 }
  0x1d   :  { %p7322_p0 = por %p7321_p13, %p7320_p12 }
  0x1f   :  { %p7323_p1 = pnand %p7322_p0, %p7316_p11 }
  0x21   :  { %7326 = shalt.err (!%p7323_p1)
}
  0x22   :  { %68 = dma.hbm_to_vmem [thread:$0]  %s8775_s5, 4096, %s7460_s12, [#allocation12], %s7401_s21, %s7401_s21, %s7402_s22  }
  0x23   :  { %s7403_s14 = smov [#allocation6]   ;;  %s7404_s16 = smov [#allocation10]  }
  0x24   :  { %s24_s15 = sshll.u32 %s7403_s14, 4  ;;  %s50_s17 = sshll.u32 %s7404_s16, 4  ;;  %s25_s15 = int_to_ptr.vmem [resolvable:$true] %s24_s15  ;;  %s7497_s17 = int_to_ptr.vmem [resolvable:$true] %s50_s17 }
  0x25   :  { %s7327_s20 = scalar_lea.hbm %s8771_s1, 4096 }
  0x26   :  { %p7328_p2 = scmp.ne.s32.totalorder %s8771_s1, %s7327_s20  ;;  %p7331_p3 = scmp.lt.u32.totalorder %s7327_s20, %s8771_s1 }
  0x28   :  { %p7333_p4 = pnand %p7331_p3, %p7328_p2 }
  0x2a   :  { %7336 = shalt.err (!%p7333_p4)
}
  0x2b   :  { %s7337_s5 = scalar_lea.vmem %s25_s15, 4096  ;;  %p7342_p6 = scmp.lt.s32.totalorder %s25_s15, %s25_s15 }
  0x2c   :  { %p7338_p5 = scmp.ne.s32.totalorder %s25_s15, %s7337_s5  ;;  %p7343_p7 = scmp.lt.s32.totalorder %s7337_s5, %s7337_s5 }
  0x2e   :  { %p7344_p8 = por %p7343_p7, %p7342_p6 }
  0x30   :  { %p7345_p9 = pnand %p7344_p8, %p7338_p5 }
  0x32   :  { %7348 = shalt.err (!%p7345_p9)
}
  0x33   :  { %30 = dma.hbm_to_vmem [thread:$0]  %s8771_s1, 4096, %s25_s15, [#allocation7], %s7401_s21, %s7401_s21, %s7402_s22  }
  0x34   :  { %s7349_s30 = scalar_lea.hbm %s8774_s4, 4096 }
  0x35   :  { %p7350_p10 = scmp.ne.s32.totalorder %s8774_s4, %s7349_s30  ;;  %p7353_p11 = scmp.lt.u32.totalorder %s7349_s30, %s8774_s4 }
  0x37   :  { %p7355_p12 = pnand %p7353_p11, %p7350_p10 }
  0x39   :  { %7358 = shalt.err (!%p7355_p12)
}
  0x3a   :  { %s7359_s14 = scalar_lea.vmem %s7497_s17, 4096  ;;  %p7364_p0 = scmp.lt.s32.totalorder %s7497_s17, %s7497_s17 }
  0x3b   :  { %p7360_p13 = scmp.ne.s32.totalorder %s7497_s17, %s7359_s14  ;;  %p7365_p1 = scmp.lt.s32.totalorder %s7359_s14, %s7359_s14 }
  0x3d   :  { %p7366_p2 = por %p7365_p1, %p7364_p0 }
  0x3f   :  { %p7367_p3 = pnand %p7366_p2, %p7360_p13 }
  0x41   :  { %7370 = shalt.err (!%p7367_p3)
}
  0x42   :  { %56 = dma.hbm_to_vmem [thread:$0]  %s8774_s4, 4096, %s7497_s17, [#allocation9], %s7401_s21, %s7401_s21, %s7402_s22  }
  0x43   :  { %s7405_s16 = smov [#allocation13]   ;;  %s7371_s23 = scalar_lea.hbm %s8778_s8, 16 }
  0x44   :  { %s79_s18 = sshll.u32 %s7405_s16, 4  ;;  %p7372_p4 = scmp.ne.s32.totalorder %s8778_s8, %s7371_s23  ;;  %s80_s18 = int_to_ptr.vmem [resolvable:$true] %s79_s18 }
  0x45   :  { %p7375_p5 = scmp.lt.u32.totalorder %s7371_s23, %s8778_s8 }
  0x47   :  { %p7377_p6 = pnand %p7375_p5, %p7372_p4 }
  0x49   :  { %7380 = shalt.err (!%p7377_p6)
}
  0x4a   :  { %s7381_s12 = scalar_lea.vmem %s80_s18, 16  ;;  %s7385_s4 = scalar_lea.vmem %s80_s18, 32 }
  0x4b   :  { %p7382_p7 = scmp.ne.s32.totalorder %s80_s18, %s7381_s12  ;;  %p7386_p8 = scmp.lt.s32.totalorder %s80_s18, %s80_s18 }
  0x4c   :  { %p7387_p9 = scmp.lt.s32.totalorder %s7385_s4, %s7381_s12 }
  0x4e   :  { %p7388_p10 = por %p7387_p9, %p7386_p8 }
  0x50   :  { %p7389_p11 = pnand %p7388_p10, %p7382_p7 }
  0x52   :  { %7392 = shalt.err (!%p7389_p11)
}
  0x53   :  { %82 = dma.hbm_to_vmem [thread:$0]  %s8778_s8, 16, %s80_s18, [#allocation12]  }
  0x54   :  { %7393 = dma.done.wait [#allocation7], 4096  }
  0x55   :  { %7394 = vsyncadd [#allocation7], 4294963200 }
  0x56   :  { %7395 = dma.done.wait [#allocation9], 8192  }
  0x57   :  { %7396 = vsyncadd [#allocation9], 4294959104 }
  0x58   :  { %7397 = dma.done.wait [#allocation12], 4112  }
  0x59   :  { %7398 = vsyncadd [#allocation12], 4294963184  ;;  %v8786_v0 = vmov 0   ;;  %v6727_v1 = vld [vmem:[#allocation6 + $0x4] ss:$16 sps:$4 sm:$0xff]   ;;  %v6788_v44 = vld [vmem:[%s8770_s0 + $0x8] sm:$0xff]  }
  0x5a   :  { %377 = vmatprep.mubr.bf16.mxu0 %v8786_v0  ;;  %450 = vmatprep.mubr.bf16.mxu1 %v8786_v0  ;;  %v6729_v2 = vld [vmem:[#allocation6 + $0xc] ss:$16 sps:$4 sm:$0xff]   ;;  %v6731_v3 = vld [vmem:[#allocation6] ss:$16 sps:$4 sm:$0xff]   ;;  %v6732_v4 = vld [vmem:[#allocation6 + $0x8] ss:$16 sps:$4 sm:$0xff]  }
  0x5b   :  { %345 = vmatprep.subr.bf16.mxu0 %v6727_v1  ;;  %418 = vmatprep.subr.bf16.mxu1 %v6729_v2  ;;  %v6733_v5 = vld [vmem:[#allocation6 + $0x24] ss:$16 sps:$4 sm:$0xff]   ;;  %v6735_v6 = vld [vmem:[#allocation6 + $0x2c] ss:$16 sps:$4 sm:$0xff]   ;;  %v6737_v7 = vld [vmem:[#allocation6 + $0x20] ss:$16 sps:$4 sm:$0xff]  }
  0x5c   :  { %346 = vmatpush1.bf16.msra.mxu0 %v6731_v3  ;;  %419 = vmatpush1.bf16.msra.mxu1 %v6732_v4  ;;  %v6738_v8 = vld [vmem:[#allocation6 + $0x28] ss:$16 sps:$4 sm:$0xff]   ;;  %v6739_v9 = vld [vmem:[#allocation6 + $0x44] ss:$16 sps:$4 sm:$0xff]   ;;  %v6741_v10 = vld [vmem:[#allocation6 + $0x4c] ss:$16 sps:$4 sm:$0xff]  }
  0x5d   :  { %347 = vmatprep.subr.bf16.mxu0 %v6733_v5  ;;  %420 = vmatprep.subr.bf16.mxu1 %v6735_v6  ;;  %v6743_v11 = vld [vmem:[#allocation6 + $0x40] ss:$16 sps:$4 sm:$0xff]   ;;  %v6744_v12 = vld [vmem:[#allocation6 + $0x48] ss:$16 sps:$4 sm:$0xff]   ;;  %v6745_v13 = vld [vmem:[#allocation6 + $0x64] ss:$16 sps:$4 sm:$0xff]  }
  0x5e   :  { %v6747_v14 = vld [vmem:[#allocation6 + $0x6c] ss:$16 sps:$4 sm:$0xff]   ;;  %v6749_v15 = vld [vmem:[#allocation6 + $0x60] ss:$16 sps:$4 sm:$0xff]   ;;  %v6750_v16 = vld [vmem:[#allocation6 + $0x68] ss:$16 sps:$4 sm:$0xff]  }
  0x5f   :  { %v6751_v17 = vld [vmem:[#allocation6 + $0x84] ss:$16 sps:$4 sm:$0xff]   ;;  %v6753_v18 = vld [vmem:[#allocation6 + $0x8c] ss:$16 sps:$4 sm:$0xff]   ;;  %v6755_v19 = vld [vmem:[#allocation6 + $0x80] ss:$16 sps:$4 sm:$0xff]  }
  0x60   :  { %348 = vmatpush1.bf16.msra.mxu0 %v6737_v7  ;;  %421 = vmatpush1.bf16.msra.mxu1 %v6738_v8  ;;  %v6756_v20 = vld [vmem:[#allocation6 + $0x88] ss:$16 sps:$4 sm:$0xff]   ;;  %v6757_v21 = vld [vmem:[#allocation6 + $0xa4] ss:$16 sps:$4 sm:$0xff]   ;;  %v6759_v22 = vld [vmem:[#allocation6 + $0xac] ss:$16 sps:$4 sm:$0xff]   ;;  %v141_v7 = vlaneseq }
  0x61   :  { %349 = vmatprep.subr.bf16.mxu0 %v6739_v9  ;;  %422 = vmatprep.subr.bf16.mxu1 %v6741_v10  ;;  %v6761_v23 = vld [vmem:[#allocation6 + $0xa0] ss:$16 sps:$4 sm:$0xff]   ;;  %v6762_v24 = vld [vmem:[#allocation6 + $0xa8] ss:$16 sps:$4 sm:$0xff]   ;;  %v6763_v25 = vld [vmem:[#allocation6 + $0xc4] ss:$16 sps:$4 sm:$0xff]  }
  0x62   :  { %v6765_v26 = vld [vmem:[#allocation6 + $0xcc] ss:$16 sps:$4 sm:$0xff]   ;;  %v6767_v27 = vld [vmem:[#allocation6 + $0xc0] ss:$16 sps:$4 sm:$0xff]   ;;  %v6768_v28 = vld [vmem:[#allocation6 + $0xc8] ss:$16 sps:$4 sm:$0xff]  }
  0x63   :  { %v6769_v29 = vld [vmem:[#allocation6 + $0xe4] ss:$16 sps:$4 sm:$0xff]   ;;  %v6771_v30 = vld [vmem:[#allocation6 + $0xec] ss:$16 sps:$4 sm:$0xff]   ;;  %v6773_v31 = vld [vmem:[#allocation6 + $0xe0] ss:$16 sps:$4 sm:$0xff]  }
  0x64   :  { %350 = vmatpush1.bf16.msra.mxu0 %v6743_v11  ;;  %423 = vmatpush1.bf16.msra.mxu1 %v6744_v12  ;;  %v6774_v32 = vld [vmem:[#allocation6 + $0xe8] ss:$16 sps:$4 sm:$0xff]   ;;  %v7548_v33 = vld [vmem:[#allocation8 + $0x4] ss:$16 sps:$4 sm:$0xff]   ;;  %v7550_v34 = vld [vmem:[#allocation8 + $0xc] ss:$16 sps:$4 sm:$0xff]  }
  0x65   :  { %351 = vmatprep.subr.bf16.mxu0 %v6745_v13  ;;  %424 = vmatprep.subr.bf16.mxu1 %v6747_v14  ;;  %v6775_v35 = vld [vmem:[%s8770_s0] sm:$0xff]   ;;  %v7557_v37 = vld [vmem:[#allocation8 + $0x8] ss:$16 sps:$4 sm:$0xff]   ;;  %v7563_v39 = vld [vmem:[#allocation8 + $0x2c] ss:$16 sps:$4 sm:$0xff]   ;;  %v8784_v6 = vmov 0.0|0.0  }
  0x66   :  { %v7555_v36 = vld [vmem:[#allocation8] ss:$16 sps:$4 sm:$0xff]   ;;  %v7561_v38 = vld [vmem:[#allocation8 + $0x24] ss:$16 sps:$4 sm:$0xff]   ;;  %v7569_v41 = vld [vmem:[#allocation8 + $0x28] ss:$16 sps:$4 sm:$0xff]  }
  0x67   :  { %v7565_v40 = vld [vmem:[#allocation8 + $0x20] ss:$16 sps:$4 sm:$0xff]   ;;  %v7573_v42 = vld [vmem:[#allocation8 + $0x44] ss:$16 sps:$4 sm:$0xff]   ;;  %v7575_v43 = vld [vmem:[#allocation8 + $0x4c] ss:$16 sps:$4 sm:$0xff]  }
  0x68   :  { %352 = vmatpush1.bf16.msra.mxu0 %v6749_v15  ;;  %425 = vmatpush1.bf16.msra.mxu1 %v6750_v16  ;;  %v7582_v45 = vld [vmem:[#allocation8 + $0x40] ss:$16 sps:$4 sm:$0xff]   ;;  %v7584_v46 = vld [vmem:[#allocation8 + $0x48] ss:$16 sps:$4 sm:$0xff]   ;;  %v7588_v47 = vld [vmem:[#allocation8 + $0x64] ss:$16 sps:$4 sm:$0xff]  }
  0x69   :  { %353 = vmatprep.subr.bf16.mxu0 %v6751_v17  ;;  %426 = vmatprep.subr.bf16.mxu1 %v6753_v18  ;;  %v7592_v48 = vld [vmem:[#allocation8 + $0x6c] ss:$16 sps:$4 sm:$0xff]   ;;  %v7594_v49 = vld [vmem:[#allocation8 + $0x60] ss:$16 sps:$4 sm:$0xff]   ;;  %v7596_v50 = vld [vmem:[#allocation8 + $0x68] ss:$16 sps:$4 sm:$0xff]  }
  0x6a   :  { %v7600_v51 = vld [vmem:[#allocation8 + $0x84] ss:$16 sps:$4 sm:$0xff]   ;;  %v7604_v52 = vld [vmem:[#allocation8 + $0x8c] ss:$16 sps:$4 sm:$0xff]   ;;  %v7611_v54 = vld [vmem:[#allocation8 + $0x80] ss:$16 sps:$4 sm:$0xff]  }
  0x6b   :  { %v6801_v53 = vld [vmem:[%s8770_s0 + $0x10] sm:$0xff]   ;;  %v7613_v55 = vld [vmem:[#allocation8 + $0x88] ss:$16 sps:$4 sm:$0xff]   ;;  %v7617_v57 = vld [vmem:[#allocation8 + $0xac] ss:$16 sps:$4 sm:$0xff]   ;;  %v7702_v8 = vshrl.u32 %v141_v7, 7 }
  0x6c   :  { %354 = vmatpush1.bf16.msra.mxu0 %v6755_v19  ;;  %427 = vmatpush1.bf16.msra.mxu1 %v6756_v20  ;;  %v7615_v56 = vld [vmem:[#allocation8 + $0xa4] ss:$16 sps:$4 sm:$0xff]   ;;  %v7623_v58 = vld [vmem:[#allocation8 + $0xa0] ss:$16 sps:$4 sm:$0xff]   ;;  %v7625_v59 = vld [vmem:[#allocation8 + $0xa8] ss:$16 sps:$4 sm:$0xff]  }
  0x6d   :  { %355 = vmatprep.subr.bf16.mxu0 %v6757_v21  ;;  %428 = vmatprep.subr.bf16.mxu1 %v6759_v22  ;;  %v7627_v60 = vld [vmem:[#allocation8 + $0xc4] ss:$16 sps:$4 sm:$0xff]   ;;  %v7629_v61 = vld [vmem:[#allocation8 + $0xcc] ss:$16 sps:$4 sm:$0xff]   ;;  %v7640_v63 = vld [vmem:[#allocation8 + $0xc0] ss:$16 sps:$4 sm:$0xff]  }
  0x6e   :  { %v6814_v62 = vld [vmem:[%s8770_s0 + $0x18] sm:$0xff]   ;;  %v7644_v2 = vld [vmem:[#allocation8 + $0xe4] ss:$16 sps:$4 sm:$0xff]   ;;  %v7652_v4 = vld [vmem:[#allocation8 + $0xe0] ss:$16 sps:$4 sm:$0xff]   ;;  %8790 = vst [vmem:[#allocation17_spill] sm:$0xff] %v7702_v8 }
  0x6f   :  { %v7642_v1 = vld [vmem:[#allocation8 + $0xc8] ss:$16 sps:$4 sm:$0xff]   ;;  %v7646_v3 = vld [vmem:[#allocation8 + $0xec] ss:$16 sps:$4 sm:$0xff]   ;;  %v8782_v9 = vsub.s32 2, %v7702_v8  ;;  %v8780_v10 = vsub.s32 3, %v7702_v8 }
  0x70   :  { %356 = vmatpush1.bf16.msra.mxu0 %v6761_v23  ;;  %429 = vmatpush1.bf16.msra.mxu1 %v6762_v24  ;;  %v7654_v5 = vld [vmem:[#allocation8 + $0xe8] ss:$16 sps:$4 sm:$0xff]   ;;  %v8783_v11 = vsub.s32 0, %v7702_v8  ;;  %v139_v12 = vld [vmem:[%s8773_s3] sm:$0xf]  ;;  %v8781_v13 = vsub.s32 1, %v7702_v8 }
  0x71   :  { %357 = vmatprep.subr.bf16.mxu0 %v6763_v25  ;;  %430 = vmatprep.subr.bf16.mxu1 %v6765_v26  ;;  %v7713_v14 = vrot.slane %v139_v12, %v8782_v9  ;;  %v7721_v17 = vrot.slane %v139_v12, %v8780_v10  ;;  %vm7409_vm0 = vmmov 0  }
  0x72   :  { %v144_v18 = vrot.slane %v139_v12, %v8783_v11  ;;  %v148_v21 = vrot.slane %v139_v12, %v8781_v13 }
  0x74   :  { %358 = vmatpush1.bf16.msra.mxu0 %v6767_v27  ;;  %431 = vmatpush1.bf16.msra.mxu1 %v6768_v28 }
  0x75   :  { %359 = vmatprep.subr.bf16.mxu0 %v6769_v29  ;;  %432 = vmatprep.subr.bf16.mxu1 %v6771_v30 }
  0x78   :  { %360 = vmatpush1.bf16.msra.mxu0 %v6773_v31  ;;  %433 = vmatpush1.bf16.msra.mxu1 %v6774_v32 }
  0x79   :  { %723 = vmatprep.subr.bf16.mxu0 %v7548_v33  ;;  %764 = vmatprep.subr.bf16.mxu1 %v7550_v34 }
  0x7b   :  { %378 = vmatmul.mubr.bf16.vlgmr.msra.gmra.mrb[0].mxu0 %v6775_v35  ;;  %451 = vmatmul.mubr.bf16.vlgmr.msra.gmra.mrb[0].mxu1 %v6775_v35 }
  0x7c   :  { %724 = vmatpush1.bf16.msra.mxu0 %v7555_v36  ;;  %765 = vmatpush1.bf16.msra.mxu1 %v7557_v37 }
  0x7d   :  { %725 = vmatprep.subr.bf16.mxu0 %v7561_v38  ;;  %766 = vmatprep.subr.bf16.mxu1 %v7563_v39 }
  0x7e   :  { %387 = vmatprep.mubr.bf16.mxu0 %v8786_v0  ;;  %460 = vmatprep.mubr.bf16.mxu1 %v8786_v0 }
  0x80   :  { %726 = vmatpush1.bf16.msra.mxu0 %v7565_v40  ;;  %767 = vmatpush1.bf16.msra.mxu1 %v7569_v41 }
  0x81   :  { %727 = vmatprep.subr.bf16.mxu0 %v7573_v42  ;;  %768 = vmatprep.subr.bf16.mxu1 %v7575_v43 }
  0x83   :  { %388 = vmatmul.mubr.bf16.gmra.mrb[4].mxu0 %v6788_v44  ;;  %461 = vmatmul.mubr.bf16.gmra.mrb[4].mxu1 %v6788_v44 }
  0x84   :  { %728 = vmatpush1.bf16.msra.mxu0 %v7582_v45  ;;  %769 = vmatpush1.bf16.msra.mxu1 %v7584_v46 }
  0x85   :  { %729 = vmatprep.subr.bf16.mxu0 %v7588_v47  ;;  %770 = vmatprep.subr.bf16.mxu1 %v7592_v48 }
  0x86   :  { %397 = vmatprep.mubr.bf16.mxu0 %v8786_v0  ;;  %470 = vmatprep.mubr.bf16.mxu1 %v8786_v0 }
  0x88   :  { %730 = vmatpush1.bf16.msra.mxu0 %v7594_v49  ;;  %771 = vmatpush1.bf16.msra.mxu1 %v7596_v50 }
  0x89   :  { %731 = vmatprep.subr.bf16.mxu0 %v7600_v51  ;;  %772 = vmatprep.subr.bf16.mxu1 %v7604_v52 }
  0x8b   :  { %398 = vmatmul.mubr.bf16.gmra.mrb[8].mxu0 %v6801_v53  ;;  %471 = vmatmul.mubr.bf16.gmra.mrb[8].mxu1 %v6801_v53 }
  0x8c   :  { %732 = vmatpush1.bf16.msra.mxu0 %v7611_v54  ;;  %773 = vmatpush1.bf16.msra.mxu1 %v7613_v55 }
  0x8d   :  { %733 = vmatprep.subr.bf16.mxu0 %v7615_v56  ;;  %774 = vmatprep.subr.bf16.mxu1 %v7617_v57 }
  0x8e   :  { %407 = vmatprep.mubr.bf16.mxu0 %v8786_v0  ;;  %480 = vmatprep.mubr.bf16.mxu1 %v8786_v0 }
  0x90   :  { %734 = vmatpush1.bf16.msra.mxu0 %v7623_v58  ;;  %775 = vmatpush1.bf16.msra.mxu1 %v7625_v59 }
  0x91   :  { %735 = vmatprep.subr.bf16.mxu0 %v7627_v60  ;;  %776 = vmatprep.subr.bf16.mxu1 %v7629_v61 }
  0x93   :  { %408 = vmatmul.mubr.bf16.gmra.mrb[12].mxu0 %v6814_v62  ;;  %481 = vmatmul.mubr.bf16.gmra.mrb[12].mxu1 %v6814_v62 }
  0x94   :  { %736 = vmatpush1.bf16.msra.mxu0 %v7640_v63  ;;  %777 = vmatpush1.bf16.msra.mxu1 %v7642_v1 }
  0x95   :  { %737 = vmatprep.subr.bf16.mxu0 %v7644_v2  ;;  %778 = vmatprep.subr.bf16.mxu1 %v7646_v3 }
  0x96   :  { %755 = vmatprep.mubr.bf16.mxu0 %v8786_v0  ;;  %796 = vmatprep.mubr.bf16.mxu1 %v8786_v0 }
  0x98   :  { %738 = vmatpush1.bf16.msra.mxu0 %v7652_v4  ;;  %779 = vmatpush1.bf16.msra.mxu1 %v7654_v5 }
  0x99   :  { %1036 = vmatprep.subr.bf16.mxu0 %v7548_v33  ;;  %1077 = vmatprep.subr.bf16.mxu1 %v7550_v34 }
  0x9b   :  { %756 = vmatmul.mubr.bf16.vlgmr.msra.gmra.mrb[16].mxu0 %v8784_v6  ;;  %797 = vmatmul.mubr.bf16.vlgmr.msra.gmra.mrb[16].mxu1 %v8784_v6 }
  0x9c   :  { %1037 = vmatpush1.bf16.msra.mxu0 %v7555_v36  ;;  %1078 = vmatpush1.bf16.msra.mxu1 %v7557_v37 }
  0x9d   :  { %1038 = vmatprep.subr.bf16.mxu0 %v7561_v38  ;;  %1079 = vmatprep.subr.bf16.mxu1 %v7563_v39 }
  0x9e   :  { %1068 = vmatprep.mubr.bf16.mxu0 %v8786_v0  ;;  %1109 = vmatprep.mubr.bf16.mxu1 %v8786_v0 }
  0xa0   :  { %1039 = vmatpush1.bf16.msra.mxu0 %v7565_v40  ;;  %1080 = vmatpush1.bf16.msra.mxu1 %v7569_v41 }
  0xa1   :  { %1040 = vmatprep.subr.bf16.mxu0 %v7573_v42  ;;  %1081 = vmatprep.subr.bf16.mxu1 %v7575_v43 }
  0xa4   :  { %1041 = vmatpush1.bf16.msra.mxu0 %v7582_v45  ;;  %1082 = vmatpush1.bf16.msra.mxu1 %v7584_v46 }
  0xa5   :  { %1042 = vmatprep.subr.bf16.mxu0 %v7588_v47  ;;  %1083 = vmatprep.subr.bf16.mxu1 %v7592_v48 }
  0xa8   :  { %1043 = vmatpush1.bf16.msra.mxu0 %v7594_v49  ;;  %1084 = vmatpush1.bf16.msra.mxu1 %v7596_v50 }
  0xa9   :  { %1044 = vmatprep.subr.bf16.mxu0 %v7600_v51  ;;  %1085 = vmatprep.subr.bf16.mxu1 %v7604_v52 }
  0xac   :  { %1045 = vmatpush1.bf16.msra.mxu0 %v7611_v54  ;;  %1086 = vmatpush1.bf16.msra.mxu1 %v7613_v55 }
  0xad   :  { %1046 = vmatprep.subr.bf16.mxu0 %v7615_v56  ;;  %1087 = vmatprep.subr.bf16.mxu1 %v7617_v57 }
  0xb0   :  { %1047 = vmatpush1.bf16.msra.mxu0 %v7623_v58  ;;  %1088 = vmatpush1.bf16.msra.mxu1 %v7625_v59 }
  0xb1   :  { %1048 = vmatprep.subr.bf16.mxu0 %v7627_v60  ;;  %1089 = vmatprep.subr.bf16.mxu1 %v7629_v61 }
  0xb4   :  { %1049 = vmatpush1.bf16.msra.mxu0 %v7640_v63  ;;  %1090 = vmatpush1.bf16.msra.mxu1 %v7642_v1 }
  0xb5   :  { %1050 = vmatprep.subr.bf16.mxu0 %v7644_v2  ;;  %1091 = vmatprep.subr.bf16.mxu1 %v7646_v3 }
  0xb8   :  { %1051 = vmatpush1.bf16.msra.mxu0 %v7652_v4  ;;  %1092 = vmatpush1.bf16.msra.mxu1 %v7654_v5 }
  0xb9   :  { %1350 = vmatprep.subr.bf16.mxu0 %v7548_v33  ;;  %1391 = vmatprep.subr.bf16.mxu1 %v7550_v34 }
 0x14e   :  { %v7715_v15 = vpop.f32.mrb[0].mxu0  ;;  %v7717_v16 = vpop.f32.mrb[0].mxu1 }
 0x14f   :  { %v381_v19 = vpop.f32.mrb[1].mxu0  ;;  %v454_v20 = vpop.f32.mrb[1].mxu1 }
 0x150   :  { %v383_v22 = vpop.f32.mrb[2].mxu0  ;;  %v456_v23 = vpop.f32.mrb[2].mxu1 }
 0x151   :  { %v7727_v24 = vadd.f32 %v383_v22, %v144_v18  ;;  %v385_v25 = vpop.f32.mrb[3].mxu0  ;;  %v7730_v26 = vadd.f32 %v456_v23, %v7713_v14  ;;  %v458_v27 = vpop.f32.mrb[3].mxu1 }
 0x152   :  { %v7732_v28 = vadd.f32 %v385_v25, %v148_v21  ;;  %v7735_v29 = vadd.f32 %v458_v27, %v7721_v17 }
 0x156   :  { %v389_v30 = vpop.f32.mrb[4].mxu0  ;;  %v462_v31 = vpop.f32.mrb[4].mxu1 }
 0x157   :  { %v7737_v32 = vadd.f32 %v389_v30, %v144_v18  ;;  %v391_v35 = vpop.f32.mrb[5].mxu0  ;;  %v7740_v44 = vadd.f32 %v462_v31, %v7713_v14  ;;  %v464_v53 = vpop.f32.mrb[5].mxu1 }
 0x158   :  { %v7742_v62 = vadd.f32 %v391_v35, %v148_v21  ;;  %v393_v7 = vpop.f32.mrb[6].mxu0  ;;  %v7745_v12 = vadd.f32 %v464_v53, %v7721_v17  ;;  %v466_v22 = vpop.f32.mrb[6].mxu1 }
 0x159   :  { %v7747_v23 = vadd.f32 %v393_v7, %v144_v18  ;;  %v395_v25 = vpop.f32.mrb[7].mxu0  ;;  %v7750_v27 = vadd.f32 %v466_v22, %v7713_v14  ;;  %v468_v30 = vpop.f32.mrb[7].mxu1 }
 0x15a   :  { %8791 = vst [vmem:[#allocation18_spill] sm:$0xff] %v7745_v12  ;;  %v7752_v10 = vadd.f32 %v395_v25, %v148_v21  ;;  %v7755_v31 = vadd.f32 %v468_v30, %v7721_v17 }
 0x15b   :  { %8792 = vst [vmem:[#allocation19_spill] sm:$0xff] %v7747_v23  ;;  %8793 = vst [vmem:[#allocation20_spill] sm:$0xff] %v7750_v27 }
 0x15c   :  { %8794 = vst [vmem:[#allocation21_spill] sm:$0xff] %v7752_v10  ;;  %8795 = vst [vmem:[#allocation22_spill] sm:$0xff] %v7755_v31 }
 0x15e   :  { %v399_v13 = vpop.f32.mrb[8].mxu0  ;;  %v472_v35 = vpop.f32.mrb[8].mxu1 }
 0x15f   :  { %v7757_v9 = vadd.f32 %v399_v13, %v144_v18  ;;  %v401_v11 = vpop.f32.mrb[9].mxu0  ;;  %v7760_v53 = vadd.f32 %v472_v35, %v7713_v14  ;;  %v474_v7 = vpop.f32.mrb[9].mxu1 }
 0x160   :  { %v7762_v6 = vadd.f32 %v401_v11, %v148_v21  ;;  %v403_v0 = vpop.f32.mrb[10].mxu0  ;;  %v7765_v22 = vadd.f32 %v474_v7, %v7721_v17  ;;  %v476_v25 = vpop.f32.mrb[10].mxu1 }
 0x161   :  { %8796 = vst [vmem:[#allocation23_spill] sm:$0xff] %v7757_v9  ;;  %8797 = vst [vmem:[#allocation24_spill] sm:$0xff] %v7760_v53  ;;  %v7767_v8 = vadd.f32 %v403_v0, %v144_v18  ;;  %v405_v30 = vpop.f32.mrb[11].mxu0  ;;  %v7770_v31 = vadd.f32 %v476_v25, %v7713_v14  ;;  %v478_v13 = vpop.f32.mrb[11].mxu1 }
 0x162   :  { %8798 = vst [vmem:[#allocation25_spill] sm:$0xff] %v7762_v6  ;;  %8799 = vst [vmem:[#allocation26_spill] sm:$0xff] %v7765_v22  ;;  %v7772_v9 = vadd.f32 %v405_v30, %v148_v21  ;;  %v7775_v35 = vadd.f32 %v478_v13, %v7721_v17 }
 0x163   :  { %8800 = vst [vmem:[#allocation27_spill] sm:$0xff] %v7767_v8  ;;  %8801 = vst [vmem:[#allocation28_spill] sm:$0xff] %v7770_v31 }
 0x164   :  { %8802 = vst [vmem:[#allocation29_spill] sm:$0xff] %v7772_v9  ;;  %8803 = vst [vmem:[#allocation30_spill] sm:$0xff] %v7775_v35 }
 0x166   :  { %v409_v53 = vpop.f32.mrb[12].mxu0  ;;  %v482_v11 = vpop.f32.mrb[12].mxu1 }
 0x167   :  { %v7777_v6 = vadd.f32 %v409_v53, %v144_v18  ;;  %v411_v10 = vpop.f32.mrb[13].mxu0  ;;  %v7780_v7 = vadd.f32 %v482_v11, %v7713_v14  ;;  %v484_v0 = vpop.f32.mrb[13].mxu1 }
 0x168   :  { %v7782_v8 = vadd.f32 %v411_v10, %v148_v21  ;;  %v413_v22 = vpop.f32.mrb[14].mxu0  ;;  %v7785_v25 = vadd.f32 %v484_v0, %v7721_v17  ;;  %v486_v30 = vpop.f32.mrb[14].mxu1  ;;  %v380_v10 = vadd.f32 %v7715_v15, %v144_v18  ;;  %v382_v0 = vadd.f32 %v381_v19, %v148_v21 }
 0x169   :  { %8804 = vst [vmem:[#allocation31_spill] sm:$0xff] %v7777_v6  ;;  %8805 = vst [vmem:[#allocation32_spill] sm:$0xff] %v7780_v7  ;;  %v7787_v9 = vadd.f32 %v413_v22, %v144_v18  ;;  %v415_v13 = vpop.f32.mrb[15].mxu0  ;;  %v7790_v35 = vadd.f32 %v486_v30, %v7713_v14  ;;  %v488_v53 = vpop.f32.mrb[15].mxu1 }
 0x16a   :  { %8806 = vst [vmem:[#allocation33_spill] sm:$0xff] %v7782_v8  ;;  %8807 = vst [vmem:[#allocation34_spill] sm:$0xff] %v7785_v25  ;;  %v7792_v6 = vadd.f32 %v415_v13, %v148_v21  ;;  %v7795_v11 = vadd.f32 %v488_v53, %v7721_v17  ;;  %v453_v8 = vadd.f32 %v7717_v16, %v7713_v14 }
 0x16b   :  { %8808 = vst [vmem:[#allocation35_spill] sm:$0xff] %v7787_v9  ;;  %8809 = vst [vmem:[#allocation36_spill] sm:$0xff] %v7790_v35  ;;  %v455_v25 = vadd.f32 %v454_v20, %v7721_v17 }
 0x16c   :  { %8810 = vst [vmem:[#allocation37_spill] sm:$0xff] %v7792_v6  ;;  %8811 = vst [vmem:[#allocation38_spill] sm:$0xff] %v7795_v11 }
 0x16e   :  { %v757_v22 = vpop.f32.mrb[16].mxu0  ;;  %v798_v9 = vpop.f32.mrb[16].mxu1 }
 0x16f   :  { %v805_v7 = vadd.f32 %v757_v22, %v380_v10  ;;  %v807_v31 = vadd.f32 %v798_v9, %v453_v8  ;;  %v759_v30 = vpop.f32.mrb[17].mxu0  ;;  %v800_v35 = vpop.f32.mrb[17].mxu1 }
 0x170   :  { %v806_v27 = vadd.f32 %v759_v30, %v382_v0  ;;  %v808_v13 = vadd.f32 %v800_v35, %v455_v25  ;;  %v761_v6 = vpop.f32.mrb[18].mxu0  ;;  %v802_v23 = vpop.f32.mrb[18].mxu1 }
 0x171   :  { %v6118_v53 = vmul.f32 -1.442695, %v805_v7  ;;  %v762_v11 = vpop.f32.mrb[19].mxu0  ;;  %v803_v12 = vpop.f32.mrb[19].mxu1 }
 0x172   :  { %v6119_v15 = vmul.f32 -1.442695, %v806_v27  ;;  %v6120_v14 = vmul.f32 -1.442695, %v808_v13  ;;  %v8812_v11 = vmov 0  }
 0x173   :  { %7027 = vpow2.f32 %v6118_v53 }
 0x174   :  { %7029 = vpow2.f32 %v6119_v15 }
 0x175   :  { %7031 = vpow2.f32 %v6120_v14 }
 0x176   :  { %7033 = vtanh.f32 %v807_v31 }
 0x17d   :  { %v7028_v16 = vpop.eup %7027 }
 0x17e   :  { %v7030_v18 = vpop.eup %7029  ;;  %v812_v17 = vadd.f32 1.0, %v7028_v16 }
 0x17f   :  { %v818_v19 = vadd.f32 1.0, %v7030_v18  ;;  %v7032_v8 = vpop.eup %7031 }
 0x180   :  { %7035 = vrcp.f32 %v812_v17  ;;  %v7034_v9 = vpop.eup %7033  ;;  %v825_v23 = vadd.f32 1.0, %v7032_v8 }
 0x181   :  { %7037 = vrcp.f32 %v818_v19 }
 0x182   :  { %7039 = vrcp.f32 %v825_v23 }
 0x18a   :  { %v7036_v20 = vpop.eup %7035 }
 0x18b   :  { %v7038_v6 = vpop.eup %7037  ;;  %v830_v21 = vmul.f32 %v7036_v20, %v7034_v9 }
 0x18c   :  { %v829_v35 = vmul.f32 0.0, %v7038_v6  ;;  %v7040_v27 = vpop.eup %7039 }
 0x18e   :  { %v7801_v12 = vadd.f32 %v830_v21, %v829_v35 }
 0x190   :  { %7041 = vtanh.f32 %v7801_v12 }
 0x19a   :  { %v7042_v7 = vpop.eup %7041 }
 0x19b   :  { %v7804_v25 = vmul.f32 %v7042_v7, %v7040_v27 }
 0x19d   :  { %v843_v31 = vpack.c.bf16 %v7804_v25, %v7804_v25 }
 0x19f   :  { %1069 = vmatmul.mubr.bf16.vlgmr.msra.gmra.mrb[20].mxu0 %v843_v31  ;;  %1110 = vmatmul.mubr.bf16.vlgmr.msra.gmra.mrb[20].mxu1 %v843_v31 }
 0x1a0   :  { %1351 = vmatpush1.bf16.msra.mxu0 %v7555_v36  ;;  %1392 = vmatpush1.bf16.msra.mxu1 %v7557_v37 }
 0x1a1   :  { %1352 = vmatprep.subr.bf16.mxu0 %v7561_v38  ;;  %1393 = vmatprep.subr.bf16.mxu1 %v7563_v39 }
 0x1a2   :  { %1382 = vmatprep.mubr.bf16.mxu0 %v8812_v11  ;;  %1423 = vmatprep.mubr.bf16.mxu1 %v8812_v11 }
 0x1a4   :  { %1353 = vmatpush1.bf16.msra.mxu0 %v7565_v40  ;;  %1394 = vmatpush1.bf16.msra.mxu1 %v7569_v41 }
 0x1a5   :  { %1354 = vmatprep.subr.bf16.mxu0 %v7573_v42  ;;  %1395 = vmatprep.subr.bf16.mxu1 %v7575_v43 }
 0x1a8   :  { %1355 = vmatpush1.bf16.msra.mxu0 %v7582_v45  ;;  %1396 = vmatpush1.bf16.msra.mxu1 %v7584_v46 }
 0x1a9   :  { %1356 = vmatprep.subr.bf16.mxu0 %v7588_v47  ;;  %1397 = vmatprep.subr.bf16.mxu1 %v7592_v48 }
 0x1ac   :  { %1357 = vmatpush1.bf16.msra.mxu0 %v7594_v49  ;;  %1398 = vmatpush1.bf16.msra.mxu1 %v7596_v50 }
 0x1ad   :  { %1358 = vmatprep.subr.bf16.mxu0 %v7600_v51  ;;  %1399 = vmatprep.subr.bf16.mxu1 %v7604_v52 }
 0x1b0   :  { %1359 = vmatpush1.bf16.msra.mxu0 %v7611_v54  ;;  %1400 = vmatpush1.bf16.msra.mxu1 %v7613_v55 }
 0x1b1   :  { %1360 = vmatprep.subr.bf16.mxu0 %v7615_v56  ;;  %1401 = vmatprep.subr.bf16.mxu1 %v7617_v57 }
 0x1b4   :  { %1361 = vmatpush1.bf16.msra.mxu0 %v7623_v58  ;;  %1402 = vmatpush1.bf16.msra.mxu1 %v7625_v59 }
 0x1b5   :  { %1362 = vmatprep.subr.bf16.mxu0 %v7627_v60  ;;  %1403 = vmatprep.subr.bf16.mxu1 %v7629_v61 }
 0x1b8   :  { %1363 = vmatpush1.bf16.msra.mxu0 %v7640_v63  ;;  %1404 = vmatpush1.bf16.msra.mxu1 %v7642_v1 }
 0x1b9   :  { %1364 = vmatprep.subr.bf16.mxu0 %v7644_v2  ;;  %1405 = vmatprep.subr.bf16.mxu1 %v7646_v3 }
 0x1bc   :  { %1365 = vmatpush1.bf16.msra.mxu0 %v7652_v4  ;;  %1406 = vmatpush1.bf16.msra.mxu1 %v7654_v5 }
 0x1bd   :  { %1664 = vmatprep.subr.bf16.mxu0 %v7548_v33  ;;  %1705 = vmatprep.subr.bf16.mxu1 %v7550_v34 }
 0x272   :  { %v1070_v10 = vpop.f32.mrb[20].mxu0  ;;  %v1111_v0 = vpop.f32.mrb[20].mxu1 }
 0x273   :  { %v1118_v22 = vadd.f32 %v1070_v10, %v7727_v24  ;;  %v1120_v30 = vadd.f32 %v1111_v0, %v7730_v26  ;;  %v1072_v13 = vpop.f32.mrb[21].mxu0  ;;  %v1113_v53 = vpop.f32.mrb[21].mxu1 }
 0x274   :  { %v1119_v15 = vadd.f32 %v1072_v13, %v7732_v28  ;;  %v1121_v14 = vadd.f32 %v1113_v53, %v7735_v29  ;;  %v1074_v16 = vpop.f32.mrb[22].mxu0  ;;  %v1115_v18 = vpop.f32.mrb[22].mxu1  ;;  %v7906_v13 = vld [vmem:[#allocation8 + $0x8] ss:$16 sps:$4 sm:$0xff]   ;;  %v7912_v53 = vld [vmem:[#allocation8 + $0x24] ss:$16 sps:$4 sm:$0xff]  }
 0x275   :  { %v6153_v17 = vmul.f32 -1.442695, %v1118_v22  ;;  %v1075_v19 = vpop.f32.mrb[23].mxu0  ;;  %v1116_v8 = vpop.f32.mrb[23].mxu1  ;;  %v7918_v16 = vld [vmem:[#allocation8 + $0x28] ss:$16 sps:$4 sm:$0xff]  }
 0x276   :  { %v6154_v33 = vmul.f32 -1.442695, %v1119_v15  ;;  %v6155_v34 = vmul.f32 -1.442695, %v1121_v14  ;;  %v7914_v15 = vld [vmem:[#allocation8 + $0x2c] ss:$16 sps:$4 sm:$0xff]  }
 0x277   :  { %7043 = vpow2.f32 %v6153_v17  ;;  %v7916_v14 = vld [vmem:[#allocation8 + $0x20] ss:$16 sps:$4 sm:$0xff]   ;;  %v7924_v18 = vld [vmem:[#allocation8 + $0x44] ss:$16 sps:$4 sm:$0xff]   ;;  %v7926_v17 = vld [vmem:[#allocation8 + $0x4c] ss:$16 sps:$4 sm:$0xff]  }
 0x278   :  { %7045 = vpow2.f32 %v6154_v33  ;;  %v7928_v19 = vld [vmem:[#allocation8 + $0x40] ss:$16 sps:$4 sm:$0xff]   ;;  %v7930_v8 = vld [vmem:[#allocation8 + $0x48] ss:$16 sps:$4 sm:$0xff]   ;;  %v7936_v33 = vld [vmem:[#allocation8 + $0x64] ss:$16 sps:$4 sm:$0xff]  }
 0x279   :  { %7047 = vpow2.f32 %v6155_v34  ;;  %v7938_v34 = vld [vmem:[#allocation8 + $0x6c] ss:$16 sps:$4 sm:$0xff]  }
 0x27a   :  { %7049 = vtanh.f32 %v1120_v30  ;;  %v7904_v30 = vld [vmem:[#allocation8] ss:$16 sps:$4 sm:$0xff]  }
 0x281   :  { %v7044_v9 = vpop.eup %7043 }
 0x282   :  { %v7046_v20 = vpop.eup %7045  ;;  %v1125_v24 = vadd.f32 1.0, %v7044_v9  ;;  %v7940_v9 = vld [vmem:[#allocation8 + $0x60] ss:$16 sps:$4 sm:$0xff]  }
 0x283   :  { %v1131_v26 = vadd.f32 1.0, %v7046_v20  ;;  %v7048_v28 = vpop.eup %7047  ;;  %v7942_v20 = vld [vmem:[#allocation8 + $0x68] ss:$16 sps:$4 sm:$0xff]  }
 0x284   :  { %7051 = vrcp.f32 %v1125_v24  ;;  %v7050_v6 = vpop.eup %7049  ;;  %v1138_v35 = vadd.f32 1.0, %v7048_v28  ;;  %v7948_v24 = vld [vmem:[#allocation8 + $0x84] ss:$16 sps:$4 sm:$0xff]   ;;  %v7952_v28 = vld [vmem:[#allocation8 + $0x80] ss:$16 sps:$4 sm:$0xff]  }
 0x285   :  { %7053 = vrcp.f32 %v1131_v26  ;;  %v7950_v26 = vld [vmem:[#allocation8 + $0x8c] ss:$16 sps:$4 sm:$0xff]  }
 0x286   :  { %7055 = vrcp.f32 %v1138_v35  ;;  %v7966_v35 = vld [vmem:[#allocation8 + $0xac] ss:$16 sps:$4 sm:$0xff]  }
 0x28e   :  { %v7052_v29 = vpop.eup %7051 }
 0x28f   :  { %v7054_v21 = vpop.eup %7053  ;;  %v1143_v23 = vmul.f32 %v7052_v29, %v7050_v6  ;;  %v7954_v6 = vld [vmem:[#allocation8 + $0x88] ss:$16 sps:$4 sm:$0xff]   ;;  %v7958_v29 = vld [vmem:[#allocation8 + $0xa4] ss:$16 sps:$4 sm:$0xff]  }
 0x290   :  { %v1142_v27 = vmul.f32 %v7054_v21, %v7801_v12  ;;  %v7056_v31 = vpop.eup %7055  ;;  %v7902_v12 = vld [vmem:[#allocation8 + $0xc] ss:$16 sps:$4 sm:$0xff]   ;;  %v7962_v21 = vld [vmem:[#allocation8 + $0xa0] ss:$16 sps:$4 sm:$0xff]  }
 0x292   :  { %v7847_v7 = vadd.f32 %v1143_v23, %v1142_v27  ;;  %v7964_v23 = vld [vmem:[#allocation8 + $0xa8] ss:$16 sps:$4 sm:$0xff]   ;;  %v7969_v27 = vld [vmem:[#allocation8 + $0xc4] ss:$16 sps:$4 sm:$0xff]  }
 0x294   :  { %7057 = vtanh.f32 %v7847_v7 }
 0x29e   :  { %v7058_v10 = vpop.eup %7057 }
 0x29f   :  { %v7850_v0 = vmul.f32 %v7058_v10, %v7056_v31  ;;  %v7976_v31 = vld [vmem:[#allocation8 + $0xc0] ss:$16 sps:$4 sm:$0xff]   ;;  %v7978_v10 = vld [vmem:[#allocation8 + $0xc8] ss:$16 sps:$4 sm:$0xff]  }
 0x2a1   :  { %v1157_v22 = vpack.c.bf16 %v7850_v0, %v7850_v0 }
 0x2a3   :  { %1383 = vmatmul.mubr.bf16.vlgmr.msra.gmra.mrb[24].mxu0 %v1157_v22  ;;  %1424 = vmatmul.mubr.bf16.vlgmr.msra.gmra.mrb[24].mxu1 %v1157_v22  ;;  %v7982_v22 = vld [vmem:[#allocation8 + $0xe4] ss:$16 sps:$4 sm:$0xff]  }
 0x2a4   :  { %1665 = vmatpush1.bf16.msra.mxu0 %v7555_v36  ;;  %1706 = vmatpush1.bf16.msra.mxu1 %v7557_v37 }
 0x2a5   :  { %1666 = vmatprep.subr.bf16.mxu0 %v7561_v38  ;;  %1707 = vmatprep.subr.bf16.mxu1 %v7563_v39 }
 0x2a6   :  { %1696 = vmatprep.mubr.bf16.mxu0 %v8812_v11  ;;  %1737 = vmatprep.mubr.bf16.mxu1 %v8812_v11 }
 0x2a8   :  { %1667 = vmatpush1.bf16.msra.mxu0 %v7565_v40  ;;  %1708 = vmatpush1.bf16.msra.mxu1 %v7569_v41 }
 0x2a9   :  { %1668 = vmatprep.subr.bf16.mxu0 %v7573_v42  ;;  %1709 = vmatprep.subr.bf16.mxu1 %v7575_v43  ;;  %v8813_v43 = vld [vmem:[#allocation18_spill] sm:$0xff] }
 0x2ac   :  { %1669 = vmatpush1.bf16.msra.mxu0 %v7582_v45  ;;  %1710 = vmatpush1.bf16.msra.mxu1 %v7584_v46 }
 0x2ad   :  { %1670 = vmatprep.subr.bf16.mxu0 %v7588_v47  ;;  %1711 = vmatprep.subr.bf16.mxu1 %v7592_v48 }
 0x2b0   :  { %1671 = vmatpush1.bf16.msra.mxu0 %v7594_v49  ;;  %1712 = vmatpush1.bf16.msra.mxu1 %v7596_v50 }
 0x2b1   :  { %1672 = vmatprep.subr.bf16.mxu0 %v7600_v51  ;;  %1713 = vmatprep.subr.bf16.mxu1 %v7604_v52 }
 0x2b4   :  { %1673 = vmatpush1.bf16.msra.mxu0 %v7611_v54  ;;  %1714 = vmatpush1.bf16.msra.mxu1 %v7613_v55 }
 0x2b5   :  { %1674 = vmatprep.subr.bf16.mxu0 %v7615_v56  ;;  %1715 = vmatprep.subr.bf16.mxu1 %v7617_v57 }
 0x2b8   :  { %1675 = vmatpush1.bf16.msra.mxu0 %v7623_v58  ;;  %1716 = vmatpush1.bf16.msra.mxu1 %v7625_v59 }
 0x2b9   :  { %1676 = vmatprep.subr.bf16.mxu0 %v7627_v60  ;;  %1717 = vmatprep.subr.bf16.mxu1 %v7629_v61 }
 0x2bc   :  { %1677 = vmatpush1.bf16.msra.mxu0 %v7640_v63  ;;  %1718 = vmatpush1.bf16.msra.mxu1 %v7642_v1 }
 0x2bd   :  { %1678 = vmatprep.subr.bf16.mxu0 %v7644_v2  ;;  %1719 = vmatprep.subr.bf16.mxu1 %v7646_v3 }
 0x2c0   :  { %1679 = vmatpush1.bf16.msra.mxu0 %v7652_v4  ;;  %1720 = vmatpush1.bf16.msra.mxu1 %v7654_v5 }
 0x2c1   :  { %2019 = vmatprep.subr.bf16.mxu1 %v7902_v12 }
 0x376   :  { %v1384_v36 = vpop.f32.mrb[24].mxu0  ;;  %v1425_v37 = vpop.f32.mrb[24].mxu1 }
 0x377   :  { %v1432_v38 = vadd.f32 %v1384_v36, %v7737_v32  ;;  %v1434_v39 = vadd.f32 %v1425_v37, %v7740_v44  ;;  %v1386_v40 = vpop.f32.mrb[25].mxu0  ;;  %v1427_v41 = vpop.f32.mrb[25].mxu1  ;;  %v7984_v36 = vld [vmem:[#allocation8 + $0xec] ss:$16 sps:$4 sm:$0xff]   ;;  %v7988_v37 = vld [vmem:[#allocation8 + $0xe0] ss:$16 sps:$4 sm:$0xff]  }
 0x378   :  { %v1433_v42 = vadd.f32 %v1386_v40, %v7742_v62  ;;  %v1435_v45 = vadd.f32 %v1427_v41, %v8813_v43  ;;  %v1388_v46 = vpop.f32.mrb[26].mxu0  ;;  %v1429_v47 = vpop.f32.mrb[26].mxu1  ;;  %v7900_v62 = vld [vmem:[#allocation8 + $0x4] ss:$16 sps:$4 sm:$0xff]   ;;  %v8815_v43 = vld [vmem:[#allocation20_spill] sm:$0xff] }
 0x379   :  { %v6188_v48 = vmul.f32 -1.442695, %v1432_v38  ;;  %v1389_v49 = vpop.f32.mrb[27].mxu0  ;;  %v1430_v50 = vpop.f32.mrb[27].mxu1  ;;  %1978 = vmatprep.subr.bf16.mxu0 %v7900_v62  ;;  %v7990_v38 = vld [vmem:[#allocation8 + $0xe8] ss:$16 sps:$4 sm:$0xff]  }
 0x37a   :  { %v6189_v51 = vmul.f32 -1.442695, %v1433_v42  ;;  %v6190_v52 = vmul.f32 -1.442695, %v1435_v45  ;;  %v8814_v41 = vld [vmem:[#allocation19_spill] sm:$0xff]  ;;  %v8817_v50 = vld [vmem:[#allocation22_spill] sm:$0xff] }
 0x37b   :  { %7059 = vpow2.f32 %v6188_v48  ;;  %v8816_v48 = vld [vmem:[#allocation21_spill] sm:$0xff] }
 0x37c   :  { %7061 = vpow2.f32 %v6189_v51 }
 0x37d   :  { %7063 = vpow2.f32 %v6190_v52 }
 0x37e   :  { %7065 = vtanh.f32 %v1434_v39 }
 0x385   :  { %v7060_v54 = vpop.eup %7059 }
 0x386   :  { %v7062_v55 = vpop.eup %7061  ;;  %v1439_v56 = vadd.f32 1.0, %v7060_v54 }
 0x387   :  { %v1445_v57 = vadd.f32 1.0, %v7062_v55  ;;  %v7064_v58 = vpop.eup %7063 }
 0x388   :  { %7067 = vrcp.f32 %v1439_v56  ;;  %v7066_v59 = vpop.eup %7065  ;;  %v1452_v1 = vadd.f32 1.0, %v7064_v58 }
 0x389   :  { %7069 = vrcp.f32 %v1445_v57 }
 0x38a   :  { %7071 = vrcp.f32 %v1452_v1 }
 0x392   :  { %v7068_v60 = vpop.eup %7067 }
 0x393   :  { %v7070_v61 = vpop.eup %7069  ;;  %v1457_v63 = vmul.f32 %v7068_v60, %v7066_v59 }
 0x394   :  { %v1456_v2 = vmul.f32 %v7070_v61, %v7847_v7  ;;  %v7072_v4 = vpop.eup %7071  ;;  %v7971_v7 = vld [vmem:[#allocation8 + $0xcc] ss:$16 sps:$4 sm:$0xff]  }
 0x396   :  { %v7891_v3 = vadd.f32 %v1457_v63, %v1456_v2 }
 0x398   :  { %7073 = vtanh.f32 %v7891_v3 }
 0x3a2   :  { %v7074_v5 = vpop.eup %7073 }
 0x3a3   :  { %v7894_v32 = vmul.f32 %v7074_v5, %v7072_v4 }
 0x3a5   :  { %v1471_v44 = vpack.c.bf16 %v7894_v32, %v7894_v32 }
 0x3a7   :  { %1697 = vmatmul.mubr.bf16.vlgmr.msra.gmra.mrb[28].mxu0 %v1471_v44  ;;  %1738 = vmatmul.mubr.bf16.vlgmr.msra.gmra.mrb[28].mxu1 %v1471_v44 }
 0x3a8   :  { %2010 = vmatprep.mubr.bf16.mxu0 %v8812_v11  ;;  %2051 = vmatprep.mubr.bf16.mxu1 %v8812_v11 }
 0x3a9   :  { %1979 = vmatpush1.bf16.msra.mxu0 %v7904_v30  ;;  %2020 = vmatpush1.bf16.msra.mxu1 %v7906_v13 }
 0x3aa   :  { %1980 = vmatprep.subr.bf16.mxu0 %v7912_v53  ;;  %2021 = vmatprep.subr.bf16.mxu1 %v7914_v15 }
 0x3ad   :  { %1981 = vmatpush1.bf16.msra.mxu0 %v7916_v14  ;;  %2022 = vmatpush1.bf16.msra.mxu1 %v7918_v16 }
 0x3ae   :  { %1982 = vmatprep.subr.bf16.mxu0 %v7924_v18  ;;  %2023 = vmatprep.subr.bf16.mxu1 %v7926_v17 }
 0x3b1   :  { %1983 = vmatpush1.bf16.msra.mxu0 %v7928_v19  ;;  %2024 = vmatpush1.bf16.msra.mxu1 %v7930_v8 }
 0x3b2   :  { %1984 = vmatprep.subr.bf16.mxu0 %v7936_v33  ;;  %2025 = vmatprep.subr.bf16.mxu1 %v7938_v34 }
 0x3b5   :  { %1985 = vmatpush1.bf16.msra.mxu0 %v7940_v9  ;;  %2026 = vmatpush1.bf16.msra.mxu1 %v7942_v20 }
 0x3b6   :  { %1986 = vmatprep.subr.bf16.mxu0 %v7948_v24  ;;  %2027 = vmatprep.subr.bf16.mxu1 %v7950_v26 }
 0x3b9   :  { %1987 = vmatpush1.bf16.msra.mxu0 %v7952_v28  ;;  %2028 = vmatpush1.bf16.msra.mxu1 %v7954_v6 }
 0x3ba   :  { %1988 = vmatprep.subr.bf16.mxu0 %v7958_v29  ;;  %2029 = vmatprep.subr.bf16.mxu1 %v7966_v35 }
 0x3bd   :  { %1989 = vmatpush1.bf16.msra.mxu0 %v7962_v21  ;;  %2030 = vmatpush1.bf16.msra.mxu1 %v7964_v23 }
 0x3be   :  { %1990 = vmatprep.subr.bf16.mxu0 %v7969_v27  ;;  %2031 = vmatprep.subr.bf16.mxu1 %v7971_v7 }
 0x3c1   :  { %1991 = vmatpush1.bf16.msra.mxu0 %v7976_v31  ;;  %2032 = vmatpush1.bf16.msra.mxu1 %v7978_v10 }
 0x3c2   :  { %1992 = vmatprep.subr.bf16.mxu0 %v7982_v22  ;;  %2033 = vmatprep.subr.bf16.mxu1 %v7984_v36 }
 0x3c5   :  { %1993 = vmatpush1.bf16.msra.mxu0 %v7988_v37  ;;  %2034 = vmatpush1.bf16.msra.mxu1 %v7990_v38 }
 0x3c6   :  { %2292 = vmatprep.subr.bf16.mxu0 %v7900_v62  ;;  %2333 = vmatprep.subr.bf16.mxu1 %v7902_v12 }
 0x47a   :  { %v1698_v39 = vpop.f32.mrb[28].mxu0  ;;  %v1739_v40 = vpop.f32.mrb[28].mxu1 }
 0x47b   :  { %v1746_v42 = vadd.f32 %v1698_v39, %v8814_v41  ;;  %v1748_v45 = vadd.f32 %v1739_v40, %v8815_v43  ;;  %v1700_v46 = vpop.f32.mrb[29].mxu0  ;;  %v1741_v47 = vpop.f32.mrb[29].mxu1 }
 0x47c   :  { %v1747_v49 = vadd.f32 %v1700_v46, %v8816_v48  ;;  %v1749_v51 = vadd.f32 %v1741_v47, %v8817_v50  ;;  %v1702_v52 = vpop.f32.mrb[30].mxu0  ;;  %v1743_v54 = vpop.f32.mrb[30].mxu1 }
 0x47d   :  { %v6223_v55 = vmul.f32 -1.442695, %v1746_v42  ;;  %v1703_v56 = vpop.f32.mrb[31].mxu0  ;;  %v1744_v57 = vpop.f32.mrb[31].mxu1 }
 0x47e   :  { %v6224_v58 = vmul.f32 -1.442695, %v1747_v49  ;;  %v6225_v59 = vmul.f32 -1.442695, %v1749_v51  ;;  %v8818_v49 = vld [vmem:[#allocation23_spill] sm:$0xff]  ;;  %v8819_v51 = vld [vmem:[#allocation24_spill] sm:$0xff] }
 0x47f   :  { %7075 = vpow2.f32 %v6223_v55  ;;  %v8820_v56 = vld [vmem:[#allocation25_spill] sm:$0xff] }
 0x480   :  { %7077 = vpow2.f32 %v6224_v58  ;;  %v8821_v58 = vld [vmem:[#allocation26_spill] sm:$0xff] }
 0x481   :  { %7079 = vpow2.f32 %v6225_v59 }
 0x482   :  { %7081 = vtanh.f32 %v1748_v45 }
 0x489   :  { %v7076_v60 = vpop.eup %7075 }
 0x48a   :  { %v7078_v61 = vpop.eup %7077  ;;  %v1753_v63 = vadd.f32 1.0, %v7076_v60 }
 0x48b   :  { %v1759_v1 = vadd.f32 1.0, %v7078_v61  ;;  %v7080_v2 = vpop.eup %7079 }
 0x48c   :  { %7083 = vrcp.f32 %v1753_v63  ;;  %v7082_v4 = vpop.eup %7081  ;;  %v1766_v40 = vadd.f32 1.0, %v7080_v2 }
 0x48d   :  { %7085 = vrcp.f32 %v1759_v1 }
 0x48e   :  { %7087 = vrcp.f32 %v1766_v40 }
 0x496   :  { %v7084_v5 = vpop.eup %7083 }
 0x497   :  { %v7086_v44 = vpop.eup %7085  ;;  %v1771_v39 = vmul.f32 %v7084_v5, %v7082_v4 }
 0x498   :  { %v1770_v41 = vmul.f32 %v7086_v44, %v7891_v3  ;;  %v7088_v43 = vpop.eup %7087 }
 0x49a   :  { %v8003_v42 = vadd.f32 %v1771_v39, %v1770_v41 }
 0x49c   :  { %7089 = vtanh.f32 %v8003_v42 }
 0x4a6   :  { %v7090_v46 = vpop.eup %7089 }
 0x4a7   :  { %v8006_v47 = vmul.f32 %v7090_v46, %v7088_v43 }
 0x4a9   :  { %v1785_v45 = vpack.c.bf16 %v8006_v47, %v8006_v47 }
 0x4ab   :  { %2011 = vmatmul.mubr.bf16.vlgmr.msra.gmra.mrb[32].mxu0 %v1785_v45  ;;  %2052 = vmatmul.mubr.bf16.vlgmr.msra.gmra.mrb[32].mxu1 %v1785_v45 }
 0x4ac   :  { %2293 = vmatpush1.bf16.msra.mxu0 %v7904_v30  ;;  %2334 = vmatpush1.bf16.msra.mxu1 %v7906_v13 }
 0x4ad   :  { %2294 = vmatprep.subr.bf16.mxu0 %v7912_v53  ;;  %2335 = vmatprep.subr.bf16.mxu1 %v7914_v15 }
 0x4ae   :  { %2324 = vmatprep.mubr.bf16.mxu0 %v8812_v11  ;;  %2365 = vmatprep.mubr.bf16.mxu1 %v8812_v11 }
 0x4b0   :  { %2295 = vmatpush1.bf16.msra.mxu0 %v7916_v14  ;;  %2336 = vmatpush1.bf16.msra.mxu1 %v7918_v16 }
 0x4b1   :  { %2296 = vmatprep.subr.bf16.mxu0 %v7924_v18  ;;  %2337 = vmatprep.subr.bf16.mxu1 %v7926_v17 }
 0x4b4   :  { %2297 = vmatpush1.bf16.msra.mxu0 %v7928_v19  ;;  %2338 = vmatpush1.bf16.msra.mxu1 %v7930_v8 }
 0x4b5   :  { %2298 = vmatprep.subr.bf16.mxu0 %v7936_v33  ;;  %2339 = vmatprep.subr.bf16.mxu1 %v7938_v34 }
 0x4b8   :  { %2299 = vmatpush1.bf16.msra.mxu0 %v7940_v9  ;;  %2340 = vmatpush1.bf16.msra.mxu1 %v7942_v20 }
 0x4b9   :  { %2300 = vmatprep.subr.bf16.mxu0 %v7948_v24  ;;  %2341 = vmatprep.subr.bf16.mxu1 %v7950_v26 }
 0x4bc   :  { %2301 = vmatpush1.bf16.msra.mxu0 %v7952_v28  ;;  %2342 = vmatpush1.bf16.msra.mxu1 %v7954_v6 }
 0x4bd   :  { %2302 = vmatprep.subr.bf16.mxu0 %v7958_v29  ;;  %2343 = vmatprep.subr.bf16.mxu1 %v7966_v35 }
 0x4c0   :  { %2303 = vmatpush1.bf16.msra.mxu0 %v7962_v21  ;;  %2344 = vmatpush1.bf16.msra.mxu1 %v7964_v23 }
 0x4c1   :  { %2304 = vmatprep.subr.bf16.mxu0 %v7969_v27  ;;  %2345 = vmatprep.subr.bf16.mxu1 %v7971_v7 }
 0x4c4   :  { %2305 = vmatpush1.bf16.msra.mxu0 %v7976_v31  ;;  %2346 = vmatpush1.bf16.msra.mxu1 %v7978_v10 }
 0x4c5   :  { %2306 = vmatprep.subr.bf16.mxu0 %v7982_v22  ;;  %2347 = vmatprep.subr.bf16.mxu1 %v7984_v36 }
 0x4c8   :  { %2307 = vmatpush1.bf16.msra.mxu0 %v7988_v37  ;;  %2348 = vmatpush1.bf16.msra.mxu1 %v7990_v38 }
 0x4c9   :  { %2606 = vmatprep.subr.bf16.mxu0 %v7900_v62  ;;  %2647 = vmatprep.subr.bf16.mxu1 %v7902_v12 }
 0x57e   :  { %v2012_v3 = vpop.f32.mrb[32].mxu0  ;;  %v2053_v48 = vpop.f32.mrb[32].mxu1 }
 0x57f   :  { %v2060_v50 = vadd.f32 %v2012_v3, %v8818_v49  ;;  %v2062_v52 = vadd.f32 %v2053_v48, %v8819_v51  ;;  %v2014_v54 = vpop.f32.mrb[33].mxu0  ;;  %v2055_v55 = vpop.f32.mrb[33].mxu1 }
 0x580   :  { %v2061_v57 = vadd.f32 %v2014_v54, %v8820_v56  ;;  %v2063_v59 = vadd.f32 %v2055_v55, %v8821_v58  ;;  %v2016_v60 = vpop.f32.mrb[34].mxu0  ;;  %v2057_v61 = vpop.f32.mrb[34].mxu1  ;;  %v8822_v58 = vld [vmem:[#allocation27_spill] sm:$0xff] }
 0x581   :  { %v6258_v63 = vmul.f32 -1.442695, %v2060_v50  ;;  %v2017_v1 = vpop.f32.mrb[35].mxu0  ;;  %v2058_v2 = vpop.f32.mrb[35].mxu1  ;;  %v8823_v60 = vld [vmem:[#allocation28_spill] sm:$0xff] }
 0x582   :  { %v6259_v4 = vmul.f32 -1.442695, %v2061_v57  ;;  %v6260_v5 = vmul.f32 -1.442695, %v2063_v59  ;;  %v8824_v2 = vld [vmem:[#allocation29_spill] sm:$0xff] }
 0x583   :  { %7091 = vpow2.f32 %v6258_v63 }
 0x584   :  { %7093 = vpow2.f32 %v6259_v4 }
 0x585   :  { %7095 = vpow2.f32 %v6260_v5  ;;  %v8825_v5 = vld [vmem:[#allocation30_spill] sm:$0xff] }
 0x586   :  { %7097 = vtanh.f32 %v2062_v52 }
 0x58d   :  { %v7092_v44 = vpop.eup %7091 }
 0x58e   :  { %v7094_v39 = vpop.eup %7093  ;;  %v2067_v40 = vadd.f32 1.0, %v7092_v44 }
 0x58f   :  { %v2073_v41 = vadd.f32 1.0, %v7094_v39  ;;  %v7096_v43 = vpop.eup %7095 }
 0x590   :  { %7099 = vrcp.f32 %v2067_v40  ;;  %v7098_v46 = vpop.eup %7097  ;;  %v2080_v49 = vadd.f32 1.0, %v7096_v43 }
 0x591   :  { %7101 = vrcp.f32 %v2073_v41 }
 0x592   :  { %7103 = vrcp.f32 %v2080_v49 }
 0x59a   :  { %v7100_v45 = vpop.eup %7099 }
 0x59b   :  { %v7102_v3 = vpop.eup %7101  ;;  %v2085_v48 = vmul.f32 %v7100_v45, %v7098_v46 }
 0x59c   :  { %v2084_v50 = vmul.f32 %v7102_v3, %v8003_v42  ;;  %v7104_v54 = vpop.eup %7103 }
 0x59e   :  { %v8049_v51 = vadd.f32 %v2085_v48, %v2084_v50 }
 0x5a0   :  { %7105 = vtanh.f32 %v8049_v51 }
 0x5aa   :  { %v7106_v55 = vpop.eup %7105 }
 0x5ab   :  { %v8052_v56 = vmul.f32 %v7106_v55, %v7104_v54 }
 0x5ad   :  { %v2099_v52 = vpack.c.bf16 %v8052_v56, %v8052_v56 }
 0x5af   :  { %2325 = vmatmul.mubr.bf16.vlgmr.msra.gmra.mrb[36].mxu0 %v2099_v52  ;;  %2366 = vmatmul.mubr.bf16.vlgmr.msra.gmra.mrb[36].mxu1 %v2099_v52 }
 0x5b0   :  { %2607 = vmatpush1.bf16.msra.mxu0 %v7904_v30  ;;  %2648 = vmatpush1.bf16.msra.mxu1 %v7906_v13 }
 0x5b1   :  { %2608 = vmatprep.subr.bf16.mxu0 %v7912_v53  ;;  %2649 = vmatprep.subr.bf16.mxu1 %v7914_v15 }
 0x5b2   :  { %2638 = vmatprep.mubr.bf16.mxu0 %v8812_v11  ;;  %2679 = vmatprep.mubr.bf16.mxu1 %v8812_v11 }
 0x5b4   :  { %2609 = vmatpush1.bf16.msra.mxu0 %v7916_v14  ;;  %2650 = vmatpush1.bf16.msra.mxu1 %v7918_v16 }
 0x5b5   :  { %2610 = vmatprep.subr.bf16.mxu0 %v7924_v18  ;;  %2651 = vmatprep.subr.bf16.mxu1 %v7926_v17 }
 0x5b8   :  { %2611 = vmatpush1.bf16.msra.mxu0 %v7928_v19  ;;  %2652 = vmatpush1.bf16.msra.mxu1 %v7930_v8 }
 0x5b9   :  { %2612 = vmatprep.subr.bf16.mxu0 %v7936_v33  ;;  %2653 = vmatprep.subr.bf16.mxu1 %v7938_v34 }
 0x5bc   :  { %2613 = vmatpush1.bf16.msra.mxu0 %v7940_v9  ;;  %2654 = vmatpush1.bf16.msra.mxu1 %v7942_v20 }
 0x5bd   :  { %2614 = vmatprep.subr.bf16.mxu0 %v7948_v24  ;;  %2655 = vmatprep.subr.bf16.mxu1 %v7950_v26 }
 0x5c0   :  { %2615 = vmatpush1.bf16.msra.mxu0 %v7952_v28  ;;  %2656 = vmatpush1.bf16.msra.mxu1 %v7954_v6 }
 0x5c1   :  { %2616 = vmatprep.subr.bf16.mxu0 %v7958_v29  ;;  %2657 = vmatprep.subr.bf16.mxu1 %v7966_v35 }
 0x5c4   :  { %2617 = vmatpush1.bf16.msra.mxu0 %v7962_v21  ;;  %2658 = vmatpush1.bf16.msra.mxu1 %v7964_v23 }
 0x5c5   :  { %2618 = vmatprep.subr.bf16.mxu0 %v7969_v27  ;;  %2659 = vmatprep.subr.bf16.mxu1 %v7971_v7 }
 0x5c8   :  { %2619 = vmatpush1.bf16.msra.mxu0 %v7976_v31  ;;  %2660 = vmatpush1.bf16.msra.mxu1 %v7978_v10 }
 0x5c9   :  { %2620 = vmatprep.subr.bf16.mxu0 %v7982_v22  ;;  %2661 = vmatprep.subr.bf16.mxu1 %v7984_v36 }
 0x5cc   :  { %2621 = vmatpush1.bf16.msra.mxu0 %v7988_v37  ;;  %2662 = vmatpush1.bf16.msra.mxu1 %v7990_v38 }
 0x5cd   :  { %2920 = vmatprep.subr.bf16.mxu0 %v7900_v62  ;;  %2961 = vmatprep.subr.bf16.mxu1 %v7902_v12 }
 0x682   :  { %v2326_v42 = vpop.f32.mrb[36].mxu0  ;;  %v2367_v57 = vpop.f32.mrb[36].mxu1 }
 0x683   :  { %v2374_v59 = vadd.f32 %v2326_v42, %v8822_v58  ;;  %v2376_v61 = vadd.f32 %v2367_v57, %v8823_v60  ;;  %v2328_v63 = vpop.f32.mrb[37].mxu0  ;;  %v2369_v1 = vpop.f32.mrb[37].mxu1 }
 0x684   :  { %v2375_v4 = vadd.f32 %v2328_v63, %v8824_v2  ;;  %v2377_v44 = vadd.f32 %v2369_v1, %v8825_v5  ;;  %v2330_v39 = vpop.f32.mrb[38].mxu0  ;;  %v2371_v40 = vpop.f32.mrb[38].mxu1 }
 0x685   :  { %v6293_v41 = vmul.f32 -1.442695, %v2374_v59  ;;  %v2331_v43 = vpop.f32.mrb[39].mxu0  ;;  %v2372_v46 = vpop.f32.mrb[39].mxu1  ;;  %v6875_v40 = vld [vmem:[#allocation10] ss:$16 sps:$4 sm:$0xff]  }
 0x686   :  { %v6294_v62 = vmul.f32 -1.442695, %v2375_v4  ;;  %v6295_v12 = vmul.f32 -1.442695, %v2377_v44  ;;  %v6883_v46 = vld [vmem:[#allocation10 + $0x24] ss:$16 sps:$4 sm:$0xff]  }
 0x687   :  { %7107 = vpow2.f32 %v6293_v41  ;;  %v6878_v41 = vld [vmem:[#allocation10 + $0x8] ss:$16 sps:$4 sm:$0xff]  }
 0x688   :  { %7109 = vpow2.f32 %v6294_v62  ;;  %v6886_v62 = vld [vmem:[#allocation10 + $0x2c] ss:$16 sps:$4 sm:$0xff]  }
 0x689   :  { %7111 = vpow2.f32 %v6295_v12  ;;  %v6881_v12 = vld [vmem:[#allocation10 + $0x20] ss:$16 sps:$4 sm:$0xff]  }
 0x68a   :  { %7113 = vtanh.f32 %v2376_v61 }
 0x691   :  { %v7108_v45 = vpop.eup %7107 }
 0x692   :  { %v7110_v3 = vpop.eup %7109  ;;  %v2381_v48 = vadd.f32 1.0, %v7108_v45  ;;  %v6884_v45 = vld [vmem:[#allocation10 + $0x28] ss:$16 sps:$4 sm:$0xff]  }
 0x693   :  { %v2387_v49 = vadd.f32 1.0, %v7110_v3  ;;  %v7112_v50 = vpop.eup %7111  ;;  %v6889_v3 = vld [vmem:[#allocation10 + $0x44] ss:$16 sps:$4 sm:$0xff]  }
 0x694   :  { %7115 = vrcp.f32 %v2381_v48  ;;  %v7114_v54 = vpop.eup %7113  ;;  %v2394_v57 = vadd.f32 1.0, %v7112_v50  ;;  %v6892_v48 = vld [vmem:[#allocation10 + $0x4c] ss:$16 sps:$4 sm:$0xff]   ;;  %v6890_v50 = vld [vmem:[#allocation10 + $0x48] ss:$16 sps:$4 sm:$0xff]  }
 0x695   :  { %7117 = vrcp.f32 %v2387_v49  ;;  %v6887_v49 = vld [vmem:[#allocation10 + $0x40] ss:$16 sps:$4 sm:$0xff]  }
 0x696   :  { %7119 = vrcp.f32 %v2394_v57  ;;  %v6901_v57 = vld [vmem:[#allocation10 + $0x84] ss:$16 sps:$4 sm:$0xff]  }
 0x69e   :  { %v7116_v55 = vpop.eup %7115 }
 0x69f   :  { %v7118_v52 = vpop.eup %7117  ;;  %v2399_v42 = vmul.f32 %v7116_v55, %v7114_v54  ;;  %v6895_v54 = vld [vmem:[#allocation10 + $0x64] ss:$16 sps:$4 sm:$0xff]   ;;  %v6898_v55 = vld [vmem:[#allocation10 + $0x6c] ss:$16 sps:$4 sm:$0xff]  }
 0x6a0   :  { %v2398_v58 = vmul.f32 %v7118_v52, %v8049_v51  ;;  %v7120_v60 = vpop.eup %7119  ;;  %v6893_v52 = vld [vmem:[#allocation10 + $0x60] ss:$16 sps:$4 sm:$0xff]  }
 0x6a2   :  { %v8095_v59 = vadd.f32 %v2399_v42, %v2398_v58  ;;  %v6896_v42 = vld [vmem:[#allocation10 + $0x68] ss:$16 sps:$4 sm:$0xff]   ;;  %v6904_v58 = vld [vmem:[#allocation10 + $0x8c] ss:$16 sps:$4 sm:$0xff]  }
 0x6a4   :  { %7121 = vtanh.f32 %v8095_v59 }
 0x6ae   :  { %v7122_v63 = vpop.eup %7121 }
 0x6af   :  { %v8098_v1 = vmul.f32 %v7122_v63, %v7120_v60  ;;  %v6902_v60 = vld [vmem:[#allocation10 + $0x88] ss:$16 sps:$4 sm:$0xff]   ;;  %v6907_v63 = vld [vmem:[#allocation10 + $0xa4] ss:$16 sps:$4 sm:$0xff]  }
 0x6b1   :  { %v2413_v61 = vpack.c.bf16 %v8098_v1, %v8098_v1 }
 0x6b3   :  { %2639 = vmatmul.mubr.bf16.vlgmr.msra.gmra.mrb[40].mxu0 %v2413_v61  ;;  %2680 = vmatmul.mubr.bf16.vlgmr.msra.gmra.mrb[40].mxu1 %v2413_v61  ;;  %v6910_v61 = vld [vmem:[#allocation10 + $0xac] ss:$16 sps:$4 sm:$0xff]  }
 0x6b4   :  { %2921 = vmatpush1.bf16.msra.mxu0 %v7904_v30  ;;  %2962 = vmatpush1.bf16.msra.mxu1 %v7906_v13  ;;  %v6877_v30 = vld [vmem:[#allocation10 + $0x4] ss:$16 sps:$4 sm:$0xff]   ;;  %v6880_v13 = vld [vmem:[#allocation10 + $0xc] ss:$16 sps:$4 sm:$0xff]  }
 0x6b5   :  { %2922 = vmatprep.subr.bf16.mxu0 %v7912_v53  ;;  %2963 = vmatprep.subr.bf16.mxu1 %v7914_v15 }
 0x6b6   :  { %2952 = vmatprep.mubr.bf16.mxu0 %v8812_v11  ;;  %2993 = vmatprep.mubr.bf16.mxu1 %v8812_v11 }
 0x6b8   :  { %2923 = vmatpush1.bf16.msra.mxu0 %v7916_v14  ;;  %2964 = vmatpush1.bf16.msra.mxu1 %v7918_v16  ;;  %v8826_v14 = vld [vmem:[#allocation31_spill] sm:$0xff] }
 0x6b9   :  { %2924 = vmatprep.subr.bf16.mxu0 %v7924_v18  ;;  %2965 = vmatprep.subr.bf16.mxu1 %v7926_v17  ;;  %v8827_v18 = vld [vmem:[#allocation32_spill] sm:$0xff] }
 0x6bc   :  { %2925 = vmatpush1.bf16.msra.mxu0 %v7928_v19  ;;  %2966 = vmatpush1.bf16.msra.mxu1 %v7930_v8 }
 0x6bd   :  { %2926 = vmatprep.subr.bf16.mxu0 %v7936_v33  ;;  %2967 = vmatprep.subr.bf16.mxu1 %v7938_v34  ;;  %v8828_v33 = vld [vmem:[#allocation33_spill] sm:$0xff] }
 0x6c0   :  { %2927 = vmatpush1.bf16.msra.mxu0 %v7940_v9  ;;  %2968 = vmatpush1.bf16.msra.mxu1 %v7942_v20  ;;  %v8829_v9 = vld [vmem:[#allocation34_spill] sm:$0xff] }
 0x6c1   :  { %2928 = vmatprep.subr.bf16.mxu0 %v7948_v24  ;;  %2969 = vmatprep.subr.bf16.mxu1 %v7950_v26 }
 0x6c4   :  { %2929 = vmatpush1.bf16.msra.mxu0 %v7952_v28  ;;  %2970 = vmatpush1.bf16.msra.mxu1 %v7954_v6 }
 0x6c5   :  { %2930 = vmatprep.subr.bf16.mxu0 %v7958_v29  ;;  %2971 = vmatprep.subr.bf16.mxu1 %v7966_v35 }
 0x6c8   :  { %2931 = vmatpush1.bf16.msra.mxu0 %v7962_v21  ;;  %2972 = vmatpush1.bf16.msra.mxu1 %v7964_v23 }
 0x6c9   :  { %2932 = vmatprep.subr.bf16.mxu0 %v7969_v27  ;;  %2973 = vmatprep.subr.bf16.mxu1 %v7971_v7 }
 0x6cc   :  { %2933 = vmatpush1.bf16.msra.mxu0 %v7976_v31  ;;  %2974 = vmatpush1.bf16.msra.mxu1 %v7978_v10 }
 0x6cd   :  { %2934 = vmatprep.subr.bf16.mxu0 %v7982_v22  ;;  %2975 = vmatprep.subr.bf16.mxu1 %v7984_v36 }
 0x6d0   :  { %2935 = vmatpush1.bf16.msra.mxu0 %v7988_v37  ;;  %2976 = vmatpush1.bf16.msra.mxu1 %v7990_v38 }
 0x6d1   :  { %3261 = vmatprep.subr.bf16.mxu0 %v6877_v30  ;;  %3334 = vmatprep.subr.bf16.mxu1 %v6880_v13  ;;  %v6905_v30 = vld [vmem:[#allocation10 + $0xa0] ss:$16 sps:$4 sm:$0xff]   ;;  %v6908_v13 = vld [vmem:[#allocation10 + $0xa8] ss:$16 sps:$4 sm:$0xff]  }
 0x786   :  { %v2640_v53 = vpop.f32.mrb[40].mxu0  ;;  %v2681_v15 = vpop.f32.mrb[40].mxu1 }
 0x787   :  { %v2688_v16 = vadd.f32 %v2640_v53, %v8826_v14  ;;  %v2690_v17 = vadd.f32 %v2681_v15, %v8827_v18  ;;  %v2642_v19 = vpop.f32.mrb[41].mxu0  ;;  %v2683_v8 = vpop.f32.mrb[41].mxu1  ;;  %v6913_v53 = vld [vmem:[#allocation10 + $0xc4] ss:$16 sps:$4 sm:$0xff]   ;;  %v6916_v15 = vld [vmem:[#allocation10 + $0xcc] ss:$16 sps:$4 sm:$0xff]  }
 0x788   :  { %v2689_v34 = vadd.f32 %v2642_v19, %v8828_v33  ;;  %v2691_v20 = vadd.f32 %v2683_v8, %v8829_v9  ;;  %v2644_v24 = vpop.f32.mrb[42].mxu0  ;;  %v2685_v26 = vpop.f32.mrb[42].mxu1  ;;  %v6911_v14 = vld [vmem:[#allocation10 + $0xc0] ss:$16 sps:$4 sm:$0xff]   ;;  %v6919_v18 = vld [vmem:[#allocation10 + $0xe4] ss:$16 sps:$4 sm:$0xff]   ;;  %v3043_v33 = vpack.c.bf16 %v7850_v0, %v7804_v25  ;;  %v3045_v9 = vpack.c.bf16 %v8098_v1, %v8052_v56 }
 0x789   :  { %v6328_v28 = vmul.f32 -1.442695, %v2688_v16  ;;  %v2645_v6 = vpop.f32.mrb[43].mxu0  ;;  %v2686_v29 = vpop.f32.mrb[43].mxu1  ;;  %v6914_v16 = vld [vmem:[#allocation10 + $0xc8] ss:$16 sps:$4 sm:$0xff]  }
 0x78a   :  { %v6329_v21 = vmul.f32 -1.442695, %v2689_v34  ;;  %v6330_v23 = vmul.f32 -1.442695, %v2691_v20  ;;  %v6917_v19 = vld [vmem:[#allocation10 + $0xe0] ss:$16 sps:$4 sm:$0xff]   ;;  %v3044_v34 = vpack.c.bf16 %v8006_v47, %v7894_v32 }
 0x78b   :  { %7123 = vpow2.f32 %v6328_v28  ;;  %v6920_v8 = vld [vmem:[#allocation10 + $0xe8] ss:$16 sps:$4 sm:$0xff]   ;;  %v8160_v25 = vld [vmem:[#allocation11 + $0x4] ss:$16 sps:$4 sm:$0xff]   ;;  %v8162_v0 = vld [vmem:[#allocation11 + $0xc] ss:$16 sps:$4 sm:$0xff]  }
 0x78c   :  { %7125 = vpow2.f32 %v6329_v21  ;;  %v8164_v32 = vld [vmem:[#allocation11] ss:$16 sps:$4 sm:$0xff]   ;;  %v8166_v47 = vld [vmem:[#allocation11 + $0x8] ss:$16 sps:$4 sm:$0xff]   ;;  %v8172_v56 = vld [vmem:[#allocation11 + $0x24] ss:$16 sps:$4 sm:$0xff]  }
 0x78d   :  { %7127 = vpow2.f32 %v6330_v23  ;;  %v8174_v1 = vld [vmem:[#allocation11 + $0x2c] ss:$16 sps:$4 sm:$0xff]   ;;  %v8176_v20 = vld [vmem:[#allocation11 + $0x20] ss:$16 sps:$4 sm:$0xff]   ;;  %v8178_v24 = vld [vmem:[#allocation11 + $0x28] ss:$16 sps:$4 sm:$0xff]  }
 0x78e   :  { %7129 = vtanh.f32 %v2690_v17  ;;  %v6922_v17 = vld [vmem:[#allocation10 + $0xec] ss:$16 sps:$4 sm:$0xff]   ;;  %v8184_v26 = vld [vmem:[#allocation11 + $0x44] ss:$16 sps:$4 sm:$0xff]   ;;  %v8188_v6 = vld [vmem:[#allocation11 + $0x40] ss:$16 sps:$4 sm:$0xff]  }
 0x78f   :  { %v8186_v28 = vld [vmem:[#allocation11 + $0x4c] ss:$16 sps:$4 sm:$0xff]   ;;  %v8190_v29 = vld [vmem:[#allocation11 + $0x48] ss:$16 sps:$4 sm:$0xff]   ;;  %v8196_v21 = vld [vmem:[#allocation11 + $0x60] ss:$16 sps:$4 sm:$0xff]  }
 0x790   :  { %v8198_v23 = vld [vmem:[#allocation11 + $0x64] ss:$16 sps:$4 sm:$0xff]  }
 0x795   :  { %v7124_v35 = vpop.eup %7123 }
 0x796   :  { %v7126_v27 = vpop.eup %7125  ;;  %v2695_v7 = vadd.f32 1.0, %v7124_v35  ;;  %v8200_v35 = vld [vmem:[#allocation11 + $0x68] ss:$16 sps:$4 sm:$0xff]  }
 0x797   :  { %v2701_v31 = vadd.f32 1.0, %v7126_v27  ;;  %v7128_v10 = vpop.eup %7127  ;;  %v8202_v27 = vld [vmem:[#allocation11 + $0x6c] ss:$16 sps:$4 sm:$0xff]  }
 0x798   :  { %7131 = vrcp.f32 %v2695_v7  ;;  %v7130_v22 = vpop.eup %7129  ;;  %v2708_v51 = vadd.f32 1.0, %v7128_v10  ;;  %v8208_v7 = vld [vmem:[#allocation11 + $0x84] ss:$16 sps:$4 sm:$0xff]   ;;  %v8212_v10 = vld [vmem:[#allocation11 + $0x80] ss:$16 sps:$4 sm:$0xff]  }
 0x799   :  { %7133 = vrcp.f32 %v2701_v31  ;;  %v8210_v31 = vld [vmem:[#allocation11 + $0x8c] ss:$16 sps:$4 sm:$0xff]  }
 0x79a   :  { %7135 = vrcp.f32 %v2708_v51  ;;  %v8226_v51 = vld [vmem:[#allocation11 + $0xac] ss:$16 sps:$4 sm:$0xff]  }
 0x7a2   :  { %v7132_v36 = vpop.eup %7131 }
 0x7a3   :  { %v7134_v37 = vpop.eup %7133  ;;  %v2713_v38 = vmul.f32 %v7132_v36, %v7130_v22  ;;  %v8214_v22 = vld [vmem:[#allocation11 + $0x88] ss:$16 sps:$4 sm:$0xff]   ;;  %v8220_v36 = vld [vmem:[#allocation11 + $0xa0] ss:$16 sps:$4 sm:$0xff]  }
 0x7a4   :  { %v2712_v2 = vmul.f32 %v7134_v37, %v8095_v59  ;;  %v7136_v5 = vpop.eup %7135  ;;  %v6899_v59 = vld [vmem:[#allocation10 + $0x80] ss:$16 sps:$4 sm:$0xff]   ;;  %v8222_v37 = vld [vmem:[#allocation11 + $0xa4] ss:$16 sps:$4 sm:$0xff]  }
 0x7a6   :  { %v8139_v4 = vadd.f32 %v2713_v38, %v2712_v2  ;;  %v8224_v38 = vld [vmem:[#allocation11 + $0xa8] ss:$16 sps:$4 sm:$0xff]   ;;  %v8232_v2 = vld [vmem:[#allocation11 + $0xc4] ss:$16 sps:$4 sm:$0xff]  }
 0x7a8   :  { %7137 = vtanh.f32 %v8139_v4 }
 0x7b2   :  { %v7138_v44 = vpop.eup %7137 }
 0x7b3   :  { %v8142_v39 = vmul.f32 %v7138_v44, %v7136_v5  ;;  %v8234_v5 = vld [vmem:[#allocation11 + $0xcc] ss:$16 sps:$4 sm:$0xff]   ;;  %v8236_v44 = vld [vmem:[#allocation11 + $0xc0] ss:$16 sps:$4 sm:$0xff]  }
 0x7b5   :  { %v2727_v43 = vpack.c.bf16 %v8142_v39, %v8142_v39 }
 0x7b7   :  { %2953 = vmatmul.mubr.bf16.vlgmr.msra.gmra.mrb[44].mxu0 %v2727_v43  ;;  %2994 = vmatmul.mubr.bf16.vlgmr.msra.gmra.mrb[44].mxu1 %v2727_v43  ;;  %v8246_v43 = vld [vmem:[#allocation11 + $0xe4] ss:$16 sps:$4 sm:$0xff]  }
 0x7b8   :  { %3262 = vmatpush1.bf16.msra.mxu0 %v6875_v40  ;;  %3335 = vmatpush1.bf16.msra.mxu1 %v6878_v41  ;;  %v8238_v40 = vld [vmem:[#allocation11 + $0xc8] ss:$16 sps:$4 sm:$0xff]   ;;  %v8244_v41 = vld [vmem:[#allocation11 + $0xe0] ss:$16 sps:$4 sm:$0xff]  }
 0x7b9   :  { %3263 = vmatprep.subr.bf16.mxu0 %v6883_v46  ;;  %3336 = vmatprep.subr.bf16.mxu1 %v6886_v62  ;;  %v8248_v46 = vld [vmem:[#allocation11 + $0xe8] ss:$16 sps:$4 sm:$0xff]   ;;  %v8250_v62 = vld [vmem:[#allocation11 + $0xec] ss:$16 sps:$4 sm:$0xff]  }
 0x7ba   :  { %3293 = vmatprep.mubr.bf16.mxu0 %v8812_v11  ;;  %3366 = vmatprep.mubr.bf16.mxu1 %v8812_v11 }
 0x7bc   :  { %3264 = vmatpush1.bf16.msra.mxu0 %v6881_v12  ;;  %3337 = vmatpush1.bf16.msra.mxu1 %v6884_v45 }
 0x7bd   :  { %3265 = vmatprep.subr.bf16.mxu0 %v6889_v3  ;;  %3338 = vmatprep.subr.bf16.mxu1 %v6892_v48  ;;  %v8830_v3 = vld [vmem:[#allocation35_spill] sm:$0xff] }
 0x7c0   :  { %3266 = vmatpush1.bf16.msra.mxu0 %v6887_v49  ;;  %3339 = vmatpush1.bf16.msra.mxu1 %v6890_v50  ;;  %v8831_v49 = vld [vmem:[#allocation36_spill] sm:$0xff] }
 0x7c1   :  { %3267 = vmatprep.subr.bf16.mxu0 %v6895_v54  ;;  %3340 = vmatprep.subr.bf16.mxu1 %v6898_v55 }
 0x7c4   :  { %3268 = vmatpush1.bf16.msra.mxu0 %v6893_v52  ;;  %3341 = vmatpush1.bf16.msra.mxu1 %v6896_v42  ;;  %v8832_v52 = vld [vmem:[#allocation37_spill] sm:$0xff] }
 0x7c5   :  { %3269 = vmatprep.subr.bf16.mxu0 %v6901_v57  ;;  %3342 = vmatprep.subr.bf16.mxu1 %v6904_v58  ;;  %v8833_v57 = vld [vmem:[#allocation38_spill] sm:$0xff] }
 0x7c8   :  { %3270 = vmatpush1.bf16.msra.mxu0 %v6899_v59  ;;  %3343 = vmatpush1.bf16.msra.mxu1 %v6902_v60 }
 0x7c9   :  { %3271 = vmatprep.subr.bf16.mxu0 %v6907_v63  ;;  %3344 = vmatprep.subr.bf16.mxu1 %v6910_v61 }
 0x7cc   :  { %3272 = vmatpush1.bf16.msra.mxu0 %v6905_v30  ;;  %3345 = vmatpush1.bf16.msra.mxu1 %v6908_v13 }
 0x7cd   :  { %3273 = vmatprep.subr.bf16.mxu0 %v6913_v53  ;;  %3346 = vmatprep.subr.bf16.mxu1 %v6916_v15 }
 0x7d0   :  { %3274 = vmatpush1.bf16.msra.mxu0 %v6911_v14  ;;  %3347 = vmatpush1.bf16.msra.mxu1 %v6914_v16 }
 0x7d1   :  { %3275 = vmatprep.subr.bf16.mxu0 %v6919_v18  ;;  %3348 = vmatprep.subr.bf16.mxu1 %v6922_v17 }
 0x7d4   :  { %3276 = vmatpush1.bf16.msra.mxu0 %v6917_v19  ;;  %3349 = vmatpush1.bf16.msra.mxu1 %v6920_v8 }
 0x7d5   :  { %3639 = vmatprep.subr.bf16.mxu0 %v8160_v25  ;;  %3680 = vmatprep.subr.bf16.mxu1 %v8162_v0 }
 0x7d7   :  { %3294 = vmatmul.mubr.bf16.vlgmr.msra.gmra.mrb[48].mxu0 %v3043_v33  ;;  %3367 = vmatmul.mubr.bf16.vlgmr.msra.gmra.mrb[48].mxu1 %v3043_v33 }
 0x7d8   :  { %3303 = vmatprep.mubr.bf16.mxu0 %v8812_v11  ;;  %3376 = vmatprep.mubr.bf16.mxu1 %v8812_v11 }
 0x7d9   :  { %3640 = vmatpush1.bf16.msra.mxu0 %v8164_v32  ;;  %3681 = vmatpush1.bf16.msra.mxu1 %v8166_v47 }
 0x7da   :  { %3641 = vmatprep.subr.bf16.mxu0 %v8172_v56  ;;  %3682 = vmatprep.subr.bf16.mxu1 %v8174_v1 }
 0x7dd   :  { %3642 = vmatpush1.bf16.msra.mxu0 %v8176_v20  ;;  %3683 = vmatpush1.bf16.msra.mxu1 %v8178_v24 }
 0x7de   :  { %3643 = vmatprep.subr.bf16.mxu0 %v8184_v26  ;;  %3684 = vmatprep.subr.bf16.mxu1 %v8186_v28 }
 0x7df   :  { %3304 = vmatmul.mubr.bf16.gmra.mrb[52].mxu0 %v3044_v34  ;;  %3377 = vmatmul.mubr.bf16.gmra.mrb[52].mxu1 %v3044_v34 }
 0x7e0   :  { %3313 = vmatprep.mubr.bf16.mxu0 %v8812_v11  ;;  %3386 = vmatprep.mubr.bf16.mxu1 %v8812_v11 }
 0x7e1   :  { %3644 = vmatpush1.bf16.msra.mxu0 %v8188_v6  ;;  %3685 = vmatpush1.bf16.msra.mxu1 %v8190_v29 }
 0x7e2   :  { %3645 = vmatprep.subr.bf16.mxu0 %v8198_v23  ;;  %3686 = vmatprep.subr.bf16.mxu1 %v8202_v27 }
 0x7e5   :  { %3646 = vmatpush1.bf16.msra.mxu0 %v8196_v21  ;;  %3687 = vmatpush1.bf16.msra.mxu1 %v8200_v35 }
 0x7e6   :  { %3647 = vmatprep.subr.bf16.mxu0 %v8208_v7  ;;  %3688 = vmatprep.subr.bf16.mxu1 %v8210_v31 }
 0x7e7   :  { %3314 = vmatmul.mubr.bf16.gmra.mrb[56].mxu0 %v3045_v9  ;;  %3387 = vmatmul.mubr.bf16.gmra.mrb[56].mxu1 %v3045_v9 }
 0x7e8   :  { %3323 = vmatprep.mubr.bf16.mxu0 %v8812_v11  ;;  %3396 = vmatprep.mubr.bf16.mxu1 %v8812_v11 }
 0x7e9   :  { %3648 = vmatpush1.bf16.msra.mxu0 %v8212_v10  ;;  %3689 = vmatpush1.bf16.msra.mxu1 %v8214_v22 }
 0x7ea   :  { %3649 = vmatprep.subr.bf16.mxu0 %v8222_v37  ;;  %3690 = vmatprep.subr.bf16.mxu1 %v8226_v51 }
 0x7ed   :  { %3650 = vmatpush1.bf16.msra.mxu0 %v8220_v36  ;;  %3691 = vmatpush1.bf16.msra.mxu1 %v8224_v38 }
 0x7ee   :  { %3651 = vmatprep.subr.bf16.mxu0 %v8232_v2  ;;  %3692 = vmatprep.subr.bf16.mxu1 %v8234_v5 }
 0x7f1   :  { %3652 = vmatpush1.bf16.msra.mxu0 %v8236_v44  ;;  %3693 = vmatpush1.bf16.msra.mxu1 %v8238_v40 }
 0x7f2   :  { %3653 = vmatprep.subr.bf16.mxu0 %v8246_v43  ;;  %3694 = vmatprep.subr.bf16.mxu1 %v8250_v62 }
 0x7f5   :  { %3654 = vmatpush1.bf16.msra.mxu0 %v8244_v41  ;;  %3695 = vmatpush1.bf16.msra.mxu1 %v8248_v46 }
 0x7f6   :  { %3950 = vmatprep.subr.bf16.mxu0 %v8160_v25  ;;  %3991 = vmatprep.subr.bf16.mxu1 %v8162_v0 }
 0x88a   :  { %v2954_v12 = vpop.f32.mrb[44].mxu0  ;;  %v2995_v45 = vpop.f32.mrb[44].mxu1 }
 0x88b   :  { %v3002_v48 = vadd.f32 %v2954_v12, %v8830_v3  ;;  %v3004_v50 = vadd.f32 %v2995_v45, %v8831_v49  ;;  %v2956_v54 = vpop.f32.mrb[45].mxu0  ;;  %v2997_v55 = vpop.f32.mrb[45].mxu1 }
 0x88c   :  { %v3003_v42 = vadd.f32 %v2956_v54, %v8832_v52  ;;  %v3005_v58 = vadd.f32 %v2997_v55, %v8833_v57  ;;  %v2958_v59 = vpop.f32.mrb[46].mxu0  ;;  %v2999_v60 = vpop.f32.mrb[46].mxu1 }
 0x88d   :  { %v6363_v63 = vmul.f32 -1.442695, %v3002_v48  ;;  %v2959_v61 = vpop.f32.mrb[47].mxu0  ;;  %v3000_v30 = vpop.f32.mrb[47].mxu1 }
 0x88e   :  { %v6364_v13 = vmul.f32 -1.442695, %v3003_v42  ;;  %v6365_v53 = vmul.f32 -1.442695, %v3005_v58 }
 0x88f   :  { %7139 = vpow2.f32 %v6363_v63 }
 0x890   :  { %7141 = vpow2.f32 %v6364_v13 }
 0x891   :  { %7143 = vpow2.f32 %v6365_v53 }
 0x892   :  { %7145 = vtanh.f32 %v3004_v50 }
 0x899   :  { %v7140_v15 = vpop.eup %7139 }
 0x89a   :  { %v7142_v14 = vpop.eup %7141  ;;  %v3009_v16 = vadd.f32 1.0, %v7140_v15 }
 0x89b   :  { %v3015_v18 = vadd.f32 1.0, %v7142_v14  ;;  %v7144_v17 = vpop.eup %7143 }
 0x89c   :  { %7147 = vrcp.f32 %v3009_v16  ;;  %v7146_v19 = vpop.eup %7145  ;;  %v3022_v9 = vadd.f32 1.0, %v7144_v17 }
 0x89d   :  { %7149 = vrcp.f32 %v3015_v18 }
 0x89e   :  { %7151 = vrcp.f32 %v3022_v9  ;;  %v8849_v9 = vmov 0.0|0.0  }
 0x8a6   :  { %v7148_v8 = vpop.eup %7147 }
 0x8a7   :  { %v7150_v33 = vpop.eup %7149  ;;  %v3027_v34 = vmul.f32 %v7148_v8, %v7146_v19 }
 0x8a8   :  { %v3026_v12 = vmul.f32 %v7150_v33, %v8139_v4  ;;  %v7152_v61 = vpop.eup %7151 }
 0x8aa   :  { %v8263_v45 = vpop.f32.mrb[48].mxu0  ;;  %v8265_v3 = vpop.f32.mrb[48].mxu1  ;;  %v3028_v48 = vadd.f32 %v3027_v34, %v3026_v12  ;;  %v3079_v12 = vld [vmem:[%s8776_s6] sm:$0xf] }
 0x8ab   :  { %v8267_v49 = vpop.f32.mrb[49].mxu0  ;;  %v8269_v50 = vpop.f32.mrb[49].mxu1 }
 0x8ac   :  { %v8271_v54 = vpop.f32.mrb[50].mxu0  ;;  %v8273_v55 = vpop.f32.mrb[50].mxu1  ;;  %7153 = vtanh.f32 %v3028_v48 }
 0x8ad   :  { %v8275_v52 = vpop.f32.mrb[51].mxu0  ;;  %v8277_v42 = vpop.f32.mrb[51].mxu1 }
 0x8b2   :  { %v8279_v4 = vpop.f32.mrb[52].mxu0  ;;  %v8281_v57 = vpop.f32.mrb[52].mxu1 }
 0x8b3   :  { %8834 = vst [vmem:[#allocation18_spill] sm:$0xff] %v8281_v57  ;;  %v8283_v58 = vpop.f32.mrb[53].mxu0  ;;  %v8285_v59 = vpop.f32.mrb[53].mxu1 }
 0x8b4   :  { %8835 = vst [vmem:[#allocation19_spill] sm:$0xff] %v8283_v58  ;;  %8836 = vst [vmem:[#allocation20_spill] sm:$0xff] %v8285_v59  ;;  %v8287_v60 = vpop.f32.mrb[54].mxu0  ;;  %v8289_v63 = vpop.f32.mrb[54].mxu1 }
 0x8b5   :  { %8837 = vst [vmem:[#allocation21_spill] sm:$0xff] %v8287_v60  ;;  %8838 = vst [vmem:[#allocation22_spill] sm:$0xff] %v8289_v63  ;;  %v8291_v30 = vpop.f32.mrb[55].mxu0  ;;  %v8293_v13 = vpop.f32.mrb[55].mxu1 }
 0x8b6   :  { %8839 = vst [vmem:[#allocation23_spill] sm:$0xff] %v8291_v30  ;;  %8840 = vst [vmem:[#allocation24_spill] sm:$0xff] %v8293_v13  ;;  %v7154_v53 = vpop.eup %7153 }
 0x8b7   :  { %v3030_v15 = vmul.f32 %v7154_v53, %v7152_v61 }
 0x8b9   :  { %v3046_v14 = vpack.c.bf16 %v3030_v15, %v8142_v39 }
 0x8ba   :  { %v8296_v16 = vpop.f32.mrb[56].mxu0  ;;  %v8298_v18 = vpop.f32.mrb[56].mxu1 }
 0x8bb   :  { %8841 = vst [vmem:[#allocation25_spill] sm:$0xff] %v8296_v16  ;;  %8842 = vst [vmem:[#allocation26_spill] sm:$0xff] %v8298_v18  ;;  %v8300_v17 = vpop.f32.mrb[57].mxu0  ;;  %v8302_v19 = vpop.f32.mrb[57].mxu1  ;;  %3324 = vmatmul.mubr.bf16.gmra.mrb[60].mxu0 %v3046_v14  ;;  %3397 = vmatmul.mubr.bf16.gmra.mrb[60].mxu1 %v3046_v14 }
 0x8bc   :  { %8843 = vst [vmem:[#allocation27_spill] sm:$0xff] %v8300_v17  ;;  %8844 = vst [vmem:[#allocation28_spill] sm:$0xff] %v8302_v19  ;;  %v8304_v8 = vpop.f32.mrb[58].mxu0  ;;  %v8306_v33 = vpop.f32.mrb[58].mxu1  ;;  %3671 = vmatprep.mubr.bf16.mxu0 %v8812_v11  ;;  %3712 = vmatprep.mubr.bf16.mxu1 %v8812_v11 }
 0x8bd   :  { %8845 = vst [vmem:[#allocation29_spill] sm:$0xff] %v8304_v8  ;;  %8846 = vst [vmem:[#allocation30_spill] sm:$0xff] %v8306_v33  ;;  %v8310_v34 = vpop.f32.mrb[59].mxu0  ;;  %v8312_v39 = vpop.f32.mrb[59].mxu1 }
 0x8be   :  { %8847 = vst [vmem:[#allocation31_spill] sm:$0xff] %v8310_v34  ;;  %8848 = vst [vmem:[#allocation32_spill] sm:$0xff] %v8312_v39  ;;  %v8856_v39 = vld [vmem:[#allocation17_spill] sm:$0xff] }
 0x8bf   :  { %v8857_v34 = vsub.s32 0, %v8856_v39  ;;  %v8858_v8 = vsub.s32 2, %v8856_v39 }
 0x8c1   :  { %v8367_v33 = vrot.slane %v3079_v12, %v8857_v34  ;;  %v8371_v19 = vrot.slane %v3079_v12, %v8858_v8 }
 0x8c3   :  { %3672 = vmatmul.mubr.bf16.vlgmr.msra.gmra.mrb[64].mxu0 %v8849_v9  ;;  %3713 = vmatmul.mubr.bf16.vlgmr.msra.gmra.mrb[64].mxu1 %v8849_v9  ;;  %v3296_v34 = vadd.f32 %v8263_v45, %v8367_v33 }
 0x8c4   :  { %3951 = vmatpush1.bf16.msra.mxu0 %v8164_v32  ;;  %3992 = vmatpush1.bf16.msra.mxu1 %v8166_v47 }
 0x8c5   :  { %3952 = vmatprep.subr.bf16.mxu0 %v8172_v56  ;;  %3993 = vmatprep.subr.bf16.mxu1 %v8174_v1 }
 0x8c6   :  { %3982 = vmatprep.mubr.bf16.mxu0 %v8812_v11  ;;  %4023 = vmatprep.mubr.bf16.mxu1 %v8812_v11 }
 0x8c8   :  { %3953 = vmatpush1.bf16.msra.mxu0 %v8176_v20  ;;  %3994 = vmatpush1.bf16.msra.mxu1 %v8178_v24 }
 0x8c9   :  { %3954 = vmatprep.subr.bf16.mxu0 %v8184_v26  ;;  %3995 = vmatprep.subr.bf16.mxu1 %v8186_v28 }
 0x8cc   :  { %3955 = vmatpush1.bf16.msra.mxu0 %v8188_v6  ;;  %3996 = vmatpush1.bf16.msra.mxu1 %v8190_v29 }
 0x8cd   :  { %3956 = vmatprep.subr.bf16.mxu0 %v8198_v23  ;;  %3997 = vmatprep.subr.bf16.mxu1 %v8202_v27 }
 0x8d0   :  { %3957 = vmatpush1.bf16.msra.mxu0 %v8196_v21  ;;  %3998 = vmatpush1.bf16.msra.mxu1 %v8200_v35 }
 0x8d1   :  { %3958 = vmatprep.subr.bf16.mxu0 %v8208_v7  ;;  %3999 = vmatprep.subr.bf16.mxu1 %v8210_v31 }
 0x8d4   :  { %3959 = vmatpush1.bf16.msra.mxu0 %v8212_v10  ;;  %4000 = vmatpush1.bf16.msra.mxu1 %v8214_v22 }
 0x8d5   :  { %3960 = vmatprep.subr.bf16.mxu0 %v8222_v37  ;;  %4001 = vmatprep.subr.bf16.mxu1 %v8226_v51 }
 0x8d8   :  { %3961 = vmatpush1.bf16.msra.mxu0 %v8220_v36  ;;  %4002 = vmatpush1.bf16.msra.mxu1 %v8224_v38 }
 0x8d9   :  { %3962 = vmatprep.subr.bf16.mxu0 %v8232_v2  ;;  %4003 = vmatprep.subr.bf16.mxu1 %v8234_v5 }
 0x8dc   :  { %3963 = vmatpush1.bf16.msra.mxu0 %v8236_v44  ;;  %4004 = vmatpush1.bf16.msra.mxu1 %v8238_v40 }
 0x8dd   :  { %3964 = vmatprep.subr.bf16.mxu0 %v8246_v43  ;;  %4005 = vmatprep.subr.bf16.mxu1 %v8250_v62 }
 0x8e0   :  { %3965 = vmatpush1.bf16.msra.mxu0 %v8244_v41  ;;  %4006 = vmatpush1.bf16.msra.mxu1 %v8248_v46 }
 0x8e1   :  { %4261 = vmatprep.subr.bf16.mxu0 %v8160_v25  ;;  %4302 = vmatprep.subr.bf16.mxu1 %v8162_v0 }
 0x98e   :  { %v8353_v48 = vpop.f32.mrb[60].mxu0  ;;  %v8355_v61 = vpop.f32.mrb[60].mxu1 }
 0x98f   :  { %8850 = vst [vmem:[#allocation33_spill] sm:$0xff] %v8353_v48  ;;  %8851 = vst [vmem:[#allocation34_spill] sm:$0xff] %v8355_v61  ;;  %v8357_v53 = vpop.f32.mrb[61].mxu0  ;;  %v8359_v15 = vpop.f32.mrb[61].mxu1 }
 0x990   :  { %8852 = vst [vmem:[#allocation35_spill] sm:$0xff] %v8357_v53  ;;  %8853 = vst [vmem:[#allocation36_spill] sm:$0xff] %v8359_v15  ;;  %v8361_v14 = vpop.f32.mrb[62].mxu0  ;;  %v8363_v9 = vpop.f32.mrb[62].mxu1  ;;  %v8861_v53 = vsub.s32 1, %v8856_v39 }
 0x991   :  { %8854 = vst [vmem:[#allocation37_spill] sm:$0xff] %v8361_v14  ;;  %8855 = vst [vmem:[#allocation38_spill] sm:$0xff] %v8363_v9  ;;  %v8373_v17 = vpop.f32.mrb[63].mxu0  ;;  %v8375_v48 = vpop.f32.mrb[63].mxu1  ;;  %v8862_v14 = vsub.s32 3, %v8856_v39  ;;  %v3369_v9 = vadd.f32 %v8265_v3, %v8371_v19 }
 0x992   :  { %8859 = vst [vmem:[#allocation17_spill] sm:$0xff] %v8373_v17  ;;  %8860 = vst [vmem:[#allocation39_spill] sm:$0xff] %v8375_v48  ;;  %v8379_v61 = vrot.slane %v3079_v12, %v8861_v53 }
 0x993   :  { %v8383_v15 = vrot.slane %v3079_v12, %v8862_v14 }
 0x994   :  { %v3298_v8 = vadd.f32 %v8267_v49, %v8379_v61 }
 0x995   :  { %v3371_v48 = vadd.f32 %v8269_v50, %v8383_v15 }
 0x996   :  { %v3673_v17 = vpop.f32.mrb[64].mxu0  ;;  %v3714_v18 = vpop.f32.mrb[64].mxu1 }
 0x997   :  { %v3721_v53 = vadd.f32 %v3673_v17, %v3296_v34  ;;  %v3723_v16 = vadd.f32 %v3714_v18, %v3369_v9  ;;  %v3675_v13 = vpop.f32.mrb[65].mxu0  ;;  %v3716_v39 = vpop.f32.mrb[65].mxu1 }
 0x998   :  { %v3722_v12 = vadd.f32 %v3675_v13, %v3298_v8  ;;  %v3724_v14 = vadd.f32 %v3716_v39, %v3371_v48  ;;  %v3677_v30 = vpop.f32.mrb[66].mxu0  ;;  %v3718_v63 = vpop.f32.mrb[66].mxu1  ;;  %v3302_v39 = vadd.f32 %v8275_v52, %v8379_v61 }
 0x999   :  { %v6430_v45 = vmul.f32 -1.442695, %v3721_v53  ;;  %v3678_v60 = vpop.f32.mrb[67].mxu0  ;;  %v3719_v59 = vpop.f32.mrb[67].mxu1 }
 0x99a   :  { %v6431_v3 = vmul.f32 -1.442695, %v3722_v12  ;;  %v6432_v49 = vmul.f32 -1.442695, %v3724_v14  ;;  %v3375_v12 = vadd.f32 %v8277_v42, %v8383_v15 }
 0x99b   :  { %7155 = vpow2.f32 %v6430_v45 }
 0x99c   :  { %7157 = vpow2.f32 %v6431_v3 }
 0x99d   :  { %7159 = vpow2.f32 %v6432_v49 }
 0x99e   :  { %7161 = vtanh.f32 %v3723_v16  ;;  %v3373_v16 = vadd.f32 %v8273_v55, %v8371_v19 }
 0x9a5   :  { %v7156_v58 = vpop.eup %7155 }
 0x9a6   :  { %v7158_v57 = vpop.eup %7157  ;;  %v3728_v50 = vadd.f32 1.0, %v7156_v58 }
 0x9a7   :  { %v3734_v17 = vadd.f32 1.0, %v7158_v57  ;;  %v7160_v18 = vpop.eup %7159  ;;  %v3300_v57 = vadd.f32 %v8271_v54, %v8367_v33 }
 0x9a8   :  { %7163 = vrcp.f32 %v3728_v50  ;;  %v7162_v13 = vpop.eup %7161  ;;  %v3741_v9 = vadd.f32 1.0, %v7160_v18 }
 0x9a9   :  { %7165 = vrcp.f32 %v3734_v17 }
 0x9aa   :  { %7167 = vrcp.f32 %v3741_v9 }
 0x9b2   :  { %v7164_v48 = vpop.eup %7163 }
 0x9b3   :  { %v7166_v30 = vpop.eup %7165  ;;  %v3746_v63 = vmul.f32 %v7164_v48, %v7162_v13 }
 0x9b4   :  { %v3745_v60 = vmul.f32 0.0, %v7166_v30  ;;  %v7168_v34 = vpop.eup %7167 }
 0x9b6   :  { %v8393_v59 = vadd.f32 %v3746_v63, %v3745_v60 }
 0x9b8   :  { %7169 = vtanh.f32 %v8393_v59 }
 0x9c2   :  { %v7170_v8 = vpop.eup %7169 }
 0x9c3   :  { %v3749_v58 = vmul.f32 %v7170_v8, %v7168_v34 }
 0x9c5   :  { %v3757_v53 = vpack.c.bf16 %v3749_v58, %v3749_v58 }
 0x9c7   :  { %3983 = vmatmul.mubr.bf16.vlgmr.msra.gmra.mrb[68].mxu0 %v3757_v53  ;;  %4024 = vmatmul.mubr.bf16.vlgmr.msra.gmra.mrb[68].mxu1 %v3757_v53 }
 0x9c8   :  { %4262 = vmatpush1.bf16.msra.mxu0 %v8164_v32  ;;  %4303 = vmatpush1.bf16.msra.mxu1 %v8166_v47 }
 0x9c9   :  { %4263 = vmatprep.subr.bf16.mxu0 %v8172_v56  ;;  %4304 = vmatprep.subr.bf16.mxu1 %v8174_v1 }
 0x9ca   :  { %4293 = vmatprep.mubr.bf16.mxu0 %v8812_v11  ;;  %4334 = vmatprep.mubr.bf16.mxu1 %v8812_v11 }
 0x9cc   :  { %4264 = vmatpush1.bf16.msra.mxu0 %v8176_v20  ;;  %4305 = vmatpush1.bf16.msra.mxu1 %v8178_v24 }
 0x9cd   :  { %4265 = vmatprep.subr.bf16.mxu0 %v8184_v26  ;;  %4306 = vmatprep.subr.bf16.mxu1 %v8186_v28 }
 0x9d0   :  { %4266 = vmatpush1.bf16.msra.mxu0 %v8188_v6  ;;  %4307 = vmatpush1.bf16.msra.mxu1 %v8190_v29 }
 0x9d1   :  { %4267 = vmatprep.subr.bf16.mxu0 %v8198_v23  ;;  %4308 = vmatprep.subr.bf16.mxu1 %v8202_v27 }
 0x9d4   :  { %4268 = vmatpush1.bf16.msra.mxu0 %v8196_v21  ;;  %4309 = vmatpush1.bf16.msra.mxu1 %v8200_v35 }
 0x9d5   :  { %4269 = vmatprep.subr.bf16.mxu0 %v8208_v7  ;;  %4310 = vmatprep.subr.bf16.mxu1 %v8210_v31 }
 0x9d8   :  { %4270 = vmatpush1.bf16.msra.mxu0 %v8212_v10  ;;  %4311 = vmatpush1.bf16.msra.mxu1 %v8214_v22 }
 0x9d9   :  { %4271 = vmatprep.subr.bf16.mxu0 %v8222_v37  ;;  %4312 = vmatprep.subr.bf16.mxu1 %v8226_v51 }
 0x9dc   :  { %4272 = vmatpush1.bf16.msra.mxu0 %v8220_v36  ;;  %4313 = vmatpush1.bf16.msra.mxu1 %v8224_v38 }
 0x9dd   :  { %4273 = vmatprep.subr.bf16.mxu0 %v8232_v2  ;;  %4314 = vmatprep.subr.bf16.mxu1 %v8234_v5 }
 0x9e0   :  { %4274 = vmatpush1.bf16.msra.mxu0 %v8236_v44  ;;  %4315 = vmatpush1.bf16.msra.mxu1 %v8238_v40 }
 0x9e1   :  { %4275 = vmatprep.subr.bf16.mxu0 %v8246_v43  ;;  %4316 = vmatprep.subr.bf16.mxu1 %v8250_v62 }
 0x9e4   :  { %4276 = vmatpush1.bf16.msra.mxu0 %v8244_v41  ;;  %4317 = vmatpush1.bf16.msra.mxu1 %v8248_v46 }
 0x9e5   :  { %4572 = vmatprep.subr.bf16.mxu0 %v8160_v25  ;;  %4613 = vmatprep.subr.bf16.mxu1 %v8162_v0 }
 0xa9a   :  { %v3984_v14 = vpop.f32.mrb[68].mxu0  ;;  %v4025_v45 = vpop.f32.mrb[68].mxu1 }
 0xa9b   :  { %v4032_v3 = vadd.f32 %v3984_v14, %v3300_v57  ;;  %v4034_v49 = vadd.f32 %v4025_v45, %v3373_v16  ;;  %v3986_v50 = vpop.f32.mrb[69].mxu0  ;;  %v4027_v25 = vpop.f32.mrb[69].mxu1 }
 0xa9c   :  { %v4033_v17 = vadd.f32 %v3986_v50, %v3302_v39  ;;  %v4035_v0 = vadd.f32 %v4027_v25, %v3375_v12  ;;  %v3988_v18 = vpop.f32.mrb[70].mxu0  ;;  %v4029_v13 = vpop.f32.mrb[70].mxu1 }
 0xa9d   :  { %v6465_v54 = vmul.f32 -1.442695, %v4032_v3  ;;  %v3989_v48 = vpop.f32.mrb[71].mxu0  ;;  %v4030_v30 = vpop.f32.mrb[71].mxu1 }
 0xa9e   :  { %v6466_v55 = vmul.f32 -1.442695, %v4033_v17  ;;  %v6467_v52 = vmul.f32 -1.442695, %v4035_v0  ;;  %v8490_v48 = vld [vmem:[#allocation11 + $0xc] ss:$16 sps:$4 sm:$0xff]  }
 0xa9f   :  { %7171 = vpow2.f32 %v6465_v54  ;;  %v8488_v54 = vld [vmem:[#allocation11 + $0x4] ss:$16 sps:$4 sm:$0xff]   ;;  %v8492_v30 = vld [vmem:[#allocation11] ss:$16 sps:$4 sm:$0xff]  }
 0xaa0   :  { %7173 = vpow2.f32 %v6466_v55  ;;  %v8494_v55 = vld [vmem:[#allocation11 + $0x8] ss:$16 sps:$4 sm:$0xff]  }
 0xaa1   :  { %7175 = vpow2.f32 %v6467_v52  ;;  %v8500_v52 = vld [vmem:[#allocation11 + $0x24] ss:$16 sps:$4 sm:$0xff]  }
 0xaa2   :  { %7177 = vtanh.f32 %v4034_v49 }
 0xaa9   :  { %v7172_v63 = vpop.eup %7171 }
 0xaaa   :  { %v7174_v9 = vpop.eup %7173  ;;  %v4039_v42 = vadd.f32 1.0, %v7172_v63  ;;  %v8502_v63 = vld [vmem:[#allocation11 + $0x2c] ss:$16 sps:$4 sm:$0xff]  }
 0xaab   :  { %v4045_v60 = vadd.f32 1.0, %v7174_v9  ;;  %v7176_v34 = vpop.eup %7175  ;;  %v8504_v9 = vld [vmem:[#allocation11 + $0x20] ss:$16 sps:$4 sm:$0xff]  }
 0xaac   :  { %7179 = vrcp.f32 %v4039_v42  ;;  %v7178_v8 = vpop.eup %7177  ;;  %v4052_v16 = vadd.f32 1.0, %v7176_v34  ;;  %v8506_v42 = vld [vmem:[#allocation11 + $0x28] ss:$16 sps:$4 sm:$0xff]   ;;  %v8514_v34 = vld [vmem:[#allocation11 + $0x4c] ss:$16 sps:$4 sm:$0xff]  }
 0xaad   :  { %7181 = vrcp.f32 %v4045_v60  ;;  %v8512_v60 = vld [vmem:[#allocation11 + $0x44] ss:$16 sps:$4 sm:$0xff]  }
 0xaae   :  { %7183 = vrcp.f32 %v4052_v16  ;;  %v8528_v16 = vld [vmem:[#allocation11 + $0x60] ss:$16 sps:$4 sm:$0xff]  }
 0xab6   :  { %v7180_v58 = vpop.eup %7179 }
 0xab7   :  { %v7182_v53 = vpop.eup %7181  ;;  %v4057_v57 = vmul.f32 %v7180_v58, %v7178_v8  ;;  %v8516_v8 = vld [vmem:[#allocation11 + $0x40] ss:$16 sps:$4 sm:$0xff]   ;;  %v8518_v58 = vld [vmem:[#allocation11 + $0x48] ss:$16 sps:$4 sm:$0xff]  }
 0xab8   :  { %v4056_v39 = vmul.f32 %v7182_v53, %v8393_v59  ;;  %v7184_v14 = vpop.eup %7183  ;;  %v8524_v53 = vld [vmem:[#allocation11 + $0x64] ss:$16 sps:$4 sm:$0xff]  }
 0xaba   :  { %v8439_v12 = vadd.f32 %v4057_v57, %v4056_v39  ;;  %v8526_v57 = vld [vmem:[#allocation11 + $0x6c] ss:$16 sps:$4 sm:$0xff]   ;;  %v8530_v39 = vld [vmem:[#allocation11 + $0x68] ss:$16 sps:$4 sm:$0xff]  }
 0xabc   :  { %7185 = vtanh.f32 %v8439_v12 }
 0xac6   :  { %v7186_v45 = vpop.eup %7185 }
 0xac7   :  { %v4060_v3 = vmul.f32 %v7186_v45, %v7184_v14  ;;  %v8538_v14 = vld [vmem:[#allocation11 + $0x84] ss:$16 sps:$4 sm:$0xff]   ;;  %v8540_v45 = vld [vmem:[#allocation11 + $0x88] ss:$16 sps:$4 sm:$0xff]  }
 0xac9   :  { %v4068_v49 = vpack.c.bf16 %v4060_v3, %v4060_v3  ;;  %v8542_v3 = vld [vmem:[#allocation11 + $0x8c] ss:$16 sps:$4 sm:$0xff]  }
 0xacb   :  { %4294 = vmatmul.mubr.bf16.vlgmr.msra.gmra.mrb[72].mxu0 %v4068_v49  ;;  %4335 = vmatmul.mubr.bf16.vlgmr.msra.gmra.mrb[72].mxu1 %v4068_v49  ;;  %v8544_v49 = vld [vmem:[#allocation11 + $0xa4] ss:$16 sps:$4 sm:$0xff]  }
 0xacc   :  { %4573 = vmatpush1.bf16.msra.mxu0 %v8164_v32  ;;  %4614 = vmatpush1.bf16.msra.mxu1 %v8166_v47  ;;  %v3306_v32 = vadd.f32 %v8279_v4, %v8367_v33  ;;  %v8863_v47 = vld [vmem:[#allocation18_spill] sm:$0xff] }
 0xacd   :  { %4574 = vmatprep.subr.bf16.mxu0 %v8172_v56  ;;  %4615 = vmatprep.subr.bf16.mxu1 %v8174_v1  ;;  %v3379_v56 = vadd.f32 %v8863_v47, %v8371_v19  ;;  %v8864_v1 = vld [vmem:[#allocation19_spill] sm:$0xff] }
 0xace   :  { %4604 = vmatprep.mubr.bf16.mxu0 %v8812_v11  ;;  %4645 = vmatprep.mubr.bf16.mxu1 %v8812_v11  ;;  %v8551_v47 = vld [vmem:[#allocation11 + $0xa0] ss:$16 sps:$4 sm:$0xff]  }
 0xad0   :  { %4575 = vmatpush1.bf16.msra.mxu0 %v8176_v20  ;;  %4616 = vmatpush1.bf16.msra.mxu1 %v8178_v24  ;;  %v3308_v20 = vadd.f32 %v8864_v1, %v8379_v61  ;;  %v8865_v24 = vld [vmem:[#allocation20_spill] sm:$0xff]  ;;  %v8557_v1 = vld [vmem:[#allocation11 + $0xc4] ss:$16 sps:$4 sm:$0xff]  }
 0xad1   :  { %4576 = vmatprep.subr.bf16.mxu0 %v8184_v26  ;;  %4617 = vmatprep.subr.bf16.mxu1 %v8186_v28  ;;  %v3381_v26 = vadd.f32 %v8865_v24, %v8383_v15  ;;  %v8563_v24 = vld [vmem:[#allocation11 + $0xc0] ss:$16 sps:$4 sm:$0xff]  }
 0xad4   :  { %4577 = vmatpush1.bf16.msra.mxu0 %v8188_v6  ;;  %4618 = vmatpush1.bf16.msra.mxu1 %v8190_v29 }
 0xad5   :  { %4578 = vmatprep.subr.bf16.mxu0 %v8198_v23  ;;  %4619 = vmatprep.subr.bf16.mxu1 %v8202_v27 }
 0xad8   :  { %4579 = vmatpush1.bf16.msra.mxu0 %v8196_v21  ;;  %4620 = vmatpush1.bf16.msra.mxu1 %v8200_v35 }
 0xad9   :  { %4580 = vmatprep.subr.bf16.mxu0 %v8208_v7  ;;  %4621 = vmatprep.subr.bf16.mxu1 %v8210_v31 }
 0xadc   :  { %4581 = vmatpush1.bf16.msra.mxu0 %v8212_v10  ;;  %4622 = vmatpush1.bf16.msra.mxu1 %v8214_v22 }
 0xadd   :  { %4582 = vmatprep.subr.bf16.mxu0 %v8222_v37  ;;  %4623 = vmatprep.subr.bf16.mxu1 %v8226_v51 }
 0xae0   :  { %4583 = vmatpush1.bf16.msra.mxu0 %v8220_v36  ;;  %4624 = vmatpush1.bf16.msra.mxu1 %v8224_v38 }
 0xae1   :  { %4584 = vmatprep.subr.bf16.mxu0 %v8232_v2  ;;  %4625 = vmatprep.subr.bf16.mxu1 %v8234_v5 }
 0xae4   :  { %4585 = vmatpush1.bf16.msra.mxu0 %v8236_v44  ;;  %4626 = vmatpush1.bf16.msra.mxu1 %v8238_v40 }
 0xae5   :  { %4586 = vmatprep.subr.bf16.mxu0 %v8246_v43  ;;  %4627 = vmatprep.subr.bf16.mxu1 %v8250_v62 }
 0xae8   :  { %4587 = vmatpush1.bf16.msra.mxu0 %v8244_v41  ;;  %4628 = vmatpush1.bf16.msra.mxu1 %v8248_v46 }
 0xae9   :  { %4883 = vmatprep.subr.bf16.mxu0 %v8488_v54  ;;  %4924 = vmatprep.subr.bf16.mxu1 %v8490_v48 }
 0xb9e   :  { %v4295_v28 = vpop.f32.mrb[72].mxu0  ;;  %v4336_v6 = vpop.f32.mrb[72].mxu1 }
 0xb9f   :  { %v4343_v29 = vadd.f32 %v4295_v28, %v3306_v32  ;;  %v4345_v21 = vadd.f32 %v4336_v6, %v3379_v56  ;;  %v4297_v23 = vpop.f32.mrb[73].mxu0  ;;  %v4338_v35 = vpop.f32.mrb[73].mxu1  ;;  %v8547_v32 = vld [vmem:[#allocation11 + $0xac] ss:$16 sps:$4 sm:$0xff]   ;;  %v8555_v56 = vld [vmem:[#allocation11 + $0xa8] ss:$16 sps:$4 sm:$0xff]  }
 0xba0   :  { %v4344_v27 = vadd.f32 %v4297_v23, %v3308_v20  ;;  %v4346_v7 = vadd.f32 %v4338_v35, %v3381_v26  ;;  %v4299_v31 = vpop.f32.mrb[74].mxu0  ;;  %v4340_v10 = vpop.f32.mrb[74].mxu1  ;;  %v8560_v20 = vld [vmem:[#allocation11 + $0xcc] ss:$16 sps:$4 sm:$0xff]   ;;  %v8567_v26 = vld [vmem:[#allocation11 + $0xc8] ss:$16 sps:$4 sm:$0xff]  }
 0xba1   :  { %v6500_v22 = vmul.f32 -1.442695, %v4343_v29  ;;  %v4300_v36 = vpop.f32.mrb[75].mxu0  ;;  %v4341_v37 = vpop.f32.mrb[75].mxu1  ;;  %v8569_v28 = vld [vmem:[#allocation11 + $0xe4] ss:$16 sps:$4 sm:$0xff]  }
 0xba2   :  { %v6501_v38 = vmul.f32 -1.442695, %v4344_v27  ;;  %v6502_v51 = vmul.f32 -1.442695, %v4346_v7  ;;  %v8572_v6 = vld [vmem:[#allocation11 + $0xec] ss:$16 sps:$4 sm:$0xff]  }
 0xba3   :  { %7187 = vpow2.f32 %v6500_v22  ;;  %v8575_v29 = vld [vmem:[#allocation11 + $0xe0] ss:$16 sps:$4 sm:$0xff]  }
 0xba4   :  { %7189 = vpow2.f32 %v6501_v38  ;;  %v8866_v23 = vld [vmem:[#allocation21_spill] sm:$0xff]  ;;  %v8867_v27 = vld [vmem:[#allocation22_spill] sm:$0xff]  ;;  %v8868_v31 = vld [vmem:[#allocation23_spill] sm:$0xff] }
 0xba5   :  { %7191 = vpow2.f32 %v6502_v51  ;;  %v3310_v35 = vadd.f32 %v8866_v23, %v8367_v33  ;;  %v3383_v7 = vadd.f32 %v8867_v27, %v8371_v19  ;;  %v3312_v10 = vadd.f32 %v8868_v31, %v8379_v61  ;;  %v8869_v22 = vld [vmem:[#allocation24_spill] sm:$0xff] }
 0xba6   :  { %7193 = vtanh.f32 %v4345_v21  ;;  %v8579_v21 = vld [vmem:[#allocation11 + $0xe8] ss:$16 sps:$4 sm:$0xff]   ;;  %v3385_v36 = vadd.f32 %v8869_v22, %v8383_v15 }
 0xbad   :  { %v7188_v2 = vpop.eup %7187 }
 0xbae   :  { %v7190_v5 = vpop.eup %7189  ;;  %v4350_v44 = vadd.f32 1.0, %v7188_v2 }
 0xbaf   :  { %v4356_v40 = vadd.f32 1.0, %v7190_v5  ;;  %v7192_v41 = vpop.eup %7191 }
 0xbb0   :  { %7195 = vrcp.f32 %v4350_v44  ;;  %v7194_v43 = vpop.eup %7193  ;;  %v4363_v59 = vadd.f32 1.0, %v7192_v41 }
 0xbb1   :  { %7197 = vrcp.f32 %v4356_v40 }
 0xbb2   :  { %7199 = vrcp.f32 %v4363_v59 }
 0xbba   :  { %v7196_v46 = vpop.eup %7195 }
 0xbbb   :  { %v7198_v62 = vpop.eup %7197  ;;  %v4368_v4 = vmul.f32 %v7196_v46, %v7194_v43 }
 0xbbc   :  { %v4367_v50 = vmul.f32 %v7198_v62, %v8439_v12  ;;  %v7200_v17 = vpop.eup %7199  ;;  %v8536_v12 = vld [vmem:[#allocation11 + $0x80] ss:$16 sps:$4 sm:$0xff]  }
 0xbbe   :  { %v8483_v25 = vadd.f32 %v4368_v4, %v4367_v50 }
 0xbc0   :  { %7201 = vtanh.f32 %v8483_v25 }
 0xbca   :  { %v7202_v0 = vpop.eup %7201 }
 0xbcb   :  { %v4371_v18 = vmul.f32 %v7202_v0, %v7200_v17 }
 0xbcd   :  { %v4379_v13 = vpack.c.bf16 %v4371_v18, %v4371_v18 }
 0xbcf   :  { %4605 = vmatmul.mubr.bf16.vlgmr.msra.gmra.mrb[76].mxu0 %v4379_v13  ;;  %4646 = vmatmul.mubr.bf16.vlgmr.msra.gmra.mrb[76].mxu1 %v4379_v13 }
 0xbd0   :  { %4915 = vmatprep.mubr.bf16.mxu0 %v8812_v11  ;;  %4956 = vmatprep.mubr.bf16.mxu1 %v8812_v11 }
 0xbd1   :  { %4884 = vmatpush1.bf16.msra.mxu0 %v8492_v30  ;;  %4925 = vmatpush1.bf16.msra.mxu1 %v8494_v55 }
 0xbd2   :  { %4885 = vmatprep.subr.bf16.mxu0 %v8500_v52  ;;  %4926 = vmatprep.subr.bf16.mxu1 %v8502_v63 }
 0xbd5   :  { %4886 = vmatpush1.bf16.msra.mxu0 %v8504_v9  ;;  %4927 = vmatpush1.bf16.msra.mxu1 %v8506_v42 }
 0xbd6   :  { %4887 = vmatprep.subr.bf16.mxu0 %v8512_v60  ;;  %4928 = vmatprep.subr.bf16.mxu1 %v8514_v34 }
 0xbd9   :  { %4888 = vmatpush1.bf16.msra.mxu0 %v8516_v8  ;;  %4929 = vmatpush1.bf16.msra.mxu1 %v8518_v58 }
 0xbda   :  { %4889 = vmatprep.subr.bf16.mxu0 %v8524_v53  ;;  %4930 = vmatprep.subr.bf16.mxu1 %v8526_v57 }
 0xbdd   :  { %4890 = vmatpush1.bf16.msra.mxu0 %v8528_v16  ;;  %4931 = vmatpush1.bf16.msra.mxu1 %v8530_v39 }
 0xbde   :  { %4891 = vmatprep.subr.bf16.mxu0 %v8538_v14  ;;  %4932 = vmatprep.subr.bf16.mxu1 %v8542_v3 }
 0xbe1   :  { %4892 = vmatpush1.bf16.msra.mxu0 %v8536_v12  ;;  %4933 = vmatpush1.bf16.msra.mxu1 %v8540_v45 }
 0xbe2   :  { %4893 = vmatprep.subr.bf16.mxu0 %v8544_v49  ;;  %4934 = vmatprep.subr.bf16.mxu1 %v8547_v32 }
 0xbe5   :  { %4894 = vmatpush1.bf16.msra.mxu0 %v8551_v47  ;;  %4935 = vmatpush1.bf16.msra.mxu1 %v8555_v56 }
 0xbe6   :  { %4895 = vmatprep.subr.bf16.mxu0 %v8557_v1  ;;  %4936 = vmatprep.subr.bf16.mxu1 %v8560_v20 }
 0xbe9   :  { %4896 = vmatpush1.bf16.msra.mxu0 %v8563_v24  ;;  %4937 = vmatpush1.bf16.msra.mxu1 %v8567_v26 }
 0xbea   :  { %4897 = vmatprep.subr.bf16.mxu0 %v8569_v28  ;;  %4938 = vmatprep.subr.bf16.mxu1 %v8572_v6 }
 0xbed   :  { %4898 = vmatpush1.bf16.msra.mxu0 %v8575_v29  ;;  %4939 = vmatpush1.bf16.msra.mxu1 %v8579_v21 }
 0xbee   :  { %5194 = vmatprep.subr.bf16.mxu0 %v8488_v54  ;;  %5235 = vmatprep.subr.bf16.mxu1 %v8490_v48 }
 0xca2   :  { %v4606_v37 = vpop.f32.mrb[76].mxu0  ;;  %v4647_v38 = vpop.f32.mrb[76].mxu1 }
 0xca3   :  { %v4654_v51 = vadd.f32 %v4606_v37, %v3310_v35  ;;  %v4656_v2 = vadd.f32 %v4647_v38, %v3383_v7  ;;  %v4608_v5 = vpop.f32.mrb[77].mxu0  ;;  %v4649_v44 = vpop.f32.mrb[77].mxu1 }
 0xca4   :  { %v4655_v40 = vadd.f32 %v4608_v5, %v3312_v10  ;;  %v4657_v41 = vadd.f32 %v4649_v44, %v3385_v36  ;;  %v4610_v43 = vpop.f32.mrb[78].mxu0  ;;  %v4651_v46 = vpop.f32.mrb[78].mxu1 }
 0xca5   :  { %v6535_v62 = vmul.f32 -1.442695, %v4654_v51  ;;  %v4611_v4 = vpop.f32.mrb[79].mxu0  ;;  %v4652_v59 = vpop.f32.mrb[79].mxu1  ;;  %v8872_v43 = vld [vmem:[#allocation27_spill] sm:$0xff] }
 0xca6   :  { %v6536_v50 = vmul.f32 -1.442695, %v4655_v40  ;;  %v6537_v17 = vmul.f32 -1.442695, %v4657_v41  ;;  %v8871_v40 = vld [vmem:[#allocation26_spill] sm:$0xff]  ;;  %v3318_v46 = vadd.f32 %v8872_v43, %v8379_v61 }
 0xca7   :  { %7203 = vpow2.f32 %v6535_v62  ;;  %v3389_v41 = vadd.f32 %v8871_v40, %v8371_v19  ;;  %v8873_v62 = vld [vmem:[#allocation28_spill] sm:$0xff] }
 0xca8   :  { %7205 = vpow2.f32 %v6536_v50  ;;  %v3391_v4 = vadd.f32 %v8873_v62, %v8383_v15 }
 0xca9   :  { %7207 = vpow2.f32 %v6537_v17 }
 0xcaa   :  { %7209 = vtanh.f32 %v4656_v2 }
 0xcb1   :  { %v7204_v0 = vpop.eup %7203 }
 0xcb2   :  { %v7206_v18 = vpop.eup %7205  ;;  %v4661_v13 = vadd.f32 1.0, %v7204_v0 }
 0xcb3   :  { %v4667_v23 = vadd.f32 1.0, %v7206_v18  ;;  %v7208_v35 = vpop.eup %7207 }
 0xcb4   :  { %7211 = vrcp.f32 %v4661_v13  ;;  %v7210_v27 = vpop.eup %7209  ;;  %v4674_v22 = vadd.f32 1.0, %v7208_v35 }
 0xcb5   :  { %7213 = vrcp.f32 %v4667_v23 }
 0xcb6   :  { %7215 = vrcp.f32 %v4674_v22 }
 0xcbe   :  { %v7212_v7 = vpop.eup %7211 }
 0xcbf   :  { %v7214_v31 = vpop.eup %7213  ;;  %v4679_v10 = vmul.f32 %v7212_v7, %v7210_v27 }
 0xcc0   :  { %v4678_v36 = vmul.f32 %v7214_v31, %v8483_v25  ;;  %v7216_v38 = vpop.eup %7215  ;;  %v8870_v25 = vld [vmem:[#allocation25_spill] sm:$0xff] }
 0xcc1   :  { %v3316_v44 = vadd.f32 %v8870_v25, %v8367_v33 }
 0xcc2   :  { %v8595_v37 = vadd.f32 %v4679_v10, %v4678_v36 }
 0xcc4   :  { %7217 = vtanh.f32 %v8595_v37 }
 0xcce   :  { %v7218_v51 = vpop.eup %7217 }
 0xccf   :  { %v4682_v5 = vmul.f32 %v7218_v51, %v7216_v38 }
 0xcd1   :  { %v4690_v2 = vpack.c.bf16 %v4682_v5, %v4682_v5 }
 0xcd3   :  { %4916 = vmatmul.mubr.bf16.vlgmr.msra.gmra.mrb[80].mxu0 %v4690_v2  ;;  %4957 = vmatmul.mubr.bf16.vlgmr.msra.gmra.mrb[80].mxu1 %v4690_v2 }
 0xcd4   :  { %5195 = vmatpush1.bf16.msra.mxu0 %v8492_v30  ;;  %5236 = vmatpush1.bf16.msra.mxu1 %v8494_v55 }
 0xcd5   :  { %5196 = vmatprep.subr.bf16.mxu0 %v8500_v52  ;;  %5237 = vmatprep.subr.bf16.mxu1 %v8502_v63 }
 0xcd6   :  { %5226 = vmatprep.mubr.bf16.mxu0 %v8812_v11  ;;  %5267 = vmatprep.mubr.bf16.mxu1 %v8812_v11 }
 0xcd8   :  { %5197 = vmatpush1.bf16.msra.mxu0 %v8504_v9  ;;  %5238 = vmatpush1.bf16.msra.mxu1 %v8506_v42 }
 0xcd9   :  { %5198 = vmatprep.subr.bf16.mxu0 %v8512_v60  ;;  %5239 = vmatprep.subr.bf16.mxu1 %v8514_v34 }
 0xcdc   :  { %5199 = vmatpush1.bf16.msra.mxu0 %v8516_v8  ;;  %5240 = vmatpush1.bf16.msra.mxu1 %v8518_v58 }
 0xcdd   :  { %5200 = vmatprep.subr.bf16.mxu0 %v8524_v53  ;;  %5241 = vmatprep.subr.bf16.mxu1 %v8526_v57 }
 0xce0   :  { %5201 = vmatpush1.bf16.msra.mxu0 %v8528_v16  ;;  %5242 = vmatpush1.bf16.msra.mxu1 %v8530_v39 }
 0xce1   :  { %5202 = vmatprep.subr.bf16.mxu0 %v8538_v14  ;;  %5243 = vmatprep.subr.bf16.mxu1 %v8542_v3 }
 0xce4   :  { %5203 = vmatpush1.bf16.msra.mxu0 %v8536_v12  ;;  %5244 = vmatpush1.bf16.msra.mxu1 %v8540_v45 }
 0xce5   :  { %5204 = vmatprep.subr.bf16.mxu0 %v8544_v49  ;;  %5245 = vmatprep.subr.bf16.mxu1 %v8547_v32 }
 0xce8   :  { %5205 = vmatpush1.bf16.msra.mxu0 %v8551_v47  ;;  %5246 = vmatpush1.bf16.msra.mxu1 %v8555_v56 }
 0xce9   :  { %5206 = vmatprep.subr.bf16.mxu0 %v8557_v1  ;;  %5247 = vmatprep.subr.bf16.mxu1 %v8560_v20 }
 0xcec   :  { %5207 = vmatpush1.bf16.msra.mxu0 %v8563_v24  ;;  %5248 = vmatpush1.bf16.msra.mxu1 %v8567_v26 }
 0xced   :  { %5208 = vmatprep.subr.bf16.mxu0 %v8569_v28  ;;  %5249 = vmatprep.subr.bf16.mxu1 %v8572_v6 }
 0xcf0   :  { %5209 = vmatpush1.bf16.msra.mxu0 %v8575_v29  ;;  %5250 = vmatpush1.bf16.msra.mxu1 %v8579_v21 }
 0xcf1   :  { %5505 = vmatprep.subr.bf16.mxu0 %v8488_v54  ;;  %5546 = vmatprep.subr.bf16.mxu1 %v8490_v48 }
 0xda6   :  { %v4917_v59 = vpop.f32.mrb[80].mxu0  ;;  %v4958_v50 = vpop.f32.mrb[80].mxu1 }
 0xda7   :  { %v4965_v17 = vadd.f32 %v4917_v59, %v3316_v44  ;;  %v4967_v0 = vadd.f32 %v4958_v50, %v3389_v41  ;;  %v4919_v18 = vpop.f32.mrb[81].mxu0  ;;  %v4960_v13 = vpop.f32.mrb[81].mxu1 }
 0xda8   :  { %v4966_v23 = vadd.f32 %v4919_v18, %v3318_v46  ;;  %v4968_v35 = vadd.f32 %v4960_v13, %v3391_v4  ;;  %v4921_v27 = vpop.f32.mrb[82].mxu0  ;;  %v4962_v7 = vpop.f32.mrb[82].mxu1 }
 0xda9   :  { %v6570_v31 = vmul.f32 -1.442695, %v4965_v17  ;;  %v4922_v10 = vpop.f32.mrb[83].mxu0  ;;  %v4963_v22 = vpop.f32.mrb[83].mxu1  ;;  %v8876_v27 = vld [vmem:[#allocation31_spill] sm:$0xff] }
 0xdaa   :  { %v6571_v36 = vmul.f32 -1.442695, %v4966_v23  ;;  %v6572_v38 = vmul.f32 -1.442695, %v4968_v35  ;;  %v8875_v23 = vld [vmem:[#allocation30_spill] sm:$0xff]  ;;  %v3322_v7 = vadd.f32 %v8876_v27, %v8379_v61 }
 0xdab   :  { %7219 = vpow2.f32 %v6570_v31  ;;  %v3393_v35 = vadd.f32 %v8875_v23, %v8371_v19  ;;  %v8877_v31 = vld [vmem:[#allocation32_spill] sm:$0xff] }
 0xdac   :  { %7221 = vpow2.f32 %v6571_v36  ;;  %v3395_v10 = vadd.f32 %v8877_v31, %v8383_v15 }
 0xdad   :  { %7223 = vpow2.f32 %v6572_v38 }
 0xdae   :  { %7225 = vtanh.f32 %v4967_v0 }
 0xdb5   :  { %v7220_v51 = vpop.eup %7219 }
 0xdb6   :  { %v7222_v5 = vpop.eup %7221  ;;  %v4972_v2 = vadd.f32 1.0, %v7220_v51 }
 0xdb7   :  { %v4978_v25 = vadd.f32 1.0, %v7222_v5  ;;  %v7224_v44 = vpop.eup %7223 }
 0xdb8   :  { %7227 = vrcp.f32 %v4972_v2  ;;  %v7226_v40 = vpop.eup %7225  ;;  %v4985_v62 = vadd.f32 1.0, %v7224_v44 }
 0xdb9   :  { %7229 = vrcp.f32 %v4978_v25 }
 0xdba   :  { %7231 = vrcp.f32 %v4985_v62 }
 0xdc2   :  { %v7228_v41 = vpop.eup %7227 }
 0xdc3   :  { %v7230_v43 = vpop.eup %7229  ;;  %v4990_v46 = vmul.f32 %v7228_v41, %v7226_v40 }
 0xdc4   :  { %v4989_v4 = vmul.f32 %v7230_v43, %v8595_v37  ;;  %v7232_v50 = vpop.eup %7231  ;;  %v8874_v37 = vld [vmem:[#allocation29_spill] sm:$0xff] }
 0xdc5   :  { %v3320_v13 = vadd.f32 %v8874_v37, %v8367_v33 }
 0xdc6   :  { %v8641_v59 = vadd.f32 %v4990_v46, %v4989_v4 }
 0xdc8   :  { %7233 = vtanh.f32 %v8641_v59 }
 0xdd2   :  { %v7234_v17 = vpop.eup %7233 }
 0xdd3   :  { %v4993_v18 = vmul.f32 %v7234_v17, %v7232_v50 }
 0xdd5   :  { %v5001_v0 = vpack.c.bf16 %v4993_v18, %v4993_v18 }
 0xdd7   :  { %5227 = vmatmul.mubr.bf16.vlgmr.msra.gmra.mrb[84].mxu0 %v5001_v0  ;;  %5268 = vmatmul.mubr.bf16.vlgmr.msra.gmra.mrb[84].mxu1 %v5001_v0 }
 0xdd8   :  { %5506 = vmatpush1.bf16.msra.mxu0 %v8492_v30  ;;  %5547 = vmatpush1.bf16.msra.mxu1 %v8494_v55 }
 0xdd9   :  { %5507 = vmatprep.subr.bf16.mxu0 %v8500_v52  ;;  %5548 = vmatprep.subr.bf16.mxu1 %v8502_v63 }
 0xdda   :  { %5537 = vmatprep.mubr.bf16.mxu0 %v8812_v11  ;;  %5578 = vmatprep.mubr.bf16.mxu1 %v8812_v11 }
 0xddc   :  { %5508 = vmatpush1.bf16.msra.mxu0 %v8504_v9  ;;  %5549 = vmatpush1.bf16.msra.mxu1 %v8506_v42 }
 0xddd   :  { %5509 = vmatprep.subr.bf16.mxu0 %v8512_v60  ;;  %5550 = vmatprep.subr.bf16.mxu1 %v8514_v34 }
 0xde0   :  { %5510 = vmatpush1.bf16.msra.mxu0 %v8516_v8  ;;  %5551 = vmatpush1.bf16.msra.mxu1 %v8518_v58 }
 0xde1   :  { %5511 = vmatprep.subr.bf16.mxu0 %v8524_v53  ;;  %5552 = vmatprep.subr.bf16.mxu1 %v8526_v57 }
 0xde4   :  { %5512 = vmatpush1.bf16.msra.mxu0 %v8528_v16  ;;  %5553 = vmatpush1.bf16.msra.mxu1 %v8530_v39 }
 0xde5   :  { %5513 = vmatprep.subr.bf16.mxu0 %v8538_v14  ;;  %5554 = vmatprep.subr.bf16.mxu1 %v8542_v3 }
 0xde8   :  { %5514 = vmatpush1.bf16.msra.mxu0 %v8536_v12  ;;  %5555 = vmatpush1.bf16.msra.mxu1 %v8540_v45 }
 0xde9   :  { %5515 = vmatprep.subr.bf16.mxu0 %v8544_v49  ;;  %5556 = vmatprep.subr.bf16.mxu1 %v8547_v32 }
 0xdec   :  { %5516 = vmatpush1.bf16.msra.mxu0 %v8551_v47  ;;  %5557 = vmatpush1.bf16.msra.mxu1 %v8555_v56 }
 0xded   :  { %5517 = vmatprep.subr.bf16.mxu0 %v8557_v1  ;;  %5558 = vmatprep.subr.bf16.mxu1 %v8560_v20 }
 0xdf0   :  { %5518 = vmatpush1.bf16.msra.mxu0 %v8563_v24  ;;  %5559 = vmatpush1.bf16.msra.mxu1 %v8567_v26 }
 0xdf1   :  { %5519 = vmatprep.subr.bf16.mxu0 %v8569_v28  ;;  %5560 = vmatprep.subr.bf16.mxu1 %v8572_v6 }
 0xdf4   :  { %5520 = vmatpush1.bf16.msra.mxu0 %v8575_v29  ;;  %5561 = vmatpush1.bf16.msra.mxu1 %v8579_v21 }
 0xdf5   :  { %5816 = vmatprep.subr.bf16.mxu0 %v8488_v54  ;;  %5857 = vmatprep.subr.bf16.mxu1 %v8490_v48 }
 0xeaa   :  { %v5228_v22 = vpop.f32.mrb[84].mxu0  ;;  %v5269_v36 = vpop.f32.mrb[84].mxu1 }
 0xeab   :  { %v5276_v38 = vadd.f32 %v5228_v22, %v3320_v13  ;;  %v5278_v51 = vadd.f32 %v5269_v36, %v3393_v35  ;;  %v5230_v5 = vpop.f32.mrb[85].mxu0  ;;  %v5271_v54 = vpop.f32.mrb[85].mxu1 }
 0xeac   :  { %v5277_v2 = vadd.f32 %v5230_v5, %v3322_v7  ;;  %v5279_v48 = vadd.f32 %v5271_v54, %v3395_v10  ;;  %v5232_v25 = vpop.f32.mrb[86].mxu0  ;;  %v5273_v44 = vpop.f32.mrb[86].mxu1 }
 0xead   :  { %v6605_v40 = vmul.f32 -1.442695, %v5276_v38  ;;  %v5233_v41 = vpop.f32.mrb[87].mxu0  ;;  %v5274_v43 = vpop.f32.mrb[87].mxu1 }
 0xeae   :  { %v6606_v46 = vmul.f32 -1.442695, %v5277_v2  ;;  %v6607_v62 = vmul.f32 -1.442695, %v5279_v48  ;;  %v7408_v41 = vmov 0.0   ;;  %v7020_v43 = vld [vmem:[%s8777_s7 + $0x8] sm:$0xff]  }
 0xeaf   :  { %7235 = vpow2.f32 %v6605_v40  ;;  %v7019_v40 = vld [vmem:[%s8777_s7] sm:$0xff]  }
 0xeb0   :  { %7237 = vpow2.f32 %v6606_v46  ;;  %v7021_v46 = vld [vmem:[%s8777_s7 + $0x10] sm:$0xff]  }
 0xeb1   :  { %7239 = vpow2.f32 %v6607_v62  ;;  %v7022_v62 = vld [vmem:[%s8777_s7 + $0x18] sm:$0xff]  }
 0xeb2   :  { %7241 = vtanh.f32 %v5278_v51 }
 0xeb9   :  { %v7236_v4 = vpop.eup %7235 }
 0xeba   :  { %v7238_v50 = vpop.eup %7237  ;;  %v5283_v17 = vadd.f32 1.0, %v7236_v4  ;;  %v7023_v4 = vld [vmem:[%s8777_s7 + $0x20] sm:$0xff]  }
 0xebb   :  { %v5289_v18 = vadd.f32 1.0, %v7238_v50  ;;  %v7240_v0 = vpop.eup %7239  ;;  %v7024_v50 = vld [vmem:[%s8777_s7 + $0x28] sm:$0xff]  }
 0xebc   :  { %7243 = vrcp.f32 %v5283_v17  ;;  %v7242_v37 = vpop.eup %7241  ;;  %v5296_v27 = vadd.f32 1.0, %v7240_v0  ;;  %v7025_v17 = vld [vmem:[%s8777_s7 + $0x30] sm:$0xff]   ;;  %v8882_v0 = vld [vmem:[#allocation37_spill] sm:$0xff] }
 0xebd   :  { %7245 = vrcp.f32 %v5289_v18  ;;  %v7026_v18 = vld [vmem:[%s8777_s7 + $0x38] sm:$0xff]  }
 0xebe   :  { %7247 = vrcp.f32 %v5296_v27 }
 0xec6   :  { %v7244_v13 = vpop.eup %7243 }
 0xec7   :  { %v7246_v23 = vpop.eup %7245  ;;  %v5301_v35 = vmul.f32 %v7244_v13, %v7242_v37  ;;  %v3330_v37 = vadd.f32 %v8882_v0, %v8367_v33  ;;  %v8883_v13 = vld [vmem:[#allocation38_spill] sm:$0xff] }
 0xec8   :  { %v5300_v7 = vmul.f32 %v7246_v23, %v8641_v59  ;;  %v7248_v10 = vpop.eup %7247  ;;  %v3403_v23 = vadd.f32 %v8883_v13, %v8371_v19 }
 0xeca   :  { %v8687_v31 = vadd.f32 %v5301_v35, %v5300_v7  ;;  %v8884_v35 = vld [vmem:[#allocation17_spill] sm:$0xff]  ;;  %v8885_v7 = vld [vmem:[#allocation39_spill] sm:$0xff] }
 0xecb   :  { %v3332_v27 = vadd.f32 %v8884_v35, %v8379_v61 }
 0xecc   :  { %7249 = vtanh.f32 %v8687_v31 }
 0xed6   :  { %v7250_v22 = vpop.eup %7249 }
 0xed7   :  { %v5304_v36 = vmul.f32 %v7250_v22, %v7248_v10 }
 0xed9   :  { %v5312_v38 = vpack.c.bf16 %v5304_v36, %v5304_v36 }
 0xedb   :  { %5538 = vmatmul.mubr.bf16.vlgmr.msra.gmra.mrb[88].mxu0 %v5312_v38  ;;  %5579 = vmatmul.mubr.bf16.vlgmr.msra.gmra.mrb[88].mxu1 %v5312_v38 }
 0xedc   :  { %5817 = vmatpush1.bf16.msra.mxu0 %v8492_v30  ;;  %5858 = vmatpush1.bf16.msra.mxu1 %v8494_v55  ;;  %v8879_v55 = vld [vmem:[#allocation34_spill] sm:$0xff] }
 0xedd   :  { %5818 = vmatprep.subr.bf16.mxu0 %v8500_v52  ;;  %5859 = vmatprep.subr.bf16.mxu1 %v8502_v63  ;;  %v3399_v52 = vadd.f32 %v8879_v55, %v8371_v19  ;;  %v8880_v63 = vld [vmem:[#allocation35_spill] sm:$0xff] }
 0xede   :  { %5848 = vmatprep.mubr.bf16.mxu0 %v8812_v11  ;;  %5889 = vmatprep.mubr.bf16.mxu1 %v8812_v11  ;;  %v8878_v11 = vld [vmem:[#allocation33_spill] sm:$0xff] }
 0xedf   :  { %v3326_v30 = vadd.f32 %v8878_v11, %v8367_v33 }
 0xee0   :  { %5819 = vmatpush1.bf16.msra.mxu0 %v8504_v9  ;;  %5860 = vmatpush1.bf16.msra.mxu1 %v8506_v42  ;;  %v3328_v9 = vadd.f32 %v8880_v63, %v8379_v61  ;;  %v8881_v42 = vld [vmem:[#allocation36_spill] sm:$0xff] }
 0xee1   :  { %5820 = vmatprep.subr.bf16.mxu0 %v8512_v60  ;;  %5861 = vmatprep.subr.bf16.mxu1 %v8514_v34  ;;  %v3401_v60 = vadd.f32 %v8881_v42, %v8383_v15 }
 0xee4   :  { %5821 = vmatpush1.bf16.msra.mxu0 %v8516_v8  ;;  %5862 = vmatpush1.bf16.msra.mxu1 %v8518_v58 }
 0xee5   :  { %5822 = vmatprep.subr.bf16.mxu0 %v8524_v53  ;;  %5863 = vmatprep.subr.bf16.mxu1 %v8526_v57 }
 0xee8   :  { %5823 = vmatpush1.bf16.msra.mxu0 %v8528_v16  ;;  %5864 = vmatpush1.bf16.msra.mxu1 %v8530_v39 }
 0xee9   :  { %5824 = vmatprep.subr.bf16.mxu0 %v8538_v14  ;;  %5865 = vmatprep.subr.bf16.mxu1 %v8542_v3 }
 0xeec   :  { %5825 = vmatpush1.bf16.msra.mxu0 %v8536_v12  ;;  %5866 = vmatpush1.bf16.msra.mxu1 %v8540_v45 }
 0xeed   :  { %5826 = vmatprep.subr.bf16.mxu0 %v8544_v49  ;;  %5867 = vmatprep.subr.bf16.mxu1 %v8547_v32 }
 0xef0   :  { %5827 = vmatpush1.bf16.msra.mxu0 %v8551_v47  ;;  %5868 = vmatpush1.bf16.msra.mxu1 %v8555_v56 }
 0xef1   :  { %5828 = vmatprep.subr.bf16.mxu0 %v8557_v1  ;;  %5869 = vmatprep.subr.bf16.mxu1 %v8560_v20 }
 0xef4   :  { %5829 = vmatpush1.bf16.msra.mxu0 %v8563_v24  ;;  %5870 = vmatpush1.bf16.msra.mxu1 %v8567_v26 }
 0xef5   :  { %5830 = vmatprep.subr.bf16.mxu0 %v8569_v28  ;;  %5871 = vmatprep.subr.bf16.mxu1 %v8572_v6 }
 0xef8   :  { %5831 = vmatpush1.bf16.msra.mxu0 %v8575_v29  ;;  %5872 = vmatpush1.bf16.msra.mxu1 %v8579_v21 }
 0xef9   :  { %6696 = vmatprep.subr.bf16.mxu0 %v7408_v41 }
 0xfae   :  { %v5539_v34 = vpop.f32.mrb[88].mxu0  ;;  %v5580_v8 = vpop.f32.mrb[88].mxu1 }
 0xfaf   :  { %v5587_v58 = vadd.f32 %v5539_v34, %v3326_v30  ;;  %v5589_v53 = vadd.f32 %v5580_v8, %v3399_v52  ;;  %v5541_v57 = vpop.f32.mrb[89].mxu0  ;;  %v5582_v16 = vpop.f32.mrb[89].mxu1 }
 0xfb0   :  { %v5588_v39 = vadd.f32 %v5541_v57, %v3328_v9  ;;  %v5590_v12 = vadd.f32 %v5582_v16, %v3401_v60  ;;  %v5543_v14 = vpop.f32.mrb[90].mxu0  ;;  %v5584_v45 = vpop.f32.mrb[90].mxu1 }
 0xfb1   :  { %v6640_v3 = vmul.f32 -1.442695, %v5587_v58  ;;  %v5544_v49 = vpop.f32.mrb[91].mxu0  ;;  %v5585_v32 = vpop.f32.mrb[91].mxu1 }
 0xfb2   :  { %v6641_v47 = vmul.f32 -1.442695, %v5588_v39  ;;  %v6642_v56 = vmul.f32 -1.442695, %v5590_v12 }
 0xfb3   :  { %7251 = vpow2.f32 %v6640_v3 }
 0xfb4   :  { %7253 = vpow2.f32 %v6641_v47 }
 0xfb5   :  { %7255 = vpow2.f32 %v6642_v56 }
 0xfb6   :  { %7257 = vtanh.f32 %v5589_v53 }
 0xfbd   :  { %v7252_v1 = vpop.eup %7251 }
 0xfbe   :  { %v7254_v20 = vpop.eup %7253  ;;  %v5594_v24 = vadd.f32 1.0, %v7252_v1  ;;  %v6678_v1 = vld [vmem:[#allocation13] ss:$0 sm:$0xff] }
 0xfbf   :  { %v5600_v26 = vadd.f32 1.0, %v7254_v20  ;;  %v7256_v28 = vpop.eup %7255 }
 0xfc0   :  { %7259 = vrcp.f32 %v5594_v24  ;;  %v7258_v6 = vpop.eup %7257  ;;  %v5607_v51 = vadd.f32 1.0, %v7256_v28 }
 0xfc1   :  { %7261 = vrcp.f32 %v5600_v26 }
 0xfc2   :  { %7263 = vrcp.f32 %v5607_v51 }
 0xfca   :  { %v7260_v29 = vpop.eup %7259 }
 0xfcb   :  { %v7262_v21 = vpop.eup %7261  ;;  %v5612_v59 = vmul.f32 %v7260_v29, %v7258_v6 }
 0xfcc   :  { %v5611_v5 = vmul.f32 %v7262_v21, %v8687_v31  ;;  %v7264_v2 = vpop.eup %7263  ;;  %v3405_v31 = vadd.f32 %v8885_v7, %v8383_v15 }
 0xfce   :  { %v8731_v54 = vadd.f32 %v5612_v59, %v5611_v5 }
 0xfd0   :  { %7265 = vtanh.f32 %v8731_v54 }
 0xfda   :  { %v7266_v48 = vpop.eup %7265 }
 0xfdb   :  { %v5615_v25 = vmul.f32 %v7266_v48, %v7264_v2 }
 0xfdd   :  { %v5623_v44 = vpack.c.bf16 %v5615_v25, %v5615_v25 }
 0xfdf   :  { %5849 = vmatmul.mubr.bf16.vlgmr.msra.gmra.mrb[92].mxu0 %v5623_v44  ;;  %5890 = vmatmul.mubr.bf16.vlgmr.msra.gmra.mrb[92].mxu1 %v5623_v44 }
 0xfe0   :  { %6697 = vmatpush3.bf16.msra.mxu0 %v7019_v40  ;;  %6712 = vmatprep.mubr.msk.bf16.mxu0 %vm7409_vm0, %v7408_v41 }
 0xfe1   :  { %6698 = vmatprep.subr.bf16.mxu0 %v7408_v41 }
 0xfe4   :  { %6699 = vmatpush3.bf16.msra.mxu0 %v7020_v43 }
 0xfe5   :  { %6700 = vmatprep.subr.bf16.mxu0 %v7408_v41 }
 0xfe8   :  { %6701 = vmatpush3.bf16.msra.mxu0 %v7021_v46 }
 0xfe9   :  { %6702 = vmatprep.subr.bf16.mxu0 %v7408_v41 }
 0xfec   :  { %6703 = vmatpush3.bf16.msra.mxu0 %v7022_v62 }
 0xfed   :  { %6704 = vmatprep.subr.bf16.mxu0 %v7408_v41 }
 0xff0   :  { %6705 = vmatpush3.bf16.msra.mxu0 %v7023_v4 }
 0xff1   :  { %6706 = vmatprep.subr.bf16.mxu0 %v7408_v41 }
 0xff4   :  { %6707 = vmatpush3.bf16.msra.mxu0 %v7024_v50 }
 0xff5   :  { %6708 = vmatprep.subr.bf16.mxu0 %v7408_v41 }
 0xff8   :  { %6709 = vmatpush3.bf16.msra.mxu0 %v7025_v17 }
 0xff9   :  { %6710 = vmatprep.subr.bf16.mxu0 %v7408_v41 }
 0xffc   :  { %6711 = vmatpush3.bf16.msra.mxu0 %v7026_v18 }
0x10b2   :  { %v5850_v10 = vpop.f32.mrb[92].mxu0  ;;  %v5891_v22 = vpop.f32.mrb[92].mxu1 }
0x10b3   :  { %v5898_v36 = vadd.f32 %v5850_v10, %v3330_v37  ;;  %v5900_v38 = vadd.f32 %v5891_v22, %v3403_v23  ;;  %v5852_v11 = vpop.f32.mrb[93].mxu0  ;;  %v5893_v30 = vpop.f32.mrb[93].mxu1 }
0x10b4   :  { %v5899_v55 = vadd.f32 %v5852_v11, %v3332_v27  ;;  %v5901_v52 = vadd.f32 %v5893_v30, %v3405_v31  ;;  %v5854_v63 = vpop.f32.mrb[94].mxu0  ;;  %v5895_v9 = vpop.f32.mrb[94].mxu1 }
0x10b5   :  { %v6675_v33 = vmul.f32 -1.442695, %v5898_v36  ;;  %v5855_v42 = vpop.f32.mrb[95].mxu0  ;;  %v5896_v60 = vpop.f32.mrb[95].mxu1 }
0x10b6   :  { %v6676_v19 = vmul.f32 -1.442695, %v5899_v55  ;;  %v6677_v61 = vmul.f32 -1.442695, %v5901_v52 }
0x10b7   :  { %7267 = vpow2.f32 %v6675_v33 }
0x10b8   :  { %7269 = vpow2.f32 %v6676_v19 }
0x10b9   :  { %7271 = vpow2.f32 %v6677_v61 }
0x10ba   :  { %7273 = vtanh.f32 %v5900_v38 }
0x10c1   :  { %v7268_v34 = vpop.eup %7267 }
0x10c2   :  { %v7270_v8 = vpop.eup %7269  ;;  %v5905_v15 = vadd.f32 1.0, %v7268_v34 }
0x10c3   :  { %v5911_v58 = vadd.f32 1.0, %v7270_v8  ;;  %v7272_v53 = vpop.eup %7271 }
0x10c4   :  { %7275 = vrcp.f32 %v5905_v15  ;;  %v7274_v57 = vpop.eup %7273  ;;  %v5918_v14 = vadd.f32 1.0, %v7272_v53 }
0x10c5   :  { %7277 = vrcp.f32 %v5911_v58 }
0x10c6   :  { %7279 = vrcp.f32 %v5918_v14 }
0x10ce   :  { %v7276_v16 = vpop.eup %7275 }
0x10cf   :  { %v7278_v39 = vpop.eup %7277  ;;  %v5923_v12 = vmul.f32 %v7276_v16, %v7274_v57 }
0x10d0   :  { %v5922_v45 = vmul.f32 %v7278_v39, %v8731_v54  ;;  %v7280_v49 = vpop.eup %7279 }
0x10d2   :  { %v5924_v3 = vadd.f32 %v5923_v12, %v5922_v45 }
0x10d4   :  { %7281 = vtanh.f32 %v5924_v3 }
0x10de   :  { %v7282_v32 = vpop.eup %7281 }
0x10df   :  { %v5926_v47 = vmul.f32 %v7282_v32, %v7280_v49 }
0x10e1   :  { %v5930_v56 = vpack.c.bf16 %v5926_v47, %v5926_v47 }
0x10e3   :  { %6713 = vmatmul.mubr.bf16.vlgmr.msra.gmra.mrb[96].mxu0 %v5930_v56 }
0x11b6   :  { %v6036_v20 = vpop.f32.mrb[96].mxu0 }
0x11b7   :  { %v6037_v24 = vadd.f32 %v6678_v1, %v6036_v20  ;;  %v6714_v26 = vpop.f32.mrb[97].mxu0 }
0x11b8   :  { %v6039_v28 = vpop.f32.mrb[98].mxu0 }
0x11b9   :  { %6042 = vst [vmem:[%s8779_s9] sm:$0xff] %v6037_v24  ;;  %v6715_v6 = vpop.f32.mrb[99].mxu0 }
0x11ba   :  { %6047 = vsyncpa [#allocation7], 1 }
0x11bb   :  { %6048 = vsyncpa [#allocation9], 1 }
0x11bc   :  { %6049 = vsyncpa [#allocation12], 1 }

</bundles_post_ra>
